<compile_context>
chip_gen: v5e
topology: v5e:2x2
jax: 0.10.0
libtpu: 0.0.40
codegen_flags: <defaults>
</compile_context>

<pallas_src>
import math
import functools

import jax
import jax.numpy as jnp
from jax import lax
from jax.experimental import pallas as pl
from jax.experimental.pallas import tpu as pltpu


# ---------------------------------------------------------------------------
# Pallas kernel: full encoder, one grid step = one (batch block, layer)
# ---------------------------------------------------------------------------
def _tener_encoder_kernel(x_ref, mask_ref, qc_ref, qs_ref, psct_ref, pcst_ref,
                          wq_ref, wv_ref, rrb_ref, rwb_ref,
                          g1_ref, b1_ref, wff_ref, bff_ref, g2_ref, b2_ref,
                          out_ref, *, n_head, inv_scale):
    f32, bf16 = jnp.float32, jnp.bfloat16
    _, L, D = out_ref.shape
    H = n_head
    hd = D // H
    layer = pl.program_id(1)

    # Layer 0 of each batch block: load the encoder input into the resident activation.
    @pl.when(layer == 0)
    def _():
        out_ref[...] = x_ref[...]

    cur = out_ref[0]                                   # [L, D] f32 activation entering this layer
    cur_b = cur.astype(bf16)

    # qv_linear (no bias), split into two lane-dense [D, D] matmuls (bf16 in, f32 accumulate).
    q = jnp.dot(cur_b, wq_ref[0], preferred_element_type=f32)     # [L, D]
    v = jnp.dot(cur_b, wv_ref[0], preferred_element_type=f32)     # [L, D]

    def split_heads(t):                                # [L, D] -> [H, L, hd] (128-lane aligned)
        return jnp.stack([t[:, h * hd:(h + 1) * hd] for h in range(H)], axis=0)

    qh = split_heads(q)                                # [H, L, hd]
    vh = split_heads(v)                                # [H, L, hd]
    kh = split_heads(cur)                              # keys are the raw layer input (as in torch)

    rr = rrb_ref[0]                                    # [H, hd]  r_r_bias -> content term
    rw = rwb_ref[0]                                    # [H, hd]  r_w_bias -> position term

    # Content term AC[h,q,k] = (q + r_r_bias) . k  — one batched MXU matmul over all heads.
    AC = jnp.einsum('hqd,hkd->hqk',
                    (qh + rr[:, None, :]).astype(bf16), kh.astype(bf16),
                    preferred_element_type=f32)        # [H, L, L]

    # Position term BD[h,q,k] = (q + r_w_bias) . sinusoid(k - q), via the trig identity:
    # two MXU matmuls against tiny tables instead of an [L,L,hd] relpos tensor + _shift gather.
    qw = qh + rw[:, None, :]                           # [H, L, hd]
    qc = (qw * qc_ref[...][None]).astype(bf16).reshape(H * L, hd)
    qs = (qw * qs_ref[...][None]).astype(bf16).reshape(H * L, hd)
    BD = (jnp.dot(qc, psct_ref[...], preferred_element_type=f32) +
          jnp.dot(qs, pcst_ref[...], preferred_element_type=f32)).reshape(H, L, L)

    attn = (AC + BD) * inv_scale
    key_pad = mask_ref[...] == 0.0                     # [1, 1, L]
    attn = jnp.where(key_pad, -1e30, attn)             # finite mask value: no -inf NaN edge case
    attn = attn - jnp.max(attn, axis=-1, keepdims=True)
    p = jnp.exp(attn)
    p = p * pl.reciprocal(jnp.sum(p, axis=-1, keepdims=True), approx=True)
    # TODO(synk): attention-map dropout omitted (eval-mode identity).

    pv = jnp.einsum('hqk,hkd->hqd', p.astype(bf16), vh.astype(bf16),
                    preferred_element_type=f32)        # [H, L, hd]
    att = jnp.concatenate([pv[h] for h in range(H)], axis=-1)      # [L, D]
    # Padded query rows are left as computed, matching the torch reference (only keys are masked).

    # Residual + LayerNorm1
    x1 = cur + att
    mu1 = jnp.mean(x1, axis=-1, keepdims=True)
    var1 = jnp.mean((x1 - mu1) ** 2, axis=-1, keepdims=True)
    x1 = (x1 - mu1) * lax.rsqrt(var1 + 1e-5) * g1_ref[0] + b1_ref[0]

    # FFN (Linear -> ReLU -> Dropout(identity)) + residual + LayerNorm2
    ffn = jnp.dot(x1.astype(bf16), wff_ref[0], preferred_element_type=f32) + bff_ref[0]
    ffn = jnp.maximum(ffn, 0.0)
    # TODO(synk): FFN dropout omitted (eval-mode identity).
    x2 = x1 + ffn
    mu2 = jnp.mean(x2, axis=-1, keepdims=True)
    var2 = jnp.mean((x2 - mu2) ** 2, axis=-1, keepdims=True)
    out_ref[0] = (x2 - mu2) * lax.rsqrt(var2 + 1e-5) * g2_ref[0] + b2_ref[0]


# ---------------------------------------------------------------------------
# Wrapper: stack per-layer params, build sinusoid tables, launch one fused pallas_call
# ---------------------------------------------------------------------------
def transformer_encoder(x, mask, layer_params, *, n_head, scale=False):
    """x: [B, L, D] float, mask: [B, L] (1 = valid token, 0 = pad). pos_embed=None (default)."""
    B, L, D = x.shape
    H = n_head
    assert D % H == 0
    hd = D // H
    assert hd % 2 == 0
    NL = len(layer_params)
    inv_scale = 1.0 / (math.sqrt(hd) if scale else 1.0)

    stk = lambda i: jnp.stack([p[i] for p in layer_params])
    wq = stk(0).astype(jnp.bfloat16)        # [NL, D, D]
    wv = stk(1).astype(jnp.bfloat16)        # [NL, D, D]
    rrb = stk(2)                            # [NL, H, hd]
    rwb = stk(3)                            # [NL, H, hd]
    g1 = stk(4)                             # [NL, 1, D]
    b1 = stk(5)
    wff = stk(6).astype(jnp.bfloat16)       # [NL, D, D]
    bff = stk(7)                            # [NL, 1, D]
    g2 = stk(8)
    b2 = stk(9)

    # Sinusoid tables — same frequencies as RelativeSinusoidalPositionalEmbedding.
    half = hd // 2
    s = math.log(10000.0) / (half - 1)
    freqs = jnp.exp(jnp.arange(half, dtype=jnp.float32) * -s)            # [half]
    ang = jnp.arange(L, dtype=jnp.float32)[:, None] * freqs[None, :]     # [L, half]
    sn, cs = jnp.sin(ang), jnp.cos(ang)
    qc_tab = jnp.concatenate([cs, cs], axis=1)                           # [L, hd]
    qs_tab = jnp.concatenate([-sn, sn], axis=1)                          # [L, hd]
    psct = jnp.concatenate([sn, cs], axis=1).T.astype(jnp.bfloat16)      # [hd, L]
    pcst = jnp.concatenate([cs, sn], axis=1).T.astype(jnp.bfloat16)      # [hd, L]

    x_f = x.astype(jnp.float32)
    mask3 = mask.astype(jnp.float32).reshape(B, 1, L)

    kernel = functools.partial(_tener_encoder_kernel, n_head=H, inv_scale=inv_scale)

    batch_map = lambda b, l: (b, 0, 0)
    layer_map = lambda b, l: (l, 0, 0)
    shared2d = lambda b, l: (0, 0)

    in_specs = [
        pl.BlockSpec((1, L, D), batch_map),        # x (read at layer 0)
        pl.BlockSpec((1, 1, L), batch_map),        # mask
        pl.BlockSpec((L, hd), shared2d),           # qc_tab
        pl.BlockSpec((L, hd), shared2d),           # qs_tab
        pl.BlockSpec((hd, L), shared2d),           # psct
        pl.BlockSpec((hd, L), shared2d),           # pcst
        pl.BlockSpec((1, D, D), layer_map),        # wq
        pl.BlockSpec((1, D, D), layer_map),        # wv
        pl.BlockSpec((1, H, hd), layer_map),       # r_r_bias
        pl.BlockSpec((1, H, hd), layer_map),       # r_w_bias
        pl.BlockSpec((1, 1, D), layer_map),        # LN1 gamma
        pl.BlockSpec((1, 1, D), layer_map),        # LN1 beta
        pl.BlockSpec((1, D, D), layer_map),        # FFN weight
        pl.BlockSpec((1, 1, D), layer_map),        # FFN bias
        pl.BlockSpec((1, 1, D), layer_map),        # LN2 gamma
        pl.BlockSpec((1, 1, D), layer_map),        # LN2 beta
    ]

    out = pl.pallas_call(
        kernel,
        out_shape=jax.ShapeDtypeStruct((B, L, D), jnp.float32),
        grid=(B, NL),
        in_specs=in_specs,
        out_specs=pl.BlockSpec((1, L, D), batch_map),   # resident across the layer axis
        compiler_params=pltpu.CompilerParams(
            dimension_semantics=("parallel", "arbitrary"),
            vmem_limit_bytes=32 * 1024 * 1024),
    )(x_f, mask3, qc_tab, qs_tab, psct, pcst,
      wq, wv, rrb, rwb, g1, b1, wff, bff, g2, b2)
    return out


# ---------------------------------------------------------------------------
# Parameter init (mirrors the PyTorch module's parameter shapes)
# ---------------------------------------------------------------------------
def _init_layer_params(key, D, H):
    hd = D // H
    ks = jax.random.split(key, 6)
    wq = jax.random.normal(ks[0], (D, D), jnp.float32) / math.sqrt(D)    # qv_linear, q half
    wv = jax.random.normal(ks[1], (D, D), jnp.float32) / math.sqrt(D)    # qv_linear, v half
    xav = math.sqrt(2.0 / (H + hd))
    rrb = jax.random.normal(ks[2], (H, hd), jnp.float32) * xav           # r_r_bias
    rwb = jax.random.normal(ks[3], (H, hd), jnp.float32) * xav           # r_w_bias
    g1 = jnp.ones((1, D), jnp.float32)                                   # LayerNorm1
    b1 = jnp.zeros((1, D), jnp.float32)
    wff = jax.random.normal(ks[4], (D, D), jnp.float32) / math.sqrt(D)   # FFN linear
    bff = (jax.random.uniform(ks[5], (1, D), jnp.float32) - 0.5) / math.sqrt(D)
    g2 = jnp.ones((1, D), jnp.float32)                                   # LayerNorm2
    b2 = jnp.zeros((1, D), jnp.float32)
    return (wq, wv, rrb, rwb, g1, b1, wff, bff, g2, b2)


if __name__ == "__main__":
    B, L, D, H, num_layers = 2, 8, 512, 4, 2

    key = jax.random.PRNGKey(0)
    kx, k0, k1 = jax.random.split(key, 3)
    x = jax.random.normal(kx, (B, L, D), jnp.float32)
    # batch 0 fully valid; batch 1 has its last 2 positions padded
    mask = jnp.ones((B, L), jnp.float32).at[1, 6:].set(0.0)

    layer_params = [_init_layer_params(k, D, H) for k in (k0, k1)[:num_layers]]

    out = transformer_encoder(x, mask, layer_params, n_head=H, scale=False)
    out = jax.block_until_ready(out)

    assert out.shape == (B, L, D)
    assert bool(jnp.all(jnp.isfinite(out)))
    print("KERNEL_OK")
</pallas_src>

<mosaic_0001>
module attributes {stable_mosaic.version = 11 : i64} {
  func.func @_tener_encoder_kernel(%arg0: i32, %arg1: i32, %arg2: memref<1x8x512xf32, #tpu.memory_space<vmem>>, %arg3: memref<1x1x8xf32, #tpu.memory_space<vmem>>, %arg4: memref<8x128xf32, #tpu.memory_space<vmem>>, %arg5: memref<8x128xf32, #tpu.memory_space<vmem>>, %arg6: memref<128x8xbf16, #tpu.memory_space<vmem>>, %arg7: memref<128x8xbf16, #tpu.memory_space<vmem>>, %arg8: memref<1x512x512xbf16, #tpu.memory_space<vmem>>, %arg9: memref<1x512x512xbf16, #tpu.memory_space<vmem>>, %arg10: memref<1x4x128xf32, #tpu.memory_space<vmem>>, %arg11: memref<1x4x128xf32, #tpu.memory_space<vmem>>, %arg12: memref<1x1x512xf32, #tpu.memory_space<vmem>>, %arg13: memref<1x1x512xf32, #tpu.memory_space<vmem>>, %arg14: memref<1x512x512xbf16, #tpu.memory_space<vmem>>, %arg15: memref<1x1x512xf32, #tpu.memory_space<vmem>>, %arg16: memref<1x1x512xf32, #tpu.memory_space<vmem>>, %arg17: memref<1x1x512xf32, #tpu.memory_space<vmem>>, %arg18: memref<1x8x512xf32, #tpu.memory_space<vmem>>) attributes {dimension_semantics = [#tpu.dimension_semantics<parallel>, #tpu.dimension_semantics<arbitrary>], iteration_bounds = array<i64: 2, 2>, scalar_prefetch = 0 : i64, scratch_operands = 0 : i64, tpu.core_type = #tpu.core_type<tc>, window_params = [{transform_indices = @transform_0, window_bounds = array<i64: 1, 8, 512>}, {transform_indices = @transform_1, window_bounds = array<i64: 1, 1, 8>}, {pipeline_mode = #tpu.pipeline_mode<synchronous>, transform_indices = @transform_2, window_bounds = array<i64: 8, 128>}, {pipeline_mode = #tpu.pipeline_mode<synchronous>, transform_indices = @transform_3, window_bounds = array<i64: 8, 128>}, {pipeline_mode = #tpu.pipeline_mode<synchronous>, transform_indices = @transform_4, window_bounds = array<i64: 128, 8>}, {pipeline_mode = #tpu.pipeline_mode<synchronous>, transform_indices = @transform_5, window_bounds = array<i64: 128, 8>}, {transform_indices = @transform_6, window_bounds = array<i64: 1, 512, 512>}, {transform_indices = @transform_7, window_bounds = array<i64: 1, 512, 512>}, {transform_indices = @transform_8, window_bounds = array<i64: 1, 4, 128>}, {transform_indices = @transform_9, window_bounds = array<i64: 1, 4, 128>}, {transform_indices = @transform_10, window_bounds = array<i64: 1, 1, 512>}, {transform_indices = @transform_11, window_bounds = array<i64: 1, 1, 512>}, {transform_indices = @transform_12, window_bounds = array<i64: 1, 512, 512>}, {transform_indices = @transform_13, window_bounds = array<i64: 1, 1, 512>}, {transform_indices = @transform_14, window_bounds = array<i64: 1, 1, 512>}, {transform_indices = @transform_15, window_bounds = array<i64: 1, 1, 512>}, {transform_indices = @transform_16, window_bounds = array<i64: 1, 8, 512>}]} {
    %c0_i32 = arith.constant 0 : i32
    %0 = arith.cmpi eq, %arg1, %c0_i32 : i32
    %1 = arith.extui %0 : i1 to i32
    %c0_i32_0 = arith.constant 0 : i32
    %2 = arith.cmpi ne, %1, %c0_i32_0 : i32
    scf.if %2 {
      %c0_69 = arith.constant 0 : index
      %c0_70 = arith.constant 0 : index
      %c0_71 = arith.constant 0 : index
      %169 = vector.load %arg2[%c0_69, %c0_70, %c0_71] : memref<1x8x512xf32, #tpu.memory_space<vmem>>, vector<1x8x512xf32>
      %c0_72 = arith.constant 0 : index
      %c0_73 = arith.constant 0 : index
      %c0_74 = arith.constant 0 : index
      %170 = vector.load %arg18[%c0_72, %c0_73, %c0_74] : memref<1x8x512xf32, #tpu.memory_space<vmem>>, vector<1x8x512xf32>
      tpu.vector_store %arg18[%c0_72, %c0_73, %c0_74], %169 {strides = array<i32>} : memref<1x8x512xf32, #tpu.memory_space<vmem>>, vector<1x8x512xf32>,
    } else {
    }
    %c0 = arith.constant 0 : index
    %c0_1 = arith.constant 0 : index
    %c0_2 = arith.constant 0 : index
    %3 = vector.load %arg18[%c0, %c0_1, %c0_2] : memref<1x8x512xf32, #tpu.memory_space<vmem>>, vector<1x8x512xf32>
    %4 = vector.shape_cast %3 : vector<1x8x512xf32> to vector<8x512xf32>
    %5 = arith.truncf %4 : vector<8x512xf32> to vector<8x512xbf16>
    %c0_3 = arith.constant 0 : index
    %c0_4 = arith.constant 0 : index
    %c0_5 = arith.constant 0 : index
    %6 = vector.load %arg8[%c0_3, %c0_4, %c0_5] : memref<1x512x512xbf16, #tpu.memory_space<vmem>>, vector<1x512x512xbf16>
    %7 = vector.shape_cast %6 : vector<1x512x512xbf16> to vector<512x512xbf16>
    %cst = arith.constant dense<0.000000e+00> : vector<8x512xf32>
    %8 = tpu.matmul %5, %7, %cst {dimension_numbers = #tpu.dot_dimension_numbers<[1], [0], [0], [1], [0, 0, 1, 1], [], []>} : vector<8x512xbf16>, vector<512x512xbf16>, vector<8x512xf32> -> vector<8x512xf32>
    %c0_6 = arith.constant 0 : index
    %c0_7 = arith.constant 0 : index
    %c0_8 = arith.constant 0 : index
    %9 = vector.load %arg9[%c0_6, %c0_7, %c0_8] : memref<1x512x512xbf16, #tpu.memory_space<vmem>>, vector<1x512x512xbf16>
    %10 = vector.shape_cast %9 : vector<1x512x512xbf16> to vector<512x512xbf16>
    %cst_9 = arith.constant dense<0.000000e+00> : vector<8x512xf32>
    %11 = tpu.matmul %5, %10, %cst_9 {dimension_numbers = #tpu.dot_dimension_numbers<[1], [0], [0], [1], [0, 0, 1, 1], [], []>} : vector<8x512xbf16>, vector<512x512xbf16>, vector<8x512xf32> -> vector<8x512xf32>
    %12 = vector.extract_strided_slice %8 {offsets = [0, 0], sizes = [8, 128], strides = [1, 1]} : vector<8x512xf32> to vector<8x128xf32>
    %13 = vector.extract_strided_slice %8 {offsets = [0, 128], sizes = [8, 128], strides = [1, 1]} : vector<8x512xf32> to vector<8x128xf32>
    %14 = vector.extract_strided_slice %8 {offsets = [0, 256], sizes = [8, 128], strides = [1, 1]} : vector<8x512xf32> to vector<8x128xf32>
    %15 = vector.extract_strided_slice %8 {offsets = [0, 384], sizes = [8, 128], strides = [1, 1]} : vector<8x512xf32> to vector<8x128xf32>
    %16 = vector.shape_cast %12 : vector<8x128xf32> to vector<1x8x128xf32>
    %17 = vector.shape_cast %13 : vector<8x128xf32> to vector<1x8x128xf32>
    %18 = vector.shape_cast %14 : vector<8x128xf32> to vector<1x8x128xf32>
    %19 = vector.shape_cast %15 : vector<8x128xf32> to vector<1x8x128xf32>
    %20 = tpu.concatenate %16, %17, %18, %19 in 0 : vector<1x8x128xf32>, vector<1x8x128xf32>, vector<1x8x128xf32>, vector<1x8x128xf32> -> vector<4x8x128xf32>
    %21 = vector.extract_strided_slice %11 {offsets = [0, 0], sizes = [8, 128], strides = [1, 1]} : vector<8x512xf32> to vector<8x128xf32>
    %22 = vector.extract_strided_slice %11 {offsets = [0, 128], sizes = [8, 128], strides = [1, 1]} : vector<8x512xf32> to vector<8x128xf32>
    %23 = vector.extract_strided_slice %11 {offsets = [0, 256], sizes = [8, 128], strides = [1, 1]} : vector<8x512xf32> to vector<8x128xf32>
    %24 = vector.extract_strided_slice %11 {offsets = [0, 384], sizes = [8, 128], strides = [1, 1]} : vector<8x512xf32> to vector<8x128xf32>
    %25 = vector.shape_cast %21 : vector<8x128xf32> to vector<1x8x128xf32>
    %26 = vector.shape_cast %22 : vector<8x128xf32> to vector<1x8x128xf32>
    %27 = vector.shape_cast %23 : vector<8x128xf32> to vector<1x8x128xf32>
    %28 = vector.shape_cast %24 : vector<8x128xf32> to vector<1x8x128xf32>
    %29 = tpu.concatenate %25, %26, %27, %28 in 0 : vector<1x8x128xf32>, vector<1x8x128xf32>, vector<1x8x128xf32>, vector<1x8x128xf32> -> vector<4x8x128xf32>
    %30 = vector.extract_strided_slice %4 {offsets = [0, 0], sizes = [8, 128], strides = [1, 1]} : vector<8x512xf32> to vector<8x128xf32>
    %31 = vector.extract_strided_slice %4 {offsets = [0, 128], sizes = [8, 128], strides = [1, 1]} : vector<8x512xf32> to vector<8x128xf32>
    %32 = vector.extract_strided_slice %4 {offsets = [0, 256], sizes = [8, 128], strides = [1, 1]} : vector<8x512xf32> to vector<8x128xf32>
    %33 = vector.extract_strided_slice %4 {offsets = [0, 384], sizes = [8, 128], strides = [1, 1]} : vector<8x512xf32> to vector<8x128xf32>
    %34 = vector.shape_cast %30 : vector<8x128xf32> to vector<1x8x128xf32>
    %35 = vector.shape_cast %31 : vector<8x128xf32> to vector<1x8x128xf32>
    %36 = vector.shape_cast %32 : vector<8x128xf32> to vector<1x8x128xf32>
    %37 = vector.shape_cast %33 : vector<8x128xf32> to vector<1x8x128xf32>
    %38 = tpu.concatenate %34, %35, %36, %37 in 0 : vector<1x8x128xf32>, vector<1x8x128xf32>, vector<1x8x128xf32>, vector<1x8x128xf32> -> vector<4x8x128xf32>
    %c0_10 = arith.constant 0 : index
    %c0_11 = arith.constant 0 : index
    %c0_12 = arith.constant 0 : index
    %39 = vector.load %arg10[%c0_10, %c0_11, %c0_12] : memref<1x4x128xf32, #tpu.memory_space<vmem>>, vector<1x4x128xf32>
    %40 = vector.shape_cast %39 : vector<1x4x128xf32> to vector<4x128xf32>
    %c0_13 = arith.constant 0 : index
    %c0_14 = arith.constant 0 : index
    %c0_15 = arith.constant 0 : index
    %41 = vector.load %arg11[%c0_13, %c0_14, %c0_15] : memref<1x4x128xf32, #tpu.memory_space<vmem>>, vector<1x4x128xf32>
    %42 = vector.shape_cast %41 : vector<1x4x128xf32> to vector<4x128xf32>
    %43 = vector.shape_cast %40 : vector<4x128xf32> to vector<4x1x128xf32>
    %44 = vector.broadcast %43 : vector<4x1x128xf32> to vector<4x8x128xf32>
    %45 = arith.addf %20, %44 : vector<4x8x128xf32>
    %46 = arith.truncf %45 : vector<4x8x128xf32> to vector<4x8x128xbf16>
    %47 = arith.truncf %38 : vector<4x8x128xf32> to vector<4x8x128xbf16>
    "tpu.trace_start"() <{level = 10 : i32, message = "hqd,hkd->hqk"}> : () -> ()
    %cst_16 = arith.constant dense<0.000000e+00> : vector<4x8x8xf32>
    %48 = tpu.matmul %46, %47, %cst_16 {dimension_numbers = #tpu.dot_dimension_numbers<[2], [2], [1], [1], [0, 0, 0, 1, 1, 1], [0], [0]>} : vector<4x8x128xbf16>, vector<4x8x128xbf16>, vector<4x8x8xf32> -> vector<4x8x8xf32>
    "tpu.trace_stop"() : () -> ()
    %49 = vector.shape_cast %42 : vector<4x128xf32> to vector<4x1x128xf32>
    %50 = vector.broadcast %49 : vector<4x1x128xf32> to vector<4x8x128xf32>
    %51 = arith.addf %20, %50 : vector<4x8x128xf32>
    %c0_17 = arith.constant 0 : index
    %c0_18 = arith.constant 0 : index
    %52 = vector.load %arg4[%c0_17, %c0_18] : memref<8x128xf32, #tpu.memory_space<vmem>>, vector<8x128xf32>
    %53 = vector.shape_cast %52 : vector<8x128xf32> to vector<1x8x128xf32>
    %54 = vector.broadcast %53 : vector<1x8x128xf32> to vector<4x8x128xf32>
    %55 = arith.mulf %51, %54 : vector<4x8x128xf32>
    %56 = arith.truncf %55 : vector<4x8x128xf32> to vector<4x8x128xbf16>
    %57 = vector.shape_cast %56 : vector<4x8x128xbf16> to vector<32x128xbf16>
    %c0_19 = arith.constant 0 : index
    %c0_20 = arith.constant 0 : index
    %58 = vector.load %arg5[%c0_19, %c0_20] : memref<8x128xf32, #tpu.memory_space<vmem>>, vector<8x128xf32>
    %59 = vector.shape_cast %58 : vector<8x128xf32> to vector<1x8x128xf32>
    %60 = vector.broadcast %59 : vector<1x8x128xf32> to vector<4x8x128xf32>
    %61 = arith.mulf %51, %60 : vector<4x8x128xf32>
    %62 = arith.truncf %61 : vector<4x8x128xf32> to vector<4x8x128xbf16>
    %63 = vector.shape_cast %62 : vector<4x8x128xbf16> to vector<32x128xbf16>
    %c0_21 = arith.constant 0 : index
    %c0_22 = arith.constant 0 : index
    %64 = vector.load %arg6[%c0_21, %c0_22] : memref<128x8xbf16, #tpu.memory_space<vmem>>, vector<128x8xbf16>
    %cst_23 = arith.constant dense<0.000000e+00> : vector<32x8xf32>
    %65 = tpu.matmul %57, %64, %cst_23 {dimension_numbers = #tpu.dot_dimension_numbers<[1], [0], [0], [1], [0, 0, 1, 1], [], []>} : vector<32x128xbf16>, vector<128x8xbf16>, vector<32x8xf32> -> vector<32x8xf32>
    %c0_24 = arith.constant 0 : index
    %c0_25 = arith.constant 0 : index
    %66 = vector.load %arg7[%c0_24, %c0_25] : memref<128x8xbf16, #tpu.memory_space<vmem>>, vector<128x8xbf16>
    %cst_26 = arith.constant dense<0.000000e+00> : vector<32x8xf32>
    %67 = tpu.matmul %63, %66, %cst_26 {dimension_numbers = #tpu.dot_dimension_numbers<[1], [0], [0], [1], [0, 0, 1, 1], [], []>} : vector<32x128xbf16>, vector<128x8xbf16>, vector<32x8xf32> -> vector<32x8xf32>
    %68 = arith.addf %65, %67 : vector<32x8xf32>
    %69 = vector.shape_cast %68 : vector<32x8xf32> to vector<4x8x8xf32>
    %70 = arith.addf %48, %69 : vector<4x8x8xf32>
    %cst_27 = arith.constant 1.000000e+00 : f32
    %71 = vector.broadcast %cst_27 : f32 to vector<4x8x8xf32>
    %72 = arith.mulf %70, %71 : vector<4x8x8xf32>
    %c0_28 = arith.constant 0 : index
    %c0_29 = arith.constant 0 : index
    %c0_30 = arith.constant 0 : index
    %73 = vector.load %arg3[%c0_28, %c0_29, %c0_30] : memref<1x1x8xf32, #tpu.memory_space<vmem>>, vector<1x1x8xf32>
    %cst_31 = arith.constant 0.000000e+00 : f32
    %74 = vector.broadcast %cst_31 : f32 to vector<1x1x8xf32>
    %75 = arith.cmpf oeq, %73, %74 : vector<1x1x8xf32>
    %cst_32 = arith.constant -1.000000e+30 : f32
    %76 = vector.shape_cast %75 : vector<1x1x8xi1> to vector<1x1x8xi1>
    %77 = vector.broadcast %76 : vector<1x1x8xi1> to vector<4x8x8xi1>
    %78 = vector.broadcast %cst_32 : f32 to vector<4x8x8xf32>
    %79 = arith.select %77, %78, %72 : vector<4x8x8xi1>, vector<4x8x8xf32>
    %cst_33 = arith.constant dense<0xFF800000> : vector<4x8xf32>
    %80 = vector.multi_reduction <maximumf>, %79, %cst_33 [2] : vector<4x8x8xf32> to vector<4x8xf32>
    %81 = vector.shape_cast %80 : vector<4x8xf32> to vector<4x8x1xf32>
    %82 = vector.broadcast %81 : vector<4x8x1xf32> to vector<4x8x8xf32>
    %83 = arith.subf %79, %82 : vector<4x8x8xf32>
    %84 = math.exp %83 : vector<4x8x8xf32>
    %cst_34 = arith.constant dense<0.000000e+00> : vector<4x8xf32>
    %85 = vector.multi_reduction <add>, %84, %cst_34 [2] : vector<4x8x8xf32> to vector<4x8xf32>
    %86 = vector.shape_cast %85 : vector<4x8xf32> to vector<4x8x1xf32>
    %87 = tpu.reciprocal %86 {approx = true} : vector<4x8x1xf32> -> vector<4x8x1xf32>
    %88 = vector.broadcast %87 : vector<4x8x1xf32> to vector<4x8x8xf32>
    %89 = arith.mulf %84, %88 : vector<4x8x8xf32>
    %90 = arith.truncf %89 : vector<4x8x8xf32> to vector<4x8x8xbf16>
    %91 = arith.truncf %29 : vector<4x8x128xf32> to vector<4x8x128xbf16>
    "tpu.trace_start"() <{level = 10 : i32, message = "hqk,hkd->hqd"}> : () -> ()
    %cst_35 = arith.constant dense<0.000000e+00> : vector<4x8x128xf32>
    %92 = tpu.matmul %90, %91, %cst_35 {dimension_numbers = #tpu.dot_dimension_numbers<[2], [1], [1], [2], [0, 0, 0, 1, 1, 2], [0], [0]>} : vector<4x8x8xbf16>, vector<4x8x128xbf16>, vector<4x8x128xf32> -> vector<4x8x128xf32>
    "tpu.trace_stop"() : () -> ()
    %93 = vector.extract_strided_slice %92 {offsets = [0, 0, 0], sizes = [1, 8, 128], strides = [1, 1, 1]} : vector<4x8x128xf32> to vector<1x8x128xf32>
    %94 = vector.shape_cast %93 : vector<1x8x128xf32> to vector<8x128xf32>
    %95 = vector.extract_strided_slice %92 {offsets = [1, 0, 0], sizes = [1, 8, 128], strides = [1, 1, 1]} : vector<4x8x128xf32> to vector<1x8x128xf32>
    %96 = vector.shape_cast %95 : vector<1x8x128xf32> to vector<8x128xf32>
    %97 = vector.extract_strided_slice %92 {offsets = [2, 0, 0], sizes = [1, 8, 128], strides = [1, 1, 1]} : vector<4x8x128xf32> to vector<1x8x128xf32>
    %98 = vector.shape_cast %97 : vector<1x8x128xf32> to vector<8x128xf32>
    %99 = vector.extract_strided_slice %92 {offsets = [3, 0, 0], sizes = [1, 8, 128], strides = [1, 1, 1]} : vector<4x8x128xf32> to vector<1x8x128xf32>
    %100 = vector.shape_cast %99 : vector<1x8x128xf32> to vector<8x128xf32>
    %101 = tpu.concatenate %94, %96, %98, %100 in 1 : vector<8x128xf32>, vector<8x128xf32>, vector<8x128xf32>, vector<8x128xf32> -> vector<8x512xf32>
    %102 = arith.addf %4, %101 : vector<8x512xf32>
    %cst_36 = arith.constant dense<0.000000e+00> : vector<8xf32>
    %103 = vector.multi_reduction <add>, %102, %cst_36 [1] : vector<8x512xf32> to vector<8xf32>
    %104 = vector.shape_cast %103 : vector<8xf32> to vector<8x1xf32>
    %cst_37 = arith.constant 5.120000e+02 : f32
    %105 = vector.broadcast %cst_37 : f32 to vector<8x1xf32>
    %106 = arith.divf %104, %105 : vector<8x1xf32>
    %107 = vector.broadcast %106 : vector<8x1xf32> to vector<8x512xf32>
    %108 = arith.subf %102, %107 : vector<8x512xf32>
    %109 = arith.mulf %108, %108 : vector<8x512xf32>
    %cst_38 = arith.constant dense<0.000000e+00> : vector<8xf32>
    %110 = vector.multi_reduction <add>, %109, %cst_38 [1] : vector<8x512xf32> to vector<8xf32>
    %111 = vector.shape_cast %110 : vector<8xf32> to vector<8x1xf32>
    %cst_39 = arith.constant 5.120000e+02 : f32
    %112 = vector.broadcast %cst_39 : f32 to vector<8x1xf32>
    %113 = arith.divf %111, %112 : vector<8x1xf32>
    %114 = vector.broadcast %106 : vector<8x1xf32> to vector<8x512xf32>
    %115 = arith.subf %102, %114 : vector<8x512xf32>
    %cst_40 = arith.constant 9.99999974E-6 : f32
    %116 = vector.broadcast %cst_40 : f32 to vector<8x1xf32>
    %117 = arith.addf %113, %116 : vector<8x1xf32>
    %118 = math.rsqrt %117 : vector<8x1xf32>
    %119 = vector.broadcast %118 : vector<8x1xf32> to vector<8x512xf32>
    %120 = arith.mulf %115, %119 : vector<8x512xf32>
    %c0_41 = arith.constant 0 : index
    %c0_42 = arith.constant 0 : index
    %c0_43 = arith.constant 0 : index
    %121 = vector.load %arg12[%c0_41, %c0_42, %c0_43] : memref<1x1x512xf32, #tpu.memory_space<vmem>>, vector<1x1x512xf32>
    %122 = vector.shape_cast %121 : vector<1x1x512xf32> to vector<1x512xf32>
    %123 = vector.broadcast %122 : vector<1x512xf32> to vector<8x512xf32>
    %124 = arith.mulf %120, %123 : vector<8x512xf32>
    %c0_44 = arith.constant 0 : index
    %c0_45 = arith.constant 0 : index
    %c0_46 = arith.constant 0 : index
    %125 = vector.load %arg13[%c0_44, %c0_45, %c0_46] : memref<1x1x512xf32, #tpu.memory_space<vmem>>, vector<1x1x512xf32>
    %126 = vector.shape_cast %125 : vector<1x1x512xf32> to vector<1x512xf32>
    %127 = vector.broadcast %126 : vector<1x512xf32> to vector<8x512xf32>
    %128 = arith.addf %124, %127 : vector<8x512xf32>
    %129 = arith.truncf %128 : vector<8x512xf32> to vector<8x512xbf16>
    %c0_47 = arith.constant 0 : index
    %c0_48 = arith.constant 0 : index
    %c0_49 = arith.constant 0 : index
    %130 = vector.load %arg14[%c0_47, %c0_48, %c0_49] : memref<1x512x512xbf16, #tpu.memory_space<vmem>>, vector<1x512x512xbf16>
    %131 = vector.shape_cast %130 : vector<1x512x512xbf16> to vector<512x512xbf16>
    %cst_50 = arith.constant dense<0.000000e+00> : vector<8x512xf32>
    %132 = tpu.matmul %129, %131, %cst_50 {dimension_numbers = #tpu.dot_dimension_numbers<[1], [0], [0], [1], [0, 0, 1, 1], [], []>} : vector<8x512xbf16>, vector<512x512xbf16>, vector<8x512xf32> -> vector<8x512xf32>
    %c0_51 = arith.constant 0 : index
    %c0_52 = arith.constant 0 : index
    %c0_53 = arith.constant 0 : index
    %133 = vector.load %arg15[%c0_51, %c0_52, %c0_53] : memref<1x1x512xf32, #tpu.memory_space<vmem>>, vector<1x1x512xf32>
    %134 = vector.shape_cast %133 : vector<1x1x512xf32> to vector<1x512xf32>
    %135 = vector.broadcast %134 : vector<1x512xf32> to vector<8x512xf32>
    %136 = arith.addf %132, %135 : vector<8x512xf32>
    %cst_54 = arith.constant 0.000000e+00 : f32
    %137 = vector.broadcast %cst_54 : f32 to vector<8x512xf32>
    %138 = arith.maximumf %136, %137 : vector<8x512xf32>
    %139 = arith.addf %128, %138 : vector<8x512xf32>
    %cst_55 = arith.constant dense<0.000000e+00> : vector<8xf32>
    %140 = vector.multi_reduction <add>, %139, %cst_55 [1] : vector<8x512xf32> to vector<8xf32>
    %141 = vector.shape_cast %140 : vector<8xf32> to vector<8x1xf32>
    %cst_56 = arith.constant 5.120000e+02 : f32
    %142 = vector.broadcast %cst_56 : f32 to vector<8x1xf32>
    %143 = arith.divf %141, %142 : vector<8x1xf32>
    %144 = vector.broadcast %143 : vector<8x1xf32> to vector<8x512xf32>
    %145 = arith.subf %139, %144 : vector<8x512xf32>
    %146 = arith.mulf %145, %145 : vector<8x512xf32>
    %cst_57 = arith.constant dense<0.000000e+00> : vector<8xf32>
    %147 = vector.multi_reduction <add>, %146, %cst_57 [1] : vector<8x512xf32> to vector<8xf32>
    %148 = vector.shape_cast %147 : vector<8xf32> to vector<8x1xf32>
    %cst_58 = arith.constant 5.120000e+02 : f32
    %149 = vector.broadcast %cst_58 : f32 to vector<8x1xf32>
    %150 = arith.divf %148, %149 : vector<8x1xf32>
    %151 = vector.broadcast %143 : vector<8x1xf32> to vector<8x512xf32>
    %152 = arith.subf %139, %151 : vector<8x512xf32>
    %cst_59 = arith.constant 9.99999974E-6 : f32
    %153 = vector.broadcast %cst_59 : f32 to vector<8x1xf32>
    %154 = arith.addf %150, %153 : vector<8x1xf32>
    %155 = math.rsqrt %154 : vector<8x1xf32>
    %156 = vector.broadcast %155 : vector<8x1xf32> to vector<8x512xf32>
    %157 = arith.mulf %152, %156 : vector<8x512xf32>
    %c0_60 = arith.constant 0 : index
    %c0_61 = arith.constant 0 : index
    %c0_62 = arith.constant 0 : index
    %158 = vector.load %arg16[%c0_60, %c0_61, %c0_62] : memref<1x1x512xf32, #tpu.memory_space<vmem>>, vector<1x1x512xf32>
    %159 = vector.shape_cast %158 : vector<1x1x512xf32> to vector<1x512xf32>
    %160 = vector.broadcast %159 : vector<1x512xf32> to vector<8x512xf32>
    %161 = arith.mulf %157, %160 : vector<8x512xf32>
    %c0_63 = arith.constant 0 : index
    %c0_64 = arith.constant 0 : index
    %c0_65 = arith.constant 0 : index
    %162 = vector.load %arg17[%c0_63, %c0_64, %c0_65] : memref<1x1x512xf32, #tpu.memory_space<vmem>>, vector<1x1x512xf32>
    %163 = vector.shape_cast %162 : vector<1x1x512xf32> to vector<1x512xf32>
    %164 = vector.broadcast %163 : vector<1x512xf32> to vector<8x512xf32>
    %165 = arith.addf %161, %164 : vector<8x512xf32>
    %c0_66 = arith.constant 0 : index
    %c0_67 = arith.constant 0 : index
    %c0_68 = arith.constant 0 : index
    %166 = vector.load %arg18[%c0_66, %c0_67, %c0_68] : memref<1x8x512xf32, #tpu.memory_space<vmem>>, vector<1x8x512xf32>
    %167 = vector.shape_cast %166 : vector<1x8x512xf32> to vector<8x512xf32>
    %168 = vector.shape_cast %165 : vector<8x512xf32> to vector<1x8x512xf32>
    tpu.vector_store %arg18[%c0_66, %c0_67, %c0_68], %168 {strides = array<i32>} : memref<1x8x512xf32, #tpu.memory_space<vmem>>, vector<1x8x512xf32>,
    return
  }
  func.func @transform_0(%arg0: i32, %arg1: i32) -> (i32, i32, i32) {
    %c0_i32 = arith.constant 0 : i32
    %c0_i32_0 = arith.constant 0 : i32
    %c0_i32_1 = arith.constant 0 : i32
    return %arg0, %c0_i32, %c0_i32_0 : i32, i32, i32
  }
  func.func @transform_1(%arg0: i32, %arg1: i32) -> (i32, i32, i32) {
    %c0_i32 = arith.constant 0 : i32
    %c0_i32_0 = arith.constant 0 : i32
    %c0_i32_1 = arith.constant 0 : i32
    return %arg0, %c0_i32, %c0_i32_0 : i32, i32, i32
  }
  func.func @transform_2(%arg0: i32, %arg1: i32) -> (i32, i32) {
    %c0_i32 = arith.constant 0 : i32
    %c0_i32_0 = arith.constant 0 : i32
    %c0_i32_1 = arith.constant 0 : i32
    return %c0_i32, %c0_i32_0 : i32, i32
  }
  func.func @transform_3(%arg0: i32, %arg1: i32) -> (i32, i32) {
    %c0_i32 = arith.constant 0 : i32
    %c0_i32_0 = arith.constant 0 : i32
    %c0_i32_1 = arith.constant 0 : i32
    return %c0_i32, %c0_i32_0 : i32, i32
  }
  func.func @transform_4(%arg0: i32, %arg1: i32) -> (i32, i32) {
    %c0_i32 = arith.constant 0 : i32
    %c0_i32_0 = arith.constant 0 : i32
    %c0_i32_1 = arith.constant 0 : i32
    return %c0_i32, %c0_i32_0 : i32, i32
  }
  func.func @transform_5(%arg0: i32, %arg1: i32) -> (i32, i32) {
    %c0_i32 = arith.constant 0 : i32
    %c0_i32_0 = arith.constant 0 : i32
    %c0_i32_1 = arith.constant 0 : i32
    return %c0_i32, %c0_i32_0 : i32, i32
  }
  func.func @transform_6(%arg0: i32, %arg1: i32) -> (i32, i32, i32) {
    %c0_i32 = arith.constant 0 : i32
    %c0_i32_0 = arith.constant 0 : i32
    %c0_i32_1 = arith.constant 0 : i32
    return %arg1, %c0_i32, %c0_i32_0 : i32, i32, i32
  }
  func.func @transform_7(%arg0: i32, %arg1: i32) -> (i32, i32, i32) {
    %c0_i32 = arith.constant 0 : i32
    %c0_i32_0 = arith.constant 0 : i32
    %c0_i32_1 = arith.constant 0 : i32
    return %arg1, %c0_i32, %c0_i32_0 : i32, i32, i32
  }
  func.func @transform_8(%arg0: i32, %arg1: i32) -> (i32, i32, i32) {
    %c0_i32 = arith.constant 0 : i32
    %c0_i32_0 = arith.constant 0 : i32
    %c0_i32_1 = arith.constant 0 : i32
    return %arg1, %c0_i32, %c0_i32_0 : i32, i32, i32
  }
  func.func @transform_9(%arg0: i32, %arg1: i32) -> (i32, i32, i32) {
    %c0_i32 = arith.constant 0 : i32
    %c0_i32_0 = arith.constant 0 : i32
    %c0_i32_1 = arith.constant 0 : i32
    return %arg1, %c0_i32, %c0_i32_0 : i32, i32, i32
  }
  func.func @transform_10(%arg0: i32, %arg1: i32) -> (i32, i32, i32) {
    %c0_i32 = arith.constant 0 : i32
    %c0_i32_0 = arith.constant 0 : i32
    %c0_i32_1 = arith.constant 0 : i32
    return %arg1, %c0_i32, %c0_i32_0 : i32, i32, i32
  }
  func.func @transform_11(%arg0: i32, %arg1: i32) -> (i32, i32, i32) {
    %c0_i32 = arith.constant 0 : i32
    %c0_i32_0 = arith.constant 0 : i32
    %c0_i32_1 = arith.constant 0 : i32
    return %arg1, %c0_i32, %c0_i32_0 : i32, i32, i32
  }
  func.func @transform_12(%arg0: i32, %arg1: i32) -> (i32, i32, i32) {
    %c0_i32 = arith.constant 0 : i32
    %c0_i32_0 = arith.constant 0 : i32
    %c0_i32_1 = arith.constant 0 : i32
    return %arg1, %c0_i32, %c0_i32_0 : i32, i32, i32
  }
  func.func @transform_13(%arg0: i32, %arg1: i32) -> (i32, i32, i32) {
    %c0_i32 = arith.constant 0 : i32
    %c0_i32_0 = arith.constant 0 : i32
    %c0_i32_1 = arith.constant 0 : i32
    return %arg1, %c0_i32, %c0_i32_0 : i32, i32, i32
  }
  func.func @transform_14(%arg0: i32, %arg1: i32) -> (i32, i32, i32) {
    %c0_i32 = arith.constant 0 : i32
    %c0_i32_0 = arith.constant 0 : i32
    %c0_i32_1 = arith.constant 0 : i32
    return %arg1, %c0_i32, %c0_i32_0 : i32, i32, i32
  }
  func.func @transform_15(%arg0: i32, %arg1: i32) -> (i32, i32, i32) {
    %c0_i32 = arith.constant 0 : i32
    %c0_i32_0 = arith.constant 0 : i32
    %c0_i32_1 = arith.constant 0 : i32
    return %arg1, %c0_i32, %c0_i32_0 : i32, i32, i32
  }
  func.func @transform_16(%arg0: i32, %arg1: i32) -> (i32, i32, i32) {
    %c0_i32 = arith.constant 0 : i32
    %c0_i32_0 = arith.constant 0 : i32
    %c0_i32_1 = arith.constant 0 : i32
    return %arg0, %c0_i32, %c0_i32_0 : i32, i32, i32
  }
}

</mosaic_0001>

<bundles_post_ra>
// kernel: tpu_custom_call.1
= control target key start
LH: loop header
LB: loop body
LE: loop exit
PB: predicated region body
PF: predicated region fallthrough
CT: control target
= control target key end

     0   :  { %s8557_s0 = inlined_call_operand.vmem [shape: f32[2,8,512], index: 0, kind: input, shape index: {}]   ;;  %s8558_s1 = inlined_call_operand.hbm [shape: f32[2,1,8], index: 1, kind: input, shape index: {}]   ;;  %s8559_s2 = inlined_call_operand.vmem [shape: f32[8,128], index: 2, kind: input, shape index: {}]   ;;  %s8560_s3 = inlined_call_operand.vmem [shape: f32[8,128], index: 3, kind: input, shape index: {}]   ;;  %s8561_s4 = inlined_call_operand.vmem [shape: bf16[128,8], index: 4, kind: input, shape index: {}]   ;;  %s8562_s5 = inlined_call_operand.vmem [shape: bf16[128,8], index: 5, kind: input, shape index: {}]   ;;  %s8563_s6 = inlined_call_operand.hbm [shape: bf16[2,512,512], index: 6, kind: input, shape index: {}]   ;;  %s8564_s7 = inlined_call_operand.hbm [shape: bf16[2,512,512], index: 7, kind: input, shape index: {}]   ;;  %s8565_s8 = inlined_call_operand.vmem [shape: f32[2,4,128], index: 8, kind: input, shape index: {}]   ;;  %s8566_s9 = inlined_call_operand.vmem [shape: f32[2,4,128], index: 9, kind: input, shape index: {}]   ;;  %s8567_s10 = inlined_call_operand.vmem [shape: f32[2,1,512], index: 10, kind: input, shape index: {}]   ;;  %s8568_s11 = inlined_call_operand.vmem [shape: f32[2,1,512], index: 11, kind: input, shape index: {}]   ;;  %s8569_s12 = inlined_call_operand.hbm [shape: bf16[2,512,512], index: 12, kind: input, shape index: {}]   ;;  %s8570_s13 = inlined_call_operand.vmem [shape: f32[2,1,512], index: 13, kind: input, shape index: {}]   ;;  %s8571_s14 = inlined_call_operand.vmem [shape: f32[2,1,512], index: 14, kind: input, shape index: {}]   ;;  %s8572_s15 = inlined_call_operand.vmem [shape: f32[2,1,512], index: 15, kind: input, shape index: {}]   ;;  %s8573_s16 = inlined_call_operand.hbm [shape: f32[2,8,512], index: 16, kind: output, shape index: {}]  }
   0x1   :  { %8598 = sst [smem:[#allocation30_spill]] %s8557_s0 }
   0x2   :  { %8599 = sst [smem:[#allocation31_spill]] %s8558_s1 }
   0x3   :  { %8600 = sst [smem:[#allocation32_spill]] %s8559_s2 }
   0x4   :  { %8601 = sst [smem:[#allocation33_spill]] %s8560_s3 }
   0x5   :  { %8602 = sst [smem:[#allocation34_spill]] %s8561_s4 }
   0x6   :  { %8603 = sst [smem:[#allocation35_spill]] %s8562_s5 }
   0x7   :  { %8604 = sst [smem:[#allocation36_spill]] %s8563_s6 }
   0x8   :  { %8605 = sst [smem:[#allocation37_spill]] %s8564_s7 }
   0x9   :  { %8606 = sst [smem:[#allocation38_spill]] %s8565_s8 }
   0xa   :  { %8607 = sst [smem:[#allocation39_spill]] %s8566_s9 }
   0xb   :  { %8608 = sst [smem:[#allocation40_spill]] %s8567_s10 }
   0xc   :  { %8609 = sst [smem:[#allocation41_spill]] %s8568_s11 }
   0xd   :  { %8610 = sst [smem:[#allocation42_spill]] %s8569_s12 }
   0xe   :  { %8611 = sst [smem:[#allocation43_spill]] %s8570_s13 }
   0xf   :  { %8612 = sst [smem:[#allocation44_spill]] %s8571_s14 }
  0x10   :  { %8613 = sst [smem:[#allocation45_spill]] %s8572_s15 }
  0x11   :  { %8614 = sst [smem:[#allocation46_spill]] %s8573_s16 }
  0x12   :  { %21 = vsyncpa [#allocation3], 0 }
  0x13   :  { %23 = vsyncpa [#allocation3 + $0x1], 0 }
  0x14   :  { %24 = vsyncpa [#allocation6], 0 }
  0x15   :  { %26 = vsyncpa [#allocation6 + $0x1], 0 }
  0x16   :  { %27 = vsyncpa [#allocation9], 0 }
  0x17   :  { %29 = vsyncpa [#allocation9 + $0x1], 0 }
  0x18   :  { %30 = vsyncpa [#allocation4], 0 }
  0x19   :  { %32 = vsyncpa [#allocation4 + $0x1], 0  ;;  %s7144_s21 = smov 0   ;;  %s7146_s22 = smov 0  }
  0x1a   :  { %s7148_s23 = smov 0   ;;  %s7150_s24 = smov 0  }
  0x1b   :  { %s7152_s25 = smov 0   ;;  %s7154_s26 = smov 0  }
  0x1c   :  { %s7156_s27 = smov 0   ;;  %s7158_s28 = smov 0  }
  0x1d   :  { %s7160_s29 = smov 0   ;;  %s7162_s30 = smov 0  }
  0x1e   :  { %s7164_s0 = smov 0  }
  0x1f LB: > { %8615 = sst [smem:[#allocation15_spill]] %s7017_s22  ;;  %s47_s17 = sadd.s32 1, %s7045_s29  ;;  %s7053_s0 = sphi %s7164_s0, %s38_s0   ;;  %s7049_s30 = sphi %s7162_s30, %s8687_s30   ;;  %s7045_s29 = sphi %s7160_s29, %s8686_s29   ;;  %s7041_s28 = sphi %s7158_s28, %s8685_s28   ;;  %s7037_s27 = sphi %s7156_s27, %s8684_s27   ;;  %s7033_s26 = sphi %s7154_s26, %s8683_s26   ;;  %s7029_s25 = sphi %s7152_s25, %s8682_s25   ;;  %s7025_s24 = sphi %s7150_s24, %s8681_s24   ;;  %s7021_s23 = sphi %s7148_s23, %s8680_s23   ;;  %s7017_s22 = sphi %s7146_s22, %s8679_s22   ;;  %s7013_s21 = sphi %s7144_s21, %s8678_s21  }
  0x20   : > { %8616 = sst [smem:[#allocation16_spill]] %s7021_s23  ;;  %p91_p0 = scmp.eq.s32.totalorder %s7053_s0, 0 }
  0x21   : > { %8617 = sst [smem:[#allocation17_spill]] %s7025_s24  ;;  %p7201_p1 = scmp.ge.s32.totalorder %s47_s17, 2 }
  0x22   : > { %8618 = sst [smem:[#allocation18_spill]] %s7029_s25  ;;  %s193_s19 = sadd.s32 1, %s7021_s23 }
  0x23   : > { %8619 = sst [smem:[#allocation19_spill]] %s7033_s26  ;;  %p200_p2 = scmp.ne.s32.totalorder %s7021_s23, %s7017_s22 }
  0x24   : > { %8620 = sst [smem:[#allocation20_spill]] %s7037_s27  ;;  %s8689_s17 = smov (%p7201_p1, %s47_s17), 0 }
  0x25   : > { %8621 = sst [smem:[#allocation21_spill]] %s7045_s29  ;;  %p7214_p3 = por %p200_p2, %p91_p0 }
  0x26   : > { %8622 = sst [smem:[#allocation22_spill]] %s7049_s30  ;;  %p8584_p4 = scmp.lt.s32.totalorder %s7053_s0, 4 }
  0x27   : > { %8623 = sst [smem:[#allocation23_spill]] %s7053_s0  ;;  %s190_s16 = ssub.s32 %s7045_s29, %s8689_s17 }
  0x28   : > { %8625 = sst [smem:[#allocation24_spill]] %s8689_s17  ;;  %s527_s2 = sand.u32 1, %s7053_s0  }
  0x29   : > { %p191_p5 = scmp.eq.s32.totalorder %s190_s16, 0  ;;  %s8578_s3 = sand.u32 1, %s7021_s23  }
  0x2a   : > { %s7224_s4 = sshll.u32 %s7045_s29, 10  ;;  %s7231_s15 = sshll.u32 %s8578_s3, 10 }
  0x2b   : > { %s7227_s5 = scalar_select %p191_p5, %s7021_s23, %s193_s19  }
  0x2c   : > { %s8628_s6 = sld [smem:[#allocation36_spill]]  ;;  %s531_s16 = scalar_lea.vmem [#allocation5], %s7231_s15 }
  0x2d   : > { %8627 = sst [smem:[#allocation25_spill]] %s7227_s5  ;;  %s539_s19 = sshll.u32 %s531_s16, 4  ;;  %s540_s19 = int_to_ptr.vmem [resolvable:$true] %s539_s19 }
  0x2e   : > { %p7242_p6 = pnand %p8584_p4, %p7214_p3  ;;  %p4627_p7 = scmp.ge.s32.totalorder %s7053_s0, 1 }
  0x2f   : > { %s8580_s14 = smov 256   ;;  %s8582_s16 = smov 16  }
  0x30   : > { %p640_p8 = scmp.lt.s32.totalorder %s7053_s0, 5  ;;  %s4615_s3 = sadd.s32 4294967294, %s7053_s0  }
  0x31   : > { %s83_s29 = sadd.s32 1, %s7033_s26  ;;  %p90_p10 = scmp.ne.s32.totalorder %s7033_s26, %s7029_s25 }
  0x32   : > { %s536_s11 = scalar_lea.hbm %s8628_s6, %s7224_s4  ;;  %p7256_p9 = pnand %p4627_p7, %p640_p8 }
  0x33   : > { %s537_s17 = sshll.u32 %s536_s11, 4  ;;  %s7247_s11 = scalar_lea.sflag [#allocation6], %s527_s2  ;;  %s538_s17 = int_to_ptr.hbm [resolvable:$true] %s537_s17 }
  0x34   : > { %6672 = dma.hbm_to_vmem [thread:$0]  (!%p7242_p6), %s538_s17, 16384, %s540_s19, %s7247_s11, %s8580_s14, %s8580_s14, %s8582_s16  }
  0x35   : > { %s7261_s2 = sadd.s32 4294967295, %s7053_s0   ;;  %s50_s6 = sadd.s32 1, %s7049_s30 }
  0x36   : > { %s8691_s6 = smov (!%p7201_p1, %s50_s6), %s7049_s30  ;;  %p96_p11 = scmp.ne.s32.totalorder %s7029_s25, %s7025_s24 }
  0x37   : > { %p52_p12 = scmp.ge.s32.totalorder %s8691_s6, 2  ;;  %p97_p13 = scmp.eq.s32.totalorder %s7261_s2, 0 }
  0x38   : > { %p7279_p2 = por %p91_p0, %p90_p10  ;;  %p206_p3 = scmp.ne.s32.totalorder %s7017_s22, %s7013_s21 }
  0x39   : > { %s8693_s6 = smov (%p52_p12, %s8691_s6), 0  ;;  %p7290_p1 = por %p97_p13, %p96_p11 }
  0x3a   : > { %8632 = sst [smem:[#allocation26_spill]] %s8693_s6  ;;  %p7294_p5 = por %p206_p3, %p97_p13 }
  0x3b   : > { %s80_s14 = ssub.s32 %s7049_s30, %s8693_s6  ;;  %p464_p0 = scmp.eq.s32.totalorder %s7261_s2, 3 }
  0x3c   : > { %p81_p7 = scmp.eq.s32.totalorder %s80_s14, 0  ;;  %p470_p8 = scmp.eq.s32.totalorder %s4615_s3, 3 }
  0x3d   : > { %p7304_p12 = por %p464_p0, %p90_p10  ;;  %s510_s16 = sand.u32 1, %s7033_s26  }
  0x3e   : > { %s7310_s5 = scalar_select %p81_p7, %s7033_s26, %s83_s29  }
  0x3f   : > { %s8635_s21 = scalar_select %p7304_p12, 1, 0 }
  0x40   : > { %8637 = sst [smem:[#allocation28_spill]] %s7310_s5  ;;  %p7315_p4 = por %p470_p8, %p96_p11 }
  0x41   : > { %8636 = sst [smem:[#allocation27_spill]] %s8635_s21  ;;  %s513_s6 = scalar_lea.vmem [#allocation2], %s510_s16 }
  0x42   : > { %s8638_s10 = scalar_select %p7315_p4, 1, 0 }
  0x43   : > { %s8640_s1 = sld [smem:[#allocation31_spill]]  ;;  %s520_s27 = sshll.u32 %s513_s6, 4  ;;  %s521_s27 = int_to_ptr.vmem [resolvable:$true] %s520_s27 }
  0x44   : > { %8639 = sst [smem:[#allocation29_spill]] %s8638_s10  ;;  %p8641_p10 = scmp.lt.s32.totalorder %s7053_s0, 4 }
  0x45   : > { %s8642_s7 = sld [smem:[#allocation37_spill]]  ;;  %s553_s8 = scalar_lea.vmem [#allocation7], %s7231_s15 }
  0x46   : > { %p6667_p13 = pnand %p8641_p10, %p7279_p2  ;;  %s561_s9 = sshll.u32 %s553_s8, 4  ;;  %s562_s9 = int_to_ptr.vmem [resolvable:$true] %s561_s9 }
  0x47   : > { %s8643_s6 = smov 16   ;;  %s8645_s12 = sld [smem:[#allocation42_spill]] }
  0x48   : > { %s603_s5 = scalar_lea.vmem [#allocation8], %s7231_s15  ;;  %s8646_s8 = sand.u32 1, %s7021_s23  }
  0x49   : > { %s516_s14 = scalar_lea.hbm %s8640_s1, %s7049_s30  ;;  %s511_s1 = scalar_lea.sflag [#allocation3], %s510_s16 }
  0x4a   : > { %s518_s3 = sshll.u32 %s516_s14, 4  ;;  %s8644_s14 = smov 256   ;;  %s519_s3 = int_to_ptr.hbm [resolvable:$true] %s518_s3 }
  0x4b   : > { %s558_s26 = scalar_lea.hbm %s8642_s7, %s7224_s4  ;;  %s611_s29 = sshll.u32 %s603_s5, 4  ;;  %s612_s29 = int_to_ptr.vmem [resolvable:$true] %s611_s29 }
  0x4c   : > { %s559_s10 = sshll.u32 %s558_s26, 4  ;;  %s600_s26 = scalar_lea.sflag [#allocation9], %s8646_s8  ;;  %s560_s10 = int_to_ptr.hbm [resolvable:$true] %s559_s10 }
  0x4d   : > { %6669 = dma.hbm_to_vmem [thread:$0]  (!%p6667_p13), %s519_s3, 16, %s521_s27, %s511_s1  }
  0x4e   : > { %6675 = dma.hbm_to_vmem [thread:$0]  (!%p7242_p6), %s560_s10, 16384, %s562_s9, %s7247_s11, %s8644_s14, %s8644_s14, %s8643_s6  }
  0x4f   : > { %s608_s24 = scalar_lea.hbm %s8645_s12, %s7224_s4  ;;  %644 = sbr.rel (%p7256_p9) target bundleno = 1711 (0x6af), region = 84 }
  0x50   : > { %s609_s7 = sshll.u32 %s608_s24, 4  ;;  %s7353_s1 = sand.u32 (!%p7256_p9), 1, %s7029_s25   ;;  %s610_s7 = int_to_ptr.hbm [resolvable:$true] %s609_s7 }
  0x51   : > { %6678 = dma.hbm_to_vmem [thread:$0]  (!%p7242_p6), %s610_s7, 16384, %s612_s29, %s600_s26, %s8644_s14, %s8644_s14, %s8643_s6  }
  0x52   : > { %s647_s4 = scalar_lea.sflag (!%p7256_p9), [#allocation3], %s7353_s1 }
  0x54   : > { %6996 = dma.done.wait (%p7290_p1), %s647_s4, 16  }
  0x55   : > { %6998 = vsyncadd (%p7290_p1), %s647_s4, 4294967280  ;;  %s655_s7 = sand.u32 1, %s7261_s2   ;;  %s657_s15 = sand.u32 1, %s7017_s22  }
  0x56   : > { %s4628_s24 = sshll.u32 %s657_s15, 10  ;;  %s656_s27 = scalar_lea.sflag [#allocation6], %s655_s7 }
  0x57   : > { %s7363_s30 = scalar_lea.vmem [#allocation5], %s4628_s24 }
  0x58   : > { %7000 = dma.done.wait (%p7294_p5), %s656_s27, 32768  }
  0x59   : > { %7002 = vsyncadd (%p7294_p5), %s656_s27, 4294934528  ;;  %s7369_s13 = scalar_lea.vmem [#allocation7], %s4628_s24  ;;  %s676_s11 = scalar_lea.sflag [#allocation9], %s657_s15 }
  0x5a   : > { %s7371_s16 = scalar_lea.vmem [#allocation8], %s4628_s24 }
  0x5b   : > { %7004 = dma.done.wait (%p7294_p5), %s676_s11, 16384  }
  0x5c   : > { %7006 = vsyncadd (%p7294_p5), %s676_s11, 4294950912  ;;  %s8647_s20 = sld [smem:[#allocation20_spill]]  ;;  %s4631_s2 = sshll.u32 %s7353_s1, 5 }
  0x5d   : > { %p776_p6 = scmp.lt.s32.totalorder %s7041_s28, 1  ;;  %s8648_s17 = sld [smem:[#allocation30_spill]] }
  0x5e   : > { %s8650_s24 = sld [smem:[#allocation39_spill]] }
  0x5f   : > { %s777_s18 = scalar_select %p776_p6, %s7041_s28, 1 }
  0x60   : > { %s8653_s12 = sld [smem:[#allocation43_spill]] }
  0x61   : > { %s6254_s9 = sshll.u32 %s777_s18, 5  ;;  %s8654_s0 = sld [smem:[#allocation44_spill]] }
  0x62   : > { %p781_p9 = scmp.lt.s32.totalorder %s8647_s20, 1  ;;  %s8655_s7 = sld [smem:[#allocation45_spill]] }
  0x63   : > { %s780_s5 = scalar_lea.vmem %s8648_s17, %s6254_s9  ;;  %s8651_s9 = sld [smem:[#allocation40_spill]] }
  0x64   : > { %s782_s3 = scalar_select %p781_p9, %s8647_s20, 1 }
  0x65   : > { %s8652_s17 = sld [smem:[#allocation41_spill]]  ;;  %p4641_p11 = scmp.ne.s32.totalorder %s8647_s20, 0 }
  0x66   : > { %s7385_s29 = sshll.u32 %s782_s3, 2 }
  0x67   : > { %s788_s27 = scalar_lea.vmem %s8650_s24, %s7385_s29  ;;  %s800_s25 = scalar_lea.vmem %s8653_s12, %s7385_s29 }
  0x68   : > { %s804_s26 = scalar_lea.vmem %s8654_s0, %s7385_s29  ;;  %s808_s15 = scalar_lea.vmem %s8655_s7, %s7385_s29 }
  0x69   : > { %s792_s3 = scalar_lea.vmem %s8651_s9, %s7385_s29  ;;  %s7415_s24 = scalar_lea.vmem [#allocation10], %s4631_s2 }
  0x6a   : > { %813 = sbr.rel (%p4641_p11) target bundleno = 116 (0x74), region = 104 }
  0x6b   : > { %s796_s10 = scalar_lea.vmem %s8652_s17, %s7385_s29 }
  0x6f   : > { %v814_v0 = vld [vmem:[%s780_s5] sm:$0xff]  ;;  %v815_v1 = vld [vmem:[%s780_s5 + $0x8] sm:$0xff]  ;;  %v816_v2 = vld [vmem:[%s780_s5 + $0x10] sm:$0xff] }
  0x70   : > { %818 = vst [vmem:[%s7415_s24] sm:$0xff] %v814_v0  ;;  %v817_v3 = vld [vmem:[%s780_s5 + $0x18] sm:$0xff] }
  0x71   : > { %819 = vst [vmem:[%s7415_s24 + $0x8] sm:$0xff] %v815_v1 }
  0x72   : > { %820 = vst [vmem:[%s7415_s24 + $0x10] sm:$0xff] %v816_v2 }
  0x73   : > { %821 = vst [vmem:[%s7415_s24 + $0x18] sm:$0xff] %v817_v3 }
  0x74 PF: > { %v4756_v4 = vld [vmem:[%s7363_s30 + $0xe0] sm:$0xf]  ;;  %v6285_v5 = vld [vmem:[%s7363_s30 + $0xec] sm:$0xf0]  ;;  %s8656_s23 = sld [smem:[#allocation35_spill]]  ;;  %vm3145_vm0 = vcmask 1043456  }
  0x75   : > { %v4884_v6 = vld [vmem:[%s7363_s30 + $0x1e0] sm:$0xf]  ;;  %v4757_v7 = vor.u32 %v6285_v5, %v4756_v4  ;;  %v6317_v8 = vld [vmem:[%s7363_s30 + $0x1ec] sm:$0xf0]  ;;  %s8660_s6 = sld [smem:[#allocation38_spill]]  ;;  %s8665_s11 = scalar_lea.vmem [#allocation2], %s7353_s1 }
  0x76   : > { %v5012_v9 = vld [vmem:[%s7363_s30 + $0x2e0] sm:$0xf]  ;;  %v6349_v10 = vld [vmem:[%s7363_s30 + $0x2ec] sm:$0xf0]  ;;  %v4885_v11 = vor.u32 %v6317_v8, %v4884_v6  ;;  %s8664_s7 = sld [smem:[#allocation32_spill]]  ;;  %vm3089_vm3 = vcmask 64512  }
  0x77   : > { %v5013_v12 = vor.u32 %v6349_v10, %v5012_v9  ;;  %v5140_v13 = vld [vmem:[%s7363_s30 + $0x3e0] sm:$0xf]  ;;  %v6381_v14 = vld [vmem:[%s7363_s30 + $0x3ec] sm:$0xf0]  ;;  %1598 = vmatpush.bf16.msra.mxu0 %v4757_v7  ;;  %s4372_s21 = sshll.u32 %s7415_s24, 4  ;;  %s4373_s21 = int_to_ptr.vmem [resolvable:$true] %s4372_s21 }
  0x78   : > { %v4740_v15 = vld [vmem:[%s7363_s30 + $0xc0] sm:$0xf]  ;;  %v5141_v16 = vor.u32 %v6381_v14, %v5140_v13  ;;  %v6281_v17 = vld [vmem:[%s7363_s30 + $0xcc] sm:$0xf0]  ;;  %1611 = vmatpush.bf16.msra.mxu1 %v4885_v11 }
  0x79   : > { %v4868_v18 = vld [vmem:[%s7363_s30 + $0x1c0] sm:$0xf]  ;;  %v6313_v19 = vld [vmem:[%s7363_s30 + $0x1cc] sm:$0xf0]  ;;  %1624 = vmatpush.bf16.msra.mxu2 %v5013_v12  ;;  %v4741_v20 = vor.u32 %v6281_v17, %v4740_v15 }
  0x7a   : > { %v4869_v21 = vor.u32 %v6313_v19, %v4868_v18  ;;  %v4996_v22 = vld [vmem:[%s7363_s30 + $0x2c0] sm:$0xf]  ;;  %v6345_v23 = vld [vmem:[%s7363_s30 + $0x2cc] sm:$0xf0]  ;;  %1637 = vmatpush.bf16.msra.mxu3 %v5141_v16  ;;  %s8657_s20 = smov %s8656_s23 }
  0x7b   : > { %v5124_v24 = vld [vmem:[%s7363_s30 + $0x3c0] sm:$0xf]  ;;  %v4997_v25 = vor.u32 %v6345_v23, %v4996_v22  ;;  %v6377_v26 = vld [vmem:[%s7363_s30 + $0x3cc] sm:$0xf0]  ;;  %1599 = vmatpush.bf16.msra.mxu0 %v4741_v20  ;;  %s8661_s14 = scalar_lea.vmem %s8660_s6, %s7385_s29  ;;  %s8663_s6 = sld [smem:[#allocation33_spill]] }
  0x7c   : > { %v4724_v27 = vld [vmem:[%s7363_s30 + $0xa0] sm:$0xf]  ;;  %v6277_v28 = vld [vmem:[%s7363_s30 + $0xac] sm:$0xf0]  ;;  %v5125_v29 = vor.u32 %v6377_v26, %v5124_v24  ;;  %1612 = vmatpush.bf16.msra.mxu1 %v4869_v21 }
  0x7d   : > { %v4852_v30 = vld [vmem:[%s7363_s30 + $0x1a0] sm:$0xf]  ;;  %v6309_v31 = vld [vmem:[%s7363_s30 + $0x1ac] sm:$0xf0]  ;;  %v4725_v33 = vor.u32 %v6277_v28, %v4724_v27  ;;  %1625 = vmatpush.bf16.msra.mxu2 %v4997_v25 }
  0x7e   : > { %v4980_v32 = vld [vmem:[%s7363_s30 + $0x2a0] sm:$0xf]  ;;  %v6341_v34 = vld [vmem:[%s7363_s30 + $0x2ac] sm:$0xf0]  ;;  %v4853_v37 = vor.u32 %v6309_v31, %v4852_v30  ;;  %1638 = vmatpush.bf16.msra.mxu3 %v5125_v29 }
  0x7f   : > { %v5108_v35 = vld [vmem:[%s7363_s30 + $0x3a0] sm:$0xf]  ;;  %v6373_v36 = vld [vmem:[%s7363_s30 + $0x3ac] sm:$0xf0]  ;;  %v4981_v38 = vor.u32 %v6341_v34, %v4980_v32  ;;  %1600 = vmatpush.bf16.msra.mxu0 %v4725_v33  ;;  %v6283_v32 = vld [vmem:[%s7363_s30 + $0xe4] sm:$0xf] }
  0x80   : > { %v4708_v39 = vld [vmem:[%s7363_s30 + $0x80] sm:$0xf]  ;;  %v6273_v40 = vld [vmem:[%s7363_s30 + $0x8c] sm:$0xf0]  ;;  %v5109_v42 = vor.u32 %v6373_v36, %v5108_v35  ;;  %1613 = vmatpush.bf16.msra.mxu1 %v4853_v37  ;;  %v4758_v33 = vld [vmem:[%s7363_s30 + $0xf0] sm:$0xf0] }
  0x81   : > { %v4836_v41 = vld [vmem:[%s7363_s30 + $0x180] sm:$0xf]  ;;  %v6305_v43 = vld [vmem:[%s7363_s30 + $0x18c] sm:$0xf0]  ;;  %v4709_v48 = vor.u32 %v6273_v40, %v4708_v39  ;;  %1626 = vmatpush.bf16.msra.mxu2 %v4981_v38  ;;  %v6315_v34 = vld [vmem:[%s7363_s30 + $0x1e4] sm:$0xf] }
  0x82   : > { %v4964_v44 = vld [vmem:[%s7363_s30 + $0x280] sm:$0xf]  ;;  %v6337_v45 = vld [vmem:[%s7363_s30 + $0x28c] sm:$0xf0]  ;;  %v4837_v49 = vor.u32 %v6305_v43, %v4836_v41  ;;  %1639 = vmatpush.bf16.msra.mxu3 %v5109_v42  ;;  %v4886_v36 = vld [vmem:[%s7363_s30 + $0x1f0] sm:$0xf0] }
  0x83   : > { %v5092_v46 = vld [vmem:[%s7363_s30 + $0x380] sm:$0xf]  ;;  %v6369_v47 = vld [vmem:[%s7363_s30 + $0x38c] sm:$0xf0]  ;;  %v4965_v50 = vor.u32 %v6337_v45, %v4964_v44  ;;  %1601 = vmatpush.bf16.msra.mxu0 %v4709_v48  ;;  %v6347_v37 = vld [vmem:[%s7363_s30 + $0x2e4] sm:$0xf]  ;;  %v4761_v44 = vor.u32 %v6283_v32, %v4758_v33  ;;  %v4889_v45 = vor.u32 %v6315_v34, %v4886_v36 }
  0x84   : > { %v4692_v51 = vld [vmem:[%s7363_s30 + $0x60] sm:$0xf]  ;;  %v6269_v52 = vld [vmem:[%s7363_s30 + $0x6c] sm:$0xf0]  ;;  %v5093_v54 = vor.u32 %v6369_v47, %v5092_v46  ;;  %1614 = vmatpush.bf16.msra.mxu1 %v4837_v49  ;;  %v5014_v38 = vld [vmem:[%s7363_s30 + $0x2f0] sm:$0xf0] }
  0x85   : > { %v4820_v53 = vld [vmem:[%s7363_s30 + $0x160] sm:$0xf]  ;;  %v6301_v55 = vld [vmem:[%s7363_s30 + $0x16c] sm:$0xf0]  ;;  %v4693_v60 = vor.u32 %v6269_v52, %v4692_v51  ;;  %1627 = vmatpush.bf16.msra.mxu2 %v4965_v50  ;;  %v6379_v41 = vld [vmem:[%s7363_s30 + $0x3e4] sm:$0xf]  ;;  %v5017_v46 = vor.u32 %v6347_v37, %v5014_v38 }
  0x86   : > { %v4948_v56 = vld [vmem:[%s7363_s30 + $0x260] sm:$0xf]  ;;  %v6333_v57 = vld [vmem:[%s7363_s30 + $0x26c] sm:$0xf0]  ;;  %v4821_v61 = vor.u32 %v6301_v55, %v4820_v53  ;;  %1640 = vmatpush.bf16.msra.mxu3 %v5093_v54  ;;  %v5142_v42 = vld [vmem:[%s7363_s30 + $0x3f0] sm:$0xf0] }
  0x87   : > { %v5076_v58 = vld [vmem:[%s7363_s30 + $0x360] sm:$0xf]  ;;  %v6365_v59 = vld [vmem:[%s7363_s30 + $0x36c] sm:$0xf0]  ;;  %v4949_v62 = vor.u32 %v6333_v57, %v4948_v56  ;;  %1602 = vmatpush.bf16.msra.mxu0 %v4693_v60  ;;  %v6279_v47 = vld [vmem:[%s7363_s30 + $0xc4] sm:$0xf]  ;;  %v5145_v50 = vor.u32 %v6379_v41, %v5142_v42 }
  0x88   : > { %v4676_v63 = vld [vmem:[%s7363_s30 + $0x40] sm:$0xf]  ;;  %v6265_v0 = vld [vmem:[%s7363_s30 + $0x4c] sm:$0xf0]  ;;  %v5077_v2 = vor.u32 %v6365_v59, %v5076_v58  ;;  %1615 = vmatpush.bf16.msra.mxu1 %v4821_v61  ;;  %v4742_v48 = vld [vmem:[%s7363_s30 + $0xd0] sm:$0xf0] }
  0x89   : > { %v4804_v1 = vld [vmem:[%s7363_s30 + $0x140] sm:$0xf]  ;;  %v6297_v3 = vld [vmem:[%s7363_s30 + $0x14c] sm:$0xf0]  ;;  %v4677_v8 = vor.u32 %v6265_v0, %v4676_v63  ;;  %1628 = vmatpush.bf16.msra.mxu2 %v4949_v62  ;;  %v6311_v49 = vld [vmem:[%s7363_s30 + $0x1c4] sm:$0xf]  ;;  %v4745_v57 = vor.u32 %v6279_v47, %v4742_v48 }
  0x8a   : > { %v4932_v4 = vld [vmem:[%s7363_s30 + $0x240] sm:$0xf]  ;;  %v6329_v5 = vld [vmem:[%s7363_s30 + $0x24c] sm:$0xf0]  ;;  %v4805_v9 = vor.u32 %v6297_v3, %v4804_v1  ;;  %1641 = vmatpush.bf16.msra.mxu3 %v5077_v2  ;;  %v4870_v51 = vld [vmem:[%s7363_s30 + $0x1d0] sm:$0xf0] }
  0x8b   : > { %v5060_v6 = vld [vmem:[%s7363_s30 + $0x340] sm:$0xf]  ;;  %v6361_v7 = vld [vmem:[%s7363_s30 + $0x34c] sm:$0xf0]  ;;  %v4933_v10 = vor.u32 %v6329_v5, %v4932_v4  ;;  %1603 = vmatpush.bf16.msra.mxu0 %v4677_v8  ;;  %v6343_v52 = vld [vmem:[%s7363_s30 + $0x2c4] sm:$0xf]  ;;  %v4873_v62 = vor.u32 %v6311_v49, %v4870_v51 }
  0x8c   : > { %v4660_v11 = vld [vmem:[%s7363_s30 + $0x20] sm:$0xf]  ;;  %v6261_v12 = vld [vmem:[%s7363_s30 + $0x2c] sm:$0xf0]  ;;  %v5061_v14 = vor.u32 %v6361_v7, %v5060_v6  ;;  %1616 = vmatpush.bf16.msra.mxu1 %v4805_v9  ;;  %v4998_v53 = vld [vmem:[%s7363_s30 + $0x2d0] sm:$0xf0] }
  0x8d   : > { %v4788_v13 = vld [vmem:[%s7363_s30 + $0x120] sm:$0xf]  ;;  %v6293_v15 = vld [vmem:[%s7363_s30 + $0x12c] sm:$0xf0]  ;;  %v4661_v20 = vor.u32 %v6261_v12, %v4660_v11  ;;  %1629 = vmatpush.bf16.msra.mxu2 %v4933_v10  ;;  %v6375_v54 = vld [vmem:[%s7363_s30 + $0x3c4] sm:$0xf]  ;;  %v5001_v63 = vor.u32 %v6343_v52, %v4998_v53 }
  0x8e   : > { %v4916_v16 = vld [vmem:[%s7363_s30 + $0x220] sm:$0xf]  ;;  %v6325_v17 = vld [vmem:[%s7363_s30 + $0x22c] sm:$0xf0]  ;;  %v4789_v23 = vor.u32 %v6293_v15, %v4788_v13  ;;  %1642 = vmatpush.bf16.msra.mxu3 %v5061_v14  ;;  %v5126_v55 = vld [vmem:[%s7363_s30 + $0x3d0] sm:$0xf0] }
  0x8f   : > { %v5044_v18 = vld [vmem:[%s7363_s30 + $0x320] sm:$0xf]  ;;  %v6357_v19 = vld [vmem:[%s7363_s30 + $0x32c] sm:$0xf0]  ;;  %v4917_v24 = vor.u32 %v6325_v17, %v4916_v16  ;;  %1604 = vmatpush.bf16.msra.mxu0 %v4661_v20  ;;  %v6275_v58 = vld [vmem:[%s7363_s30 + $0xa4] sm:$0xf]  ;;  %v5129_v3 = vor.u32 %v6375_v54, %v5126_v55 }
  0x90   : > { %v4644_v21 = vld [vmem:[%s7363_s30] sm:$0xf]  ;;  %v6257_v22 = vld [vmem:[%s7363_s30 + $0xc] sm:$0xf0]  ;;  %v5045_v28 = vor.u32 %v6357_v19, %v5044_v18  ;;  %1617 = vmatpush.bf16.msra.mxu1 %v4789_v23  ;;  %v4726_v59 = vld [vmem:[%s7363_s30 + $0xb0] sm:$0xf0] }
  0x91   : > { %v4772_v25 = vld [vmem:[%s7363_s30 + $0x100] sm:$0xf]  ;;  %v6289_v26 = vld [vmem:[%s7363_s30 + $0x10c] sm:$0xf0]  ;;  %v4645_v35 = vor.u32 %v6257_v22, %v4644_v21  ;;  %1630 = vmatpush.bf16.msra.mxu2 %v4917_v24  ;;  %v6307_v60 = vld [vmem:[%s7363_s30 + $0x1a4] sm:$0xf]  ;;  %v4729_v12 = vor.u32 %v6275_v58, %v4726_v59 }
  0x92   : > { %v4900_v27 = vld [vmem:[%s7363_s30 + $0x200] sm:$0xf]  ;;  %v6321_v29 = vld [vmem:[%s7363_s30 + $0x20c] sm:$0xf0]  ;;  %v4773_v39 = vor.u32 %v6289_v26, %v4772_v25  ;;  %1643 = vmatpush.bf16.msra.mxu3 %v5045_v28  ;;  %v4854_v0 = vld [vmem:[%s7363_s30 + $0x1b0] sm:$0xf0] }
  0x93   : > { %v5028_v30 = vld [vmem:[%s7363_s30 + $0x300] sm:$0xf]  ;;  %v6353_v31 = vld [vmem:[%s7363_s30 + $0x30c] sm:$0xf0]  ;;  %v4901_v40 = vor.u32 %v6321_v29, %v4900_v27  ;;  %1605 = vmatpush.bf16.msra.mxu0 %v4645_v35  ;;  %v6339_v1 = vld [vmem:[%s7363_s30 + $0x2a4] sm:$0xf]  ;;  %v4857_v13 = vor.u32 %v6307_v60, %v4854_v0 }
  0x94   : > { %v5029_v43 = vor.u32 %v6353_v31, %v5028_v30  ;;  %1618 = vmatpush.bf16.msra.mxu1 %v4773_v39  ;;  %v824_v56 = vld [vmem:[%s7415_s24 + $0x10] sm:$0xff]  ;;  %v825_v4 = vld [vmem:[%s7415_s24 + $0x18] sm:$0xff]  ;;  %v822_v5 = vld [vmem:[%s7415_s24] sm:$0xff] }
  0x95   : > { %1631 = vmatpush.bf16.msra.mxu2 %v4901_v40  ;;  %v7506_v61 = vpack.c.bf16 %v824_v56, %v824_v56  ;;  %v4982_v2 = vld [vmem:[%s7363_s30 + $0x2b0] sm:$0xf0]  ;;  %v823_v6 = vld [vmem:[%s7415_s24 + $0x8] sm:$0xff]  ;;  %v6371_v7 = vld [vmem:[%s7363_s30 + $0x3a4] sm:$0xf]  ;;  %v7517_v9 = vpack.c.bf16 %v825_v4, %v825_v4  ;;  %v7519_v10 = vpack.c.bf16 %v822_v5, %v822_v5 }
  0x96   : > { %1644 = vmatpush.bf16.msra.mxu3 %v5029_v43  ;;  %v5110_v8 = vld [vmem:[%s7363_s30 + $0x3b0] sm:$0xf0]  ;;  %v7521_v11 = vpack.c.bf16 %v823_v6, %v823_v6  ;;  %v4985_v14 = vor.u32 %v6339_v1, %v4982_v2  ;;  %v6271_v15 = vld [vmem:[%s7363_s30 + $0x84] sm:$0xf] }
  0x97   : > { %1650 = vmatpush.bf16.msrb.mxu0 %v4761_v44  ;;  %v4710_v16 = vld [vmem:[%s7363_s30 + $0x90] sm:$0xf0]  ;;  %v6303_v17 = vld [vmem:[%s7363_s30 + $0x184] sm:$0xf]  ;;  %v5113_v18 = vor.u32 %v6371_v7, %v5110_v8 }
  0x98   : > { %1663 = vmatpush.bf16.msrb.mxu1 %v4889_v45  ;;  %1632 = vmatmul.bf16.vlgmr.msra.gmra.mxu2 %v7506_v61  ;;  %v4838_v19 = vld [vmem:[%s7363_s30 + $0x190] sm:$0xf0]  ;;  %v6335_v20 = vld [vmem:[%s7363_s30 + $0x284] sm:$0xf]  ;;  %v4713_v24 = vor.u32 %v6271_v15, %v4710_v16  ;;  %v6318_v16 = vld [vmem:[%s7363_s30 + $0x1f4] sm:$0xf0] }
  0x99   : > { %1676 = vmatpush.bf16.msrb.mxu2 %v5017_v46  ;;  %v4966_v21 = vld [vmem:[%s7363_s30 + $0x290] sm:$0xf0]  ;;  %1606 = vmatmul.bf16.vlgmr.msra.gmra.mxu0 %v7519_v10  ;;  %v6367_v22 = vld [vmem:[%s7363_s30 + $0x384] sm:$0xf]  ;;  %v4841_v25 = vor.u32 %v6303_v17, %v4838_v19  ;;  %v5020_v17 = vld [vmem:[%s7363_s30 + $0x2e8] sm:$0xf] }
  0x9a   : > { %1689 = vmatpush.bf16.msrb.mxu3 %v5145_v50  ;;  %v5094_v23 = vld [vmem:[%s7363_s30 + $0x390] sm:$0xf0]  ;;  %1619 = vmatmul.bf16.vlgmr.msra.gmra.mxu1 %v7521_v11  ;;  %v4969_v26 = vor.u32 %v6335_v20, %v4966_v21  ;;  %v6267_v27 = vld [vmem:[%s7363_s30 + $0x64] sm:$0xf]  ;;  %v5148_v21 = vld [vmem:[%s7363_s30 + $0x3e8] sm:$0xf] }
  0x9b   : > { %1651 = vmatpush.bf16.msrb.mxu0 %v4745_v57  ;;  %1645 = vmatmul.bf16.vlgmr.msra.gmra.mxu3 %v7517_v9  ;;  %v4694_v28 = vld [vmem:[%s7363_s30 + $0x70] sm:$0xf0]  ;;  %v6299_v29 = vld [vmem:[%s7363_s30 + $0x164] sm:$0xf]  ;;  %v5097_v30 = vor.u32 %v6367_v22, %v5094_v23  ;;  %v6382_v22 = vld [vmem:[%s7363_s30 + $0x3f4] sm:$0xf0] }
  0x9c   : > { %1664 = vmatpush.bf16.msrb.mxu1 %v4873_v62  ;;  %v4822_v31 = vld [vmem:[%s7363_s30 + $0x170] sm:$0xf0]  ;;  %v6331_v32 = vld [vmem:[%s7363_s30 + $0x264] sm:$0xf]  ;;  %v4697_v36 = vor.u32 %v6267_v27, %v4694_v28  ;;  %v4748_v27 = vld [vmem:[%s7363_s30 + $0xc8] sm:$0xf] }
  0x9d   : > { %1677 = vmatpush.bf16.msrb.mxu2 %v5001_v63  ;;  %v4950_v33 = vld [vmem:[%s7363_s30 + $0x270] sm:$0xf0]  ;;  %v6363_v34 = vld [vmem:[%s7363_s30 + $0x364] sm:$0xf]  ;;  %v4825_v37 = vor.u32 %v6299_v29, %v4822_v31  ;;  %v6282_v28 = vld [vmem:[%s7363_s30 + $0xd4] sm:$0xf0] }
  0x9e   : > { %1690 = vmatpush.bf16.msrb.mxu3 %v5129_v3  ;;  %v5078_v35 = vld [vmem:[%s7363_s30 + $0x370] sm:$0xf0]  ;;  %v4953_v38 = vor.u32 %v6331_v32, %v4950_v33  ;;  %v6263_v39 = vld [vmem:[%s7363_s30 + $0x44] sm:$0xf]  ;;  %v4876_v29 = vld [vmem:[%s7363_s30 + $0x1c8] sm:$0xf] }
  0x9f   : > { %1652 = vmatpush.bf16.msrb.mxu0 %v4729_v12  ;;  %v4678_v40 = vld [vmem:[%s7363_s30 + $0x50] sm:$0xf0]  ;;  %v6295_v41 = vld [vmem:[%s7363_s30 + $0x144] sm:$0xf]  ;;  %v5081_v42 = vor.u32 %v6363_v34, %v5078_v35  ;;  %v4764_v12 = vld [vmem:[%s7363_s30 + $0xe8] sm:$0xf] }
  0xa0   : > { %1665 = vmatpush.bf16.msrb.mxu1 %v4857_v13  ;;  %v4806_v43 = vld [vmem:[%s7363_s30 + $0x150] sm:$0xf0]  ;;  %v6327_v44 = vld [vmem:[%s7363_s30 + $0x244] sm:$0xf]  ;;  %v4681_v48 = vor.u32 %v6263_v39, %v4678_v40  ;;  %v6286_v13 = vld [vmem:[%s7363_s30 + $0xf4] sm:$0xf0] }
  0xa1   : > { %1678 = vmatpush.bf16.msrb.mxu2 %v4985_v14  ;;  %v4934_v45 = vld [vmem:[%s7363_s30 + $0x250] sm:$0xf0]  ;;  %v6359_v46 = vld [vmem:[%s7363_s30 + $0x344] sm:$0xf]  ;;  %v4809_v49 = vor.u32 %v6295_v41, %v4806_v43  ;;  %v4892_v14 = vld [vmem:[%s7363_s30 + $0x1e8] sm:$0xf] }
  0xa2   : > { %1691 = vmatpush.bf16.msrb.mxu3 %v5113_v18  ;;  %v5062_v47 = vld [vmem:[%s7363_s30 + $0x350] sm:$0xf0]  ;;  %v4937_v50 = vor.u32 %v6327_v44, %v4934_v45  ;;  %v6259_v51 = vld [vmem:[%s7363_s30 + $0x24] sm:$0xf]  ;;  %v6350_v18 = vld [vmem:[%s7363_s30 + $0x2f4] sm:$0xf0] }
  0xa3   : > { %1653 = vmatpush.bf16.msrb.mxu0 %v4713_v24  ;;  %v4662_v52 = vld [vmem:[%s7363_s30 + $0x30] sm:$0xf0]  ;;  %v6291_v53 = vld [vmem:[%s7363_s30 + $0x124] sm:$0xf]  ;;  %v5065_v54 = vor.u32 %v6359_v46, %v5062_v47  ;;  %v4765_v24 = vor.u32 %v6286_v13, %v4764_v12  ;;  %v6314_v31 = vld [vmem:[%s7363_s30 + $0x1d4] sm:$0xf0] }
  0xa4   : > { %1666 = vmatpush.bf16.msrb.mxu1 %v4841_v25  ;;  %v4790_v55 = vld [vmem:[%s7363_s30 + $0x130] sm:$0xf0]  ;;  %v6323_v56 = vld [vmem:[%s7363_s30 + $0x224] sm:$0xf]  ;;  %v4665_v60 = vor.u32 %v6259_v51, %v4662_v52  ;;  %v4893_v25 = vor.u32 %v6318_v16, %v4892_v14  ;;  %v5004_v32 = vld [vmem:[%s7363_s30 + $0x2c8] sm:$0xf] }
  0xa5   : > { %1679 = vmatpush.bf16.msrb.mxu2 %v4969_v26  ;;  %v4918_v57 = vld [vmem:[%s7363_s30 + $0x230] sm:$0xf0]  ;;  %v6355_v58 = vld [vmem:[%s7363_s30 + $0x324] sm:$0xf]  ;;  %v4793_v0 = vor.u32 %v6291_v53, %v4790_v55  ;;  %v5021_v26 = vor.u32 %v6350_v18, %v5020_v17  ;;  %v6346_v33 = vld [vmem:[%s7363_s30 + $0x2d4] sm:$0xf0] }
  0xa6   : > { %1692 = vmatpush.bf16.msrb.mxu3 %v5097_v30  ;;  %v5046_v59 = vld [vmem:[%s7363_s30 + $0x330] sm:$0xf0]  ;;  %v6255_v62 = vld [vmem:[%s7363_s30 + $0x4] sm:$0xf]  ;;  %v4921_v1 = vor.u32 %v6323_v56, %v4918_v57  ;;  %v5149_v30 = vor.u32 %v6382_v22, %v5148_v21  ;;  %v5132_v34 = vld [vmem:[%s7363_s30 + $0x3c8] sm:$0xf] }
  0xa7   : > { %1654 = vmatpush.bf16.msrb.mxu0 %v4697_v36  ;;  %v4646_v63 = vld [vmem:[%s7363_s30 + $0x10] sm:$0xf0]  ;;  %v6287_v2 = vld [vmem:[%s7363_s30 + $0x104] sm:$0xf]  ;;  %v5049_v5 = vor.u32 %v6355_v58, %v5046_v59  ;;  %v6378_v35 = vld [vmem:[%s7363_s30 + $0x3d4] sm:$0xf0]  ;;  %v4749_v36 = vor.u32 %v6282_v28, %v4748_v27 }
  0xa8   : > { %1667 = vmatpush.bf16.msrb.mxu1 %v4825_v37  ;;  %v4774_v3 = vld [vmem:[%s7363_s30 + $0x110] sm:$0xf0]  ;;  %v6319_v4 = vld [vmem:[%s7363_s30 + $0x204] sm:$0xf]  ;;  %v4649_v15 = vor.u32 %v6255_v62, %v4646_v63  ;;  %v4877_v37 = vor.u32 %v6314_v31, %v4876_v29  ;;  %v4732_v39 = vld [vmem:[%s7363_s30 + $0xa8] sm:$0xf] }
  0xa9   : > { %1680 = vmatpush.bf16.msrb.mxu2 %v4953_v38  ;;  %v4902_v6 = vld [vmem:[%s7363_s30 + $0x210] sm:$0xf0]  ;;  %v6351_v7 = vld [vmem:[%s7363_s30 + $0x304] sm:$0xf]  ;;  %v4777_v19 = vor.u32 %v6287_v2, %v4774_v3  ;;  %v5005_v38 = vor.u32 %v6346_v33, %v5004_v32  ;;  %v6278_v40 = vld [vmem:[%s7363_s30 + $0xb4] sm:$0xf0] }
  0xaa   : > { %1693 = vmatpush.bf16.msrb.mxu3 %v5081_v42  ;;  %v5030_v8 = vld [vmem:[%s7363_s30 + $0x310] sm:$0xf0]  ;;  %v4905_v20 = vor.u32 %v6319_v4, %v4902_v6  ;;  %v4860_v41 = vld [vmem:[%s7363_s30 + $0x1a8] sm:$0xf]  ;;  %v5133_v42 = vor.u32 %v6378_v35, %v5132_v34  ;;  %v6310_v43 = vld [vmem:[%s7363_s30 + $0x1b4] sm:$0xf0] }
  0xab   : > { %1655 = vmatpush.bf16.msrb.mxu0 %v4681_v48  ;;  %v5033_v23 = vor.u32 %v6351_v7, %v5030_v8  ;;  %v4988_v44 = vld [vmem:[%s7363_s30 + $0x2a8] sm:$0xf]  ;;  %v6342_v45 = vld [vmem:[%s7363_s30 + $0x2b4] sm:$0xf0]  ;;  %v4733_v48 = vor.u32 %v6278_v40, %v4732_v39 }
  0xac   : > { %1668 = vmatpush.bf16.msrb.mxu1 %v4809_v49  ;;  %v5116_v46 = vld [vmem:[%s7363_s30 + $0x3a8] sm:$0xf]  ;;  %v6374_v47 = vld [vmem:[%s7363_s30 + $0x3b4] sm:$0xf0]  ;;  %v4861_v49 = vor.u32 %v6310_v43, %v4860_v41 }
  0xad   : > { %1681 = vmatpush.bf16.msrb.mxu2 %v4937_v50  ;;  %v4989_v50 = vor.u32 %v6342_v45, %v4988_v44  ;;  %v4716_v51 = vld [vmem:[%s7363_s30 + $0x88] sm:$0xf]  ;;  %v6274_v52 = vld [vmem:[%s7363_s30 + $0x94] sm:$0xf0] }
  0xae   : > { %1694 = vmatpush.bf16.msrb.mxu3 %v5065_v54  ;;  %v4844_v53 = vld [vmem:[%s7363_s30 + $0x188] sm:$0xf]  ;;  %v5117_v54 = vor.u32 %v6374_v47, %v5116_v46  ;;  %v6306_v55 = vld [vmem:[%s7363_s30 + $0x194] sm:$0xf0] }
  0xaf   : > { %1656 = vmatpush.bf16.msrb.mxu0 %v4665_v60  ;;  %v4972_v56 = vld [vmem:[%s7363_s30 + $0x288] sm:$0xf]  ;;  %v6338_v57 = vld [vmem:[%s7363_s30 + $0x294] sm:$0xf0]  ;;  %v4717_v60 = vor.u32 %v6274_v52, %v4716_v51  ;;  %v4845_v62 = vor.u32 %v6306_v55, %v4844_v53  ;;  %v4894_v52 = vld [vmem:[%s7363_s30 + $0x1f8] sm:$0xf0] }
  0xb0   : > { %1669 = vmatpush.bf16.msrb.mxu1 %v4793_v0  ;;  %v5100_v58 = vld [vmem:[%s7363_s30 + $0x388] sm:$0xf]  ;;  %v6370_v59 = vld [vmem:[%s7363_s30 + $0x394] sm:$0xf0]  ;;  %v4973_v63 = vor.u32 %v6338_v57, %v4972_v56  ;;  %v6348_v53 = vld [vmem:[%s7363_s30 + $0x2ec] sm:$0xf] }
  0xb1   : > { %1682 = vmatpush.bf16.msrb.mxu2 %v4921_v1  ;;  %v4700_v0 = vld [vmem:[%s7363_s30 + $0x68] sm:$0xf]  ;;  %v6270_v1 = vld [vmem:[%s7363_s30 + $0x74] sm:$0xf0]  ;;  %v5101_v3 = vor.u32 %v6370_v59, %v5100_v58  ;;  %v6380_v57 = vld [vmem:[%s7363_s30 + $0x3ec] sm:$0xf] }
  0xb2   : > { %1695 = vmatpush.bf16.msrb.mxu3 %v5049_v5  ;;  %v4828_v2 = vld [vmem:[%s7363_s30 + $0x168] sm:$0xf]  ;;  %v6302_v4 = vld [vmem:[%s7363_s30 + $0x174] sm:$0xf0]  ;;  %v4701_v12 = vor.u32 %v6270_v1, %v4700_v0  ;;  %v5150_v58 = vld [vmem:[%s7363_s30 + $0x3f8] sm:$0xf0] }
  0xb3   : > { %1657 = vmatpush.bf16.msrb.mxu0 %v4649_v15  ;;  %v4956_v5 = vld [vmem:[%s7363_s30 + $0x268] sm:$0xf]  ;;  %v6334_v6 = vld [vmem:[%s7363_s30 + $0x274] sm:$0xf0]  ;;  %v4829_v13 = vor.u32 %v6302_v4, %v4828_v2  ;;  %v6280_v0 = vld [vmem:[%s7363_s30 + $0xcc] sm:$0xf] }
  0xb4   : > { %1670 = vmatpush.bf16.msrb.mxu1 %v4777_v19  ;;  %v5084_v7 = vld [vmem:[%s7363_s30 + $0x368] sm:$0xf]  ;;  %v6366_v8 = vld [vmem:[%s7363_s30 + $0x374] sm:$0xf0]  ;;  %v4957_v14 = vor.u32 %v6334_v6, %v4956_v5  ;;  %v4750_v1 = vld [vmem:[%s7363_s30 + $0xd8] sm:$0xf0] }
  0xb5   : > { %1683 = vmatpush.bf16.msrb.mxu2 %v4905_v20  ;;  %v4684_v15 = vld [vmem:[%s7363_s30 + $0x48] sm:$0xf]  ;;  %v6266_v16 = vld [vmem:[%s7363_s30 + $0x54] sm:$0xf0]  ;;  %v5085_v18 = vor.u32 %v6366_v8, %v5084_v7  ;;  %v6312_v2 = vld [vmem:[%s7363_s30 + $0x1cc] sm:$0xf] }
  0xb6   : > { %1696 = vmatpush.bf16.msrb.mxu3 %v5033_v23  ;;  %1658 = vmatmul.bf16.vlgmr.msrb.gmra.mxu0 %v7519_v10  ;;  %v4812_v17 = vld [vmem:[%s7363_s30 + $0x148] sm:$0xf]  ;;  %v6298_v19 = vld [vmem:[%s7363_s30 + $0x154] sm:$0xf0]  ;;  %v4878_v4 = vld [vmem:[%s7363_s30 + $0x1d8] sm:$0xf0] }
  0xb7   : > { %1702 = vmatpush.bf16.msra.mxu0 %v4765_v24  ;;  %1671 = vmatmul.bf16.vlgmr.msrb.gmra.mxu1 %v7521_v11  ;;  %v4940_v20 = vld [vmem:[%s7363_s30 + $0x248] sm:$0xf]  ;;  %v6330_v21 = vld [vmem:[%s7363_s30 + $0x254] sm:$0xf0]  ;;  %v4685_v24 = vor.u32 %v6266_v16, %v4684_v15  ;;  %v6344_v5 = vld [vmem:[%s7363_s30 + $0x2cc] sm:$0xf] }
  0xb8   : > { %1715 = vmatpush.bf16.msra.mxu1 %v4893_v25  ;;  %1684 = vmatmul.bf16.vlgmr.msrb.gmra.mxu2 %v7506_v61  ;;  %v5068_v22 = vld [vmem:[%s7363_s30 + $0x348] sm:$0xf]  ;;  %v6362_v23 = vld [vmem:[%s7363_s30 + $0x354] sm:$0xf0]  ;;  %v4813_v25 = vor.u32 %v6298_v19, %v4812_v17  ;;  %v5006_v6 = vld [vmem:[%s7363_s30 + $0x2d8] sm:$0xf0] }
  0xb9   : > { %1728 = vmatpush.bf16.msra.mxu2 %v5021_v26  ;;  %1697 = vmatmul.bf16.vlgmr.msrb.gmra.mxu3 %v7517_v9  ;;  %v4941_v26 = vor.u32 %v6330_v21, %v4940_v20  ;;  %v4668_v27 = vld [vmem:[%s7363_s30 + $0x28] sm:$0xf]  ;;  %v6262_v28 = vld [vmem:[%s7363_s30 + $0x34] sm:$0xf0]  ;;  %v6376_v7 = vld [vmem:[%s7363_s30 + $0x3cc] sm:$0xf] }
  0xba   : > { %1741 = vmatpush.bf16.msra.mxu3 %v5149_v30  ;;  %v4796_v29 = vld [vmem:[%s7363_s30 + $0x128] sm:$0xf]  ;;  %v5069_v30 = vor.u32 %v6362_v23, %v5068_v22  ;;  %v6294_v31 = vld [vmem:[%s7363_s30 + $0x134] sm:$0xf0]  ;;  %v5134_v8 = vld [vmem:[%s7363_s30 + $0x3d8] sm:$0xf0] }
  0xbb   : > { %1703 = vmatpush.bf16.msra.mxu0 %v4749_v36  ;;  %v4924_v32 = vld [vmem:[%s7363_s30 + $0x228] sm:$0xf]  ;;  %v6326_v33 = vld [vmem:[%s7363_s30 + $0x234] sm:$0xf0]  ;;  %v4669_v36 = vor.u32 %v6262_v28, %v4668_v27  ;;  %v4797_v39 = vor.u32 %v6294_v31, %v4796_v29  ;;  %v6276_v15 = vld [vmem:[%s7363_s30 + $0xac] sm:$0xf] }
  0xbc   : > { %1716 = vmatpush.bf16.msra.mxu1 %v4877_v37  ;;  %v5052_v34 = vld [vmem:[%s7363_s30 + $0x328] sm:$0xf]  ;;  %v6358_v35 = vld [vmem:[%s7363_s30 + $0x334] sm:$0xf0]  ;;  %v4925_v40 = vor.u32 %v6326_v33, %v4924_v32  ;;  %v4734_v16 = vld [vmem:[%s7363_s30 + $0xb8] sm:$0xf0] }
  0xbd   : > { %1729 = vmatpush.bf16.msra.mxu2 %v5005_v38  ;;  %v4652_v37 = vld [vmem:[%s7363_s30 + $0x8] sm:$0xf]  ;;  %v6258_v38 = vld [vmem:[%s7363_s30 + $0x14] sm:$0xf0]  ;;  %v5053_v44 = vor.u32 %v6358_v35, %v5052_v34  ;;  %v6308_v17 = vld [vmem:[%s7363_s30 + $0x1ac] sm:$0xf] }
  0xbe   : > { %1742 = vmatpush.bf16.msra.mxu3 %v5133_v42  ;;  %v4780_v41 = vld [vmem:[%s7363_s30 + $0x108] sm:$0xf]  ;;  %v6290_v42 = vld [vmem:[%s7363_s30 + $0x114] sm:$0xf0]  ;;  %v4653_v51 = vor.u32 %v6258_v38, %v4652_v37  ;;  %v4862_v19 = vld [vmem:[%s7363_s30 + $0x1b8] sm:$0xf0] }
  0xbf   : > { %1704 = vmatpush.bf16.msra.mxu0 %v4733_v48  ;;  %v4908_v43 = vld [vmem:[%s7363_s30 + $0x208] sm:$0xf]  ;;  %v6322_v45 = vld [vmem:[%s7363_s30 + $0x214] sm:$0xf0]  ;;  %v6284_v48 = vld [vmem:[%s7363_s30 + $0xec] sm:$0xf]  ;;  %v4781_v55 = vor.u32 %v6290_v42, %v4780_v41 }
  0xc0   : > { %1717 = vmatpush.bf16.msra.mxu1 %v4861_v49  ;;  %v5036_v46 = vld [vmem:[%s7363_s30 + $0x308] sm:$0xf]  ;;  %v6354_v47 = vld [vmem:[%s7363_s30 + $0x314] sm:$0xf0]  ;;  %v4766_v49 = vld [vmem:[%s7363_s30 + $0xf8] sm:$0xf0]  ;;  %v4909_v56 = vor.u32 %v6322_v45, %v4908_v43 }
  0xc1   : > { %1730 = vmatpush.bf16.msra.mxu2 %v4989_v50  ;;  %v6316_v50 = vld [vmem:[%s7363_s30 + $0x1ec] sm:$0xf]  ;;  %v5037_v59 = vor.u32 %v6354_v47, %v5036_v46  ;;  %v4990_v21 = vld [vmem:[%s7363_s30 + $0x2b8] sm:$0xf0] }
  0xc2   : > { %1743 = vmatpush.bf16.msra.mxu3 %v5117_v54  ;;  %v5022_v54 = vld [vmem:[%s7363_s30 + $0x2f8] sm:$0xf0]  ;;  %v6340_v20 = vld [vmem:[%s7363_s30 + $0x2ac] sm:$0xf] }
  0xc3   : > { %1705 = vmatpush.bf16.msra.mxu0 %v4717_v60  ;;  %v4769_v60 = vor.u32 %v6284_v48, %v4766_v49  ;;  %v6372_v22 = vld [vmem:[%s7363_s30 + $0x3ac] sm:$0xf]  ;;  %v5118_v23 = vld [vmem:[%s7363_s30 + $0x3b8] sm:$0xf0] }
  0xc4   : > { %1718 = vmatpush.bf16.msra.mxu1 %v4845_v62  ;;  %v4897_v62 = vor.u32 %v6316_v50, %v4894_v52  ;;  %v6272_v27 = vld [vmem:[%s7363_s30 + $0x8c] sm:$0xf]  ;;  %v4718_v28 = vld [vmem:[%s7363_s30 + $0x98] sm:$0xf0] }
  0xc5   : > { %1731 = vmatpush.bf16.msra.mxu2 %v4973_v63  ;;  %v5025_v63 = vor.u32 %v6348_v53, %v5022_v54  ;;  %v6304_v29 = vld [vmem:[%s7363_s30 + $0x18c] sm:$0xf]  ;;  %v4846_v31 = vld [vmem:[%s7363_s30 + $0x198] sm:$0xf0] }
  0xc6   : > { %1744 = vmatpush.bf16.msra.mxu3 %v5101_v3  ;;  %v5153_v3 = vor.u32 %v6380_v57, %v5150_v58  ;;  %v6336_v32 = vld [vmem:[%s7363_s30 + $0x28c] sm:$0xf]  ;;  %v4974_v33 = vld [vmem:[%s7363_s30 + $0x298] sm:$0xf0]  ;;  %v4849_v37 = vor.u32 %v6304_v29, %v4846_v31  ;;  %v5524_v29 = vld [vmem:[%s7369_s13 + $0x2e0] sm:$0xf] }
  0xc7   : > { %1706 = vmatpush.bf16.msra.mxu0 %v4701_v12  ;;  %v4753_v12 = vor.u32 %v6280_v0, %v4750_v1  ;;  %v6368_v34 = vld [vmem:[%s7363_s30 + $0x38c] sm:$0xf]  ;;  %v5102_v35 = vld [vmem:[%s7363_s30 + $0x398] sm:$0xf0]  ;;  %v4977_v38 = vor.u32 %v6336_v32, %v4974_v33  ;;  %v5652_v33 = vld [vmem:[%s7369_s13 + $0x3e0] sm:$0xf] }
  0xc8   : > { %1719 = vmatpush.bf16.msra.mxu1 %v4829_v13  ;;  %v4881_v13 = vor.u32 %v6312_v2, %v4878_v4  ;;  %v6300_v41 = vld [vmem:[%s7363_s30 + $0x16c] sm:$0xf]  ;;  %v5105_v42 = vor.u32 %v6368_v34, %v5102_v35  ;;  %v4830_v43 = vld [vmem:[%s7363_s30 + $0x178] sm:$0xf0]  ;;  %v6509_v34 = vld [vmem:[%s7369_s13 + $0x3ec] sm:$0xf0] }
  0xc9   : > { %1732 = vmatpush.bf16.msra.mxu2 %v4957_v14  ;;  %v5009_v14 = vor.u32 %v6344_v5, %v5006_v6  ;;  %v4958_v45 = vld [vmem:[%s7363_s30 + $0x278] sm:$0xf0]  ;;  %v6364_v46 = vld [vmem:[%s7363_s30 + $0x36c] sm:$0xf]  ;;  %v4833_v49 = vor.u32 %v6300_v41, %v4830_v43  ;;  %v5380_v41 = vld [vmem:[%s7369_s13 + $0x1c0] sm:$0xf] }
  0xca   : > { %1745 = vmatpush.bf16.msra.mxu3 %v5085_v18  ;;  %v5137_v18 = vor.u32 %v6376_v7, %v5134_v8  ;;  %v5086_v47 = vld [vmem:[%s7363_s30 + $0x378] sm:$0xf0]  ;;  %v6296_v53 = vld [vmem:[%s7363_s30 + $0x14c] sm:$0xf]  ;;  %v6441_v43 = vld [vmem:[%s7369_s13 + $0x1cc] sm:$0xf0] }
  0xcb   : > { %1707 = vmatpush.bf16.msra.mxu0 %v4685_v24  ;;  %v4737_v24 = vor.u32 %v6276_v15, %v4734_v16  ;;  %v4686_v52 = vld [vmem:[%s7363_s30 + $0x58] sm:$0xf0]  ;;  %v5089_v54 = vor.u32 %v6364_v46, %v5086_v47  ;;  %v6360_v58 = vld [vmem:[%s7363_s30 + $0x34c] sm:$0xf]  ;;  %v5636_v46 = vld [vmem:[%s7369_s13 + $0x3c0] sm:$0xf] }
  0xcc   : > { %1720 = vmatpush.bf16.msra.mxu1 %v4813_v25  ;;  %v4865_v25 = vor.u32 %v6308_v17, %v4862_v19  ;;  %v4942_v57 = vld [vmem:[%s7363_s30 + $0x258] sm:$0xf0]  ;;  %v6260_v0 = vld [vmem:[%s7363_s30 + $0x2c] sm:$0xf]  ;;  %v6505_v47 = vld [vmem:[%s7369_s13 + $0x3cc] sm:$0xf0] }
  0xcd   : > { %1733 = vmatpush.bf16.msra.mxu2 %v4941_v26  ;;  %v4993_v26 = vor.u32 %v6340_v20, %v4990_v21  ;;  %v4670_v1 = vld [vmem:[%s7363_s30 + $0x38] sm:$0xf0]  ;;  %v6292_v2 = vld [vmem:[%s7363_s30 + $0x12c] sm:$0xf] }
  0xce   : > { %1746 = vmatpush.bf16.msra.mxu3 %v5069_v30  ;;  %v5121_v30 = vor.u32 %v6372_v22, %v5118_v23  ;;  %v4798_v4 = vld [vmem:[%s7363_s30 + $0x138] sm:$0xf0]  ;;  %v6324_v5 = vld [vmem:[%s7363_s30 + $0x22c] sm:$0xf] }
  0xcf   : > { %1708 = vmatpush.bf16.msra.mxu0 %v4669_v36  ;;  %v4721_v36 = vor.u32 %v6272_v27, %v4718_v28  ;;  %v4926_v6 = vld [vmem:[%s7363_s30 + $0x238] sm:$0xf0]  ;;  %v6356_v7 = vld [vmem:[%s7363_s30 + $0x32c] sm:$0xf]  ;;  %v4801_v15 = vor.u32 %v6292_v2, %v4798_v4  ;;  %v6445_v28 = vld [vmem:[%s7369_s13 + $0x1ec] sm:$0xf0] }
  0xd0   : > { %1721 = vmatpush.bf16.msra.mxu1 %v4797_v39  ;;  %v6268_v39 = vld [vmem:[%s7363_s30 + $0x6c] sm:$0xf]  ;;  %v5054_v8 = vld [vmem:[%s7363_s30 + $0x338] sm:$0xf0]  ;;  %v4929_v16 = vor.u32 %v6324_v5, %v4926_v6  ;;  %v5348_v2 = vld [vmem:[%s7369_s13 + $0x180] sm:$0xf] }
  0xd1   : > { %1734 = vmatpush.bf16.msra.mxu2 %v4925_v40  ;;  %v4702_v40 = vld [vmem:[%s7363_s30 + $0x78] sm:$0xf0]  ;;  %v6288_v17 = vld [vmem:[%s7363_s30 + $0x10c] sm:$0xf]  ;;  %v5057_v20 = vor.u32 %v6356_v7, %v5054_v8  ;;  %v6433_v4 = vld [vmem:[%s7369_s13 + $0x18c] sm:$0xf0] }
  0xd2   : > { %1747 = vmatpush.bf16.msra.mxu3 %v5053_v44  ;;  %v6332_v44 = vld [vmem:[%s7363_s30 + $0x26c] sm:$0xf]  ;;  %v4705_v48 = vor.u32 %v6268_v39, %v4702_v40  ;;  %v4910_v21 = vld [vmem:[%s7363_s30 + $0x218] sm:$0xf0]  ;;  %v5252_v39 = vld [vmem:[%s7369_s13 + $0xc0] sm:$0xf] }
  0xd3   : > { %1709 = vmatpush.bf16.msra.mxu0 %v4653_v51  ;;  %v4961_v50 = vor.u32 %v6332_v44, %v4958_v45  ;;  %v6264_v51 = vld [vmem:[%s7363_s30 + $0x4c] sm:$0xf]  ;;  %v5038_v23 = vld [vmem:[%s7363_s30 + $0x318] sm:$0xf0]  ;;  %v6409_v40 = vld [vmem:[%s7369_s13 + $0xcc] sm:$0xf0] }
  0xd4   : > { %1722 = vmatpush.bf16.msra.mxu1 %v4781_v55  ;;  %v4814_v55 = vld [vmem:[%s7363_s30 + $0x158] sm:$0xf0]  ;;  %v6320_v19 = vld [vmem:[%s7363_s30 + $0x20c] sm:$0xf]  ;;  %v5508_v44 = vld [vmem:[%s7369_s13 + $0x2c0] sm:$0xf] }
  0xd5   : > { %1735 = vmatpush.bf16.msra.mxu2 %v4909_v56  ;;  %v6328_v56 = vld [vmem:[%s7363_s30 + $0x24c] sm:$0xf]  ;;  %v4913_v32 = vor.u32 %v6320_v19, %v4910_v21  ;;  %v6473_v45 = vld [vmem:[%s7369_s13 + $0x2cc] sm:$0xf0]  ;;  %v5476_v5 = vld [vmem:[%s7369_s13 + $0x280] sm:$0xf] }
  0xd6   : > { %1748 = vmatpush.bf16.msra.mxu3 %v5037_v59  ;;  %1710 = vmatmul.bf16.vlgmr.msra.gmra.mxu0 %v7519_v10  ;;  %v5070_v59 = vld [vmem:[%s7363_s30 + $0x358] sm:$0xf0]  ;;  %v6352_v22 = vld [vmem:[%s7363_s30 + $0x30c] sm:$0xf]  ;;  %v6465_v6 = vld [vmem:[%s7369_s13 + $0x28c] sm:$0xf0] }
  0xd7   : > { %1754 = vmatpush.bf16.msrb.mxu0 %v4769_v60  ;;  %1723 = vmatmul.bf16.vlgmr.msra.gmra.mxu1 %v7521_v11  ;;  %v4689_v60 = vor.u32 %v6264_v51, %v4686_v52  ;;  %v5041_v35 = vor.u32 %v6352_v22, %v5038_v23  ;;  %v5236_v51 = vld [vmem:[%s7369_s13 + $0xa0] sm:$0xf]  ;;  %v6405_v52 = vld [vmem:[%s7369_s13 + $0xac] sm:$0xf0] }
  0xd8   : > { %1767 = vmatpush.bf16.msrb.mxu1 %v4897_v62  ;;  %1736 = vmatmul.bf16.vlgmr.msra.gmra.mxu2 %v7506_v61  ;;  %v4817_v62 = vor.u32 %v6296_v53, %v4814_v55  ;;  %v5364_v53 = vld [vmem:[%s7369_s13 + $0x1a0] sm:$0xf]  ;;  %v6437_v55 = vld [vmem:[%s7369_s13 + $0x1ac] sm:$0xf0] }
  0xd9   : > { %1780 = vmatpush.bf16.msrb.mxu2 %v5025_v63  ;;  %1749 = vmatmul.bf16.vlgmr.msra.gmra.mxu3 %v7517_v9  ;;  %v4945_v63 = vor.u32 %v6328_v56, %v4942_v57  ;;  %v5492_v56 = vld [vmem:[%s7369_s13 + $0x2a0] sm:$0xf]  ;;  %v6469_v57 = vld [vmem:[%s7369_s13 + $0x2ac] sm:$0xf0] }
  0xda   : > { %1793 = vmatpush.bf16.msrb.mxu3 %v5153_v3  ;;  %v5073_v3 = vor.u32 %v6360_v58, %v5070_v59  ;;  %v5620_v58 = vld [vmem:[%s7369_s13 + $0x3a0] sm:$0xf]  ;;  %v6501_v59 = vld [vmem:[%s7369_s13 + $0x3ac] sm:$0xf0] }
  0xdb   : > { %1755 = vmatpush.bf16.msrb.mxu0 %v4753_v12  ;;  %v4673_v12 = vor.u32 %v6260_v0, %v4670_v1  ;;  %v5220_v0 = vld [vmem:[%s7369_s13 + $0x80] sm:$0xf]  ;;  %v6401_v1 = vld [vmem:[%s7369_s13 + $0x8c] sm:$0xf0] }
  0xdc   : > { %1768 = vmatpush.bf16.msrb.mxu1 %v4881_v13  ;;  %v6256_v13 = vld [vmem:[%s7363_s30 + $0xc] sm:$0xf]  ;;  %v5604_v7 = vld [vmem:[%s7369_s13 + $0x380] sm:$0xf]  ;;  %v6497_v8 = vld [vmem:[%s7369_s13 + $0x38c] sm:$0xf0] }
  0xdd   : > { %1781 = vmatpush.bf16.msrb.mxu2 %v5009_v14  ;;  %v4654_v14 = vld [vmem:[%s7363_s30 + $0x18] sm:$0xf0]  ;;  %v6429_v19 = vld [vmem:[%s7369_s13 + $0x16c] sm:$0xf0]  ;;  %v5588_v22 = vld [vmem:[%s7369_s13 + $0x360] sm:$0xf] }
  0xde   : > { %1794 = vmatpush.bf16.msrb.mxu3 %v5137_v18  ;;  %v4782_v18 = vld [vmem:[%s7363_s30 + $0x118] sm:$0xf0]  ;;  %v4657_v27 = vor.u32 %v6256_v13, %v4654_v14  ;;  %v5349_v13 = vor.u32 %v6433_v4, %v5348_v2  ;;  %v5477_v14 = vor.u32 %v6465_v6, %v5476_v5  ;;  %v6461_v21 = vld [vmem:[%s7369_s13 + $0x26c] sm:$0xf0]  ;;  %v6475_v2 = vld [vmem:[%s7369_s13 + $0x2e4] sm:$0xf] }
  0xdf   : > { %1756 = vmatpush.bf16.msrb.mxu0 %v4737_v24  ;;  %v5268_v24 = vld [vmem:[%s7369_s13 + $0xe0] sm:$0xf]  ;;  %v4785_v31 = vor.u32 %v6288_v17, %v4782_v18  ;;  %v5605_v18 = vor.u32 %v6497_v8, %v5604_v7  ;;  %v6493_v23 = vld [vmem:[%s7369_s13 + $0x36c] sm:$0xf0]  ;;  %v6507_v6 = vld [vmem:[%s7369_s13 + $0x3e4] sm:$0xf] }
  0xe0   : > { %1769 = vmatpush.bf16.msrb.mxu1 %v4865_v25  ;;  %v6413_v25 = vld [vmem:[%s7369_s13 + $0xec] sm:$0xf0]  ;;  %v5332_v17 = vld [vmem:[%s7369_s13 + $0x160] sm:$0xf]  ;;  %v5654_v7 = vld [vmem:[%s7369_s13 + $0x3f0] sm:$0xf0] }
  0xe1   : > { %1782 = vmatpush.bf16.msrb.mxu2 %v4993_v26  ;;  %v5396_v26 = vld [vmem:[%s7369_s13 + $0x1e0] sm:$0xf]  ;;  %s8658_s30 = sld [smem:[#allocation34_spill]] }
  0xe2   : > { %1795 = vmatpush.bf16.msrb.mxu3 %v5121_v30  ;;  %v6477_v30 = vld [vmem:[%s7369_s13 + $0x2ec] sm:$0xf0] }
  0xe3   : > { %1757 = vmatpush.bf16.msrb.mxu0 %v4721_v36  ;;  %v5269_v36 = vor.u32 %v6413_v25, %v5268_v24  ;;  %v5333_v25 = vor.u32 %v6429_v19, %v5332_v17  ;;  %v6439_v17 = vld [vmem:[%s7369_s13 + $0x1c4] sm:$0xf]  ;;  %v5382_v19 = vld [vmem:[%s7369_s13 + $0x1d0] sm:$0xf0] }
  0xe4   : > { %1770 = vmatpush.bf16.msrb.mxu1 %v4849_v37  ;;  %v5397_v37 = vor.u32 %v6445_v28, %v5396_v26  ;;  %v6393_v28 = vld [vmem:[%s7369_s13 + $0x4c] sm:$0xf0] }
  0xe5   : > { %1783 = vmatpush.bf16.msrb.mxu2 %v4977_v38  ;;  %v5525_v38 = vor.u32 %v6477_v30, %v5524_v29  ;;  %v5316_v29 = vld [vmem:[%s7369_s13 + $0x140] sm:$0xf]  ;;  %v5589_v30 = vor.u32 %v6493_v23, %v5588_v22  ;;  %v6503_v22 = vld [vmem:[%s7369_s13 + $0x3c4] sm:$0xf]  ;;  %v5638_v23 = vld [vmem:[%s7369_s13 + $0x3d0] sm:$0xf0] }
  0xe6   : > { %1796 = vmatpush.bf16.msrb.mxu3 %v5105_v42  ;;  %v5653_v42 = vor.u32 %v6509_v34, %v5652_v33  ;;  %v6457_v33 = vld [vmem:[%s7369_s13 + $0x24c] sm:$0xf0]  ;;  %v5572_v34 = vld [vmem:[%s7369_s13 + $0x340] sm:$0xf] }
  0xe7   : > { %1758 = vmatpush.bf16.msrb.mxu0 %v4705_v48  ;;  %v5253_v48 = vor.u32 %v6409_v40, %v5252_v39  ;;  %v5172_v39 = vld [vmem:[%s7369_s13 + $0x20] sm:$0xf]  ;;  %v6389_v40 = vld [vmem:[%s7369_s13 + $0x2c] sm:$0xf0]  ;;  %s8659_s2 = smov %s8658_s30 }
  0xe8   : > { %1771 = vmatpush.bf16.msrb.mxu1 %v4833_v49  ;;  %v5381_v49 = vor.u32 %v6441_v43, %v5380_v41  ;;  %v5300_v41 = vld [vmem:[%s7369_s13 + $0x120] sm:$0xf]  ;;  %v6421_v43 = vld [vmem:[%s7369_s13 + $0x12c] sm:$0xf0] }
  0xe9   : > { %1784 = vmatpush.bf16.msrb.mxu2 %v4961_v50  ;;  %v5509_v50 = vor.u32 %v6473_v45, %v5508_v44  ;;  %v5428_v44 = vld [vmem:[%s7369_s13 + $0x220] sm:$0xf]  ;;  %v6453_v45 = vld [vmem:[%s7369_s13 + $0x22c] sm:$0xf0] }
  0xea   : > { %1797 = vmatpush.bf16.msrb.mxu3 %v5089_v54  ;;  %v5637_v54 = vor.u32 %v6505_v47, %v5636_v46  ;;  %v5556_v46 = vld [vmem:[%s7369_s13 + $0x320] sm:$0xf]  ;;  %v6485_v47 = vld [vmem:[%s7369_s13 + $0x32c] sm:$0xf0] }
  0xeb   : > { %1759 = vmatpush.bf16.msrb.mxu0 %v4689_v60  ;;  %v5237_v60 = vor.u32 %v6405_v52, %v5236_v51  ;;  %v5301_v51 = vor.u32 %v6421_v43, %v5300_v41  ;;  %v5429_v52 = vor.u32 %v6453_v45, %v5428_v44  ;;  %v6431_v41 = vld [vmem:[%s7369_s13 + $0x184] sm:$0xf]  ;;  %v5350_v43 = vld [vmem:[%s7369_s13 + $0x190] sm:$0xf0] }
  0xec   : > { %1772 = vmatpush.bf16.msrb.mxu1 %v4817_v62  ;;  %v5365_v62 = vor.u32 %v6437_v55, %v5364_v53  ;;  %v5284_v53 = vld [vmem:[%s7369_s13 + $0x100] sm:$0xf]  ;;  %v6463_v44 = vld [vmem:[%s7369_s13 + $0x284] sm:$0xf]  ;;  %v5478_v45 = vld [vmem:[%s7369_s13 + $0x290] sm:$0xf0] }
  0xed   : > { %1785 = vmatpush.bf16.msrb.mxu2 %v4945_v63  ;;  %v5493_v63 = vor.u32 %v6469_v57, %v5492_v56  ;;  %v5412_v55 = vld [vmem:[%s7369_s13 + $0x200] sm:$0xf]  ;;  %v5557_v56 = vor.u32 %v6485_v47, %v5556_v46  ;;  %v6449_v57 = vld [vmem:[%s7369_s13 + $0x20c] sm:$0xf0]  ;;  %v6495_v46 = vld [vmem:[%s7369_s13 + $0x384] sm:$0xf] }
  0xee   : > { %1798 = vmatpush.bf16.msrb.mxu3 %v5073_v3  ;;  %v5621_v3 = vor.u32 %v6501_v59, %v5620_v58  ;;  %v5540_v58 = vld [vmem:[%s7369_s13 + $0x300] sm:$0xf]  ;;  %v6481_v59 = vld [vmem:[%s7369_s13 + $0x30c] sm:$0xf0]  ;;  %v5413_v5 = vor.u32 %v6449_v57, %v5412_v55  ;;  %v5606_v47 = vld [vmem:[%s7369_s13 + $0x390] sm:$0xf0] }
  0xef   : > { %1760 = vmatpush.bf16.msrb.mxu0 %v4673_v12  ;;  %v5221_v12 = vor.u32 %v6401_v1, %v5220_v0  ;;  %v5398_v1 = vld [vmem:[%s7369_s13 + $0x1f0] sm:$0xf0]  ;;  %v5541_v8 = vor.u32 %v6481_v59, %v5540_v58  ;;  %v6491_v58 = vld [vmem:[%s7369_s13 + $0x364] sm:$0xf] }
  0xf0   : > { %1773 = vmatpush.bf16.msrb.mxu1 %v4801_v15  ;;  %v5204_v15 = vld [vmem:[%s7369_s13 + $0x60] sm:$0xf]  ;;  %v5334_v55 = vld [vmem:[%s7369_s13 + $0x170] sm:$0xf0] }
  0xf1   : > { %1786 = vmatpush.bf16.msrb.mxu2 %v4929_v16  ;;  %v6397_v16 = vld [vmem:[%s7369_s13 + $0x6c] sm:$0xf0]  ;;  %v5462_v57 = vld [vmem:[%s7369_s13 + $0x270] sm:$0xf0] }
  0xf2   : > { %1799 = vmatpush.bf16.msrb.mxu3 %v5057_v20  ;;  %v5460_v20 = vld [vmem:[%s7369_s13 + $0x260] sm:$0xf]  ;;  %v5205_v24 = vor.u32 %v6397_v16, %v5204_v15  ;;  %v6407_v15 = vld [vmem:[%s7369_s13 + $0xc4] sm:$0xf]  ;;  %v5254_v16 = vld [vmem:[%s7369_s13 + $0xd0] sm:$0xf0] }
  0xf3   : > { %1761 = vmatpush.bf16.msrb.mxu0 %v4657_v27  ;;  %v5461_v26 = vor.u32 %v6461_v21, %v5460_v20  ;;  %v5188_v27 = vld [vmem:[%s7369_s13 + $0x40] sm:$0xf]  ;;  %v6471_v20 = vld [vmem:[%s7369_s13 + $0x2c4] sm:$0xf]  ;;  %v5510_v21 = vld [vmem:[%s7369_s13 + $0x2d0] sm:$0xf0] }
  0xf4   : > { %1774 = vmatpush.bf16.msrb.mxu1 %v4785_v31  ;;  %v6425_v31 = vld [vmem:[%s7369_s13 + $0x14c] sm:$0xf0]  ;;  %v5590_v59 = vld [vmem:[%s7369_s13 + $0x370] sm:$0xf0] }
  0xf5   : > { %1787 = vmatpush.bf16.msrb.mxu2 %v4913_v32  ;;  %v5444_v32 = vld [vmem:[%s7369_s13 + $0x240] sm:$0xf] }
  0xf6   : > { %1800 = vmatpush.bf16.msrb.mxu3 %v5041_v35  ;;  %1762 = vmatmul.bf16.vlgmr.msrb.gmra.mxu0 %v7519_v10  ;;  %v6489_v35 = vld [vmem:[%s7369_s13 + $0x34c] sm:$0xf0] }
  0xf7   : > { %2574 = vmatpush.bf16.msra.mxu0 %v5269_v36  ;;  %1775 = vmatmul.bf16.vlgmr.msrb.gmra.mxu1 %v7521_v11  ;;  %v5189_v36 = vor.u32 %v6393_v28, %v5188_v27  ;;  %v6403_v27 = vld [vmem:[%s7369_s13 + $0xa4] sm:$0xf]  ;;  %v5238_v28 = vld [vmem:[%s7369_s13 + $0xb0] sm:$0xf0] }
  0xf8   : > { %2587 = vmatpush.bf16.msra.mxu1 %v5397_v37  ;;  %1788 = vmatmul.bf16.vlgmr.msrb.gmra.mxu2 %v7506_v61  ;;  %v5317_v37 = vor.u32 %v6425_v31, %v5316_v29  ;;  %v6435_v29 = vld [vmem:[%s7369_s13 + $0x1a4] sm:$0xf]  ;;  %v5366_v31 = vld [vmem:[%s7369_s13 + $0x1b0] sm:$0xf0] }
  0xf9   : > { %2600 = vmatpush.bf16.msra.mxu2 %v5525_v38  ;;  %1801 = vmatmul.bf16.vlgmr.msrb.gmra.mxu3 %v7517_v9  ;;  %v5445_v38 = vor.u32 %v6457_v33, %v5444_v32  ;;  %v6467_v32 = vld [vmem:[%s7369_s13 + $0x2a4] sm:$0xf]  ;;  %v5494_v33 = vld [vmem:[%s7369_s13 + $0x2b0] sm:$0xf0] }
  0xfa   : > { %2613 = vmatpush.bf16.msra.mxu3 %v5653_v42  ;;  %v5573_v42 = vor.u32 %v6489_v35, %v5572_v34  ;;  %v6499_v34 = vld [vmem:[%s7369_s13 + $0x3a4] sm:$0xf]  ;;  %v5622_v35 = vld [vmem:[%s7369_s13 + $0x3b0] sm:$0xf0] }
  0xfb   : > { %2575 = vmatpush.bf16.msra.mxu0 %v5253_v48  ;;  %v5173_v48 = vor.u32 %v6389_v40, %v5172_v39  ;;  %v6399_v39 = vld [vmem:[%s7369_s13 + $0x84] sm:$0xf]  ;;  %v5222_v40 = vld [vmem:[%s7369_s13 + $0x90] sm:$0xf0] }
  0xfc   : > { %2588 = vmatpush.bf16.msra.mxu1 %v5381_v49  ;;  %v5156_v49 = vld [vmem:[%s7369_s13] sm:$0xf] }
  0xfd   : > { %2601 = vmatpush.bf16.msra.mxu2 %v5509_v50  ;;  %v6385_v50 = vld [vmem:[%s7369_s13 + $0xc] sm:$0xf0] }
  0xfe   : > { %2614 = vmatpush.bf16.msra.mxu3 %v5637_v54  ;;  %v6417_v54 = vld [vmem:[%s7369_s13 + $0x10c] sm:$0xf0]  ;;  %v5157_v0 = vor.u32 %v6385_v50, %v5156_v49  ;;  %v5353_v49 = vor.u32 %v6431_v41, %v5350_v43  ;;  %v5481_v50 = vor.u32 %v6463_v44, %v5478_v45  ;;  %v5414_v43 = vld [vmem:[%s7369_s13 + $0x210] sm:$0xf0]  ;;  %v6479_v44 = vld [vmem:[%s7369_s13 + $0x304] sm:$0xf] }
  0xff   : > { %2576 = vmatpush.bf16.msra.mxu0 %v5237_v60  ;;  %v6411_v60 = vld [vmem:[%s7369_s13 + $0xe4] sm:$0xf]  ;;  %v5285_v4 = vor.u32 %v6417_v54, %v5284_v53  ;;  %v5609_v54 = vor.u32 %v6495_v46, %v5606_v47  ;;  %v5542_v45 = vld [vmem:[%s7369_s13 + $0x310] sm:$0xf0]  ;;  %v5276_v46 = vld [vmem:[%s7369_s13 + $0xe8] sm:$0xf] }
 0x100   : > { %2589 = vmatpush.bf16.msra.mxu1 %v5365_v62  ;;  %v5270_v62 = vld [vmem:[%s7369_s13 + $0xf0] sm:$0xf0]  ;;  %v6427_v53 = vld [vmem:[%s7369_s13 + $0x164] sm:$0xf]  ;;  %v6414_v47 = vld [vmem:[%s7369_s13 + $0xf4] sm:$0xf0] }
 0x101   : > { %2602 = vmatpush.bf16.msra.mxu2 %v5493_v63  ;;  %v6443_v63 = vld [vmem:[%s7369_s13 + $0x1e4] sm:$0xf] }
 0x102   : > { %2615 = vmatpush.bf16.msra.mxu3 %v5621_v3  ;;  %v5526_v3 = vld [vmem:[%s7369_s13 + $0x2f0] sm:$0xf0] }
 0x103   : > { %2577 = vmatpush.bf16.msra.mxu0 %v5221_v12  ;;  %v5273_v12 = vor.u32 %v6411_v60, %v5270_v62 }
 0x104   : > { %2590 = vmatpush.bf16.msra.mxu1 %v5349_v13  ;;  %v5401_v13 = vor.u32 %v6443_v63, %v5398_v1 }
 0x105   : > { %2603 = vmatpush.bf16.msra.mxu2 %v5477_v14  ;;  %v5529_v14 = vor.u32 %v6475_v2, %v5526_v3  ;;  %v6391_v2 = vld [vmem:[%s7369_s13 + $0x44] sm:$0xf]  ;;  %v5190_v3 = vld [vmem:[%s7369_s13 + $0x50] sm:$0xf0] }
 0x106   : > { %2616 = vmatpush.bf16.msra.mxu3 %v5605_v18  ;;  %v5657_v18 = vor.u32 %v6507_v6, %v5654_v7  ;;  %v5593_v7 = vor.u32 %v6491_v58, %v5590_v59  ;;  %v5277_v58 = vor.u32 %v6414_v47, %v5276_v46  ;;  %v5468_v46 = vld [vmem:[%s7369_s13 + $0x268] sm:$0xf]  ;;  %v6462_v47 = vld [vmem:[%s7369_s13 + $0x274] sm:$0xf0] }
 0x107   : > { %2578 = vmatpush.bf16.msra.mxu0 %v5205_v24  ;;  %v5257_v24 = vor.u32 %v6407_v15, %v5254_v16  ;;  %v5574_v15 = vld [vmem:[%s7369_s13 + $0x350] sm:$0xf0] }
 0x108   : > { %2591 = vmatpush.bf16.msra.mxu1 %v5333_v25  ;;  %v5385_v25 = vor.u32 %v6439_v17, %v5382_v19  ;;  %v5193_v17 = vor.u32 %v6391_v2, %v5190_v3  ;;  %v6442_v3 = vld [vmem:[%s7369_s13 + $0x1d4] sm:$0xf0] }
 0x109   : > { %2604 = vmatpush.bf16.msra.mxu2 %v5461_v26  ;;  %v5513_v26 = vor.u32 %v6471_v20, %v5510_v21  ;;  %v6387_v20 = vld [vmem:[%s7369_s13 + $0x24] sm:$0xf]  ;;  %v5174_v21 = vld [vmem:[%s7369_s13 + $0x30] sm:$0xf0] }
 0x10a   : > { %2617 = vmatpush.bf16.msra.mxu3 %v5589_v30  ;;  %v5641_v30 = vor.u32 %v6503_v22, %v5638_v23  ;;  %v6419_v22 = vld [vmem:[%s7369_s13 + $0x124] sm:$0xf] }
 0x10b   : > { %2579 = vmatpush.bf16.msra.mxu0 %v5189_v36  ;;  %v5241_v36 = vor.u32 %v6403_v27, %v5238_v28  ;;  %v6483_v28 = vld [vmem:[%s7369_s13 + $0x324] sm:$0xf] }
 0x10c   : > { %2592 = vmatpush.bf16.msra.mxu1 %v5317_v37  ;;  %v5369_v37 = vor.u32 %v6435_v29, %v5366_v31  ;;  %v5558_v29 = vld [vmem:[%s7369_s13 + $0x330] sm:$0xf0] }
 0x10d   : > { %2605 = vmatpush.bf16.msra.mxu2 %v5445_v38  ;;  %v5497_v38 = vor.u32 %v6467_v32, %v5494_v33  ;;  %v5177_v32 = vor.u32 %v6387_v20, %v5174_v21  ;;  %v6383_v33 = vld [vmem:[%s7369_s13 + $0x4] sm:$0xf]  ;;  %v6470_v20 = vld [vmem:[%s7369_s13 + $0x2b4] sm:$0xf0]  ;;  %v5628_v21 = vld [vmem:[%s7369_s13 + $0x3a8] sm:$0xf] }
 0x10e   : > { %2618 = vmatpush.bf16.msra.mxu3 %v5573_v42  ;;  %v5625_v42 = vor.u32 %v6499_v34, %v5622_v35  ;;  %v5158_v34 = vld [vmem:[%s7369_s13 + $0x10] sm:$0xf0] }
 0x10f   : > { %2580 = vmatpush.bf16.msra.mxu0 %v5173_v48  ;;  %v5225_v48 = vor.u32 %v6399_v39, %v5222_v40  ;;  %v5286_v39 = vld [vmem:[%s7369_s13 + $0x110] sm:$0xf0]  ;;  %v6447_v40 = vld [vmem:[%s7369_s13 + $0x204] sm:$0xf] }
 0x110   : > { %2593 = vmatpush.bf16.msra.mxu1 %v5301_v51  ;;  %v6395_v51 = vld [vmem:[%s7369_s13 + $0x64] sm:$0xf] }
 0x111   : > { %2606 = vmatpush.bf16.msra.mxu2 %v5429_v52  ;;  %v5206_v52 = vld [vmem:[%s7369_s13 + $0x70] sm:$0xf0] }
 0x112   : > { %2619 = vmatpush.bf16.msra.mxu3 %v5557_v56  ;;  %v6459_v56 = vld [vmem:[%s7369_s13 + $0x264] sm:$0xf]  ;;  %v5209_v62 = vor.u32 %v6395_v51, %v5206_v52  ;;  %v5532_v51 = vld [vmem:[%s7369_s13 + $0x2e8] sm:$0xf]  ;;  %v6478_v52 = vld [vmem:[%s7369_s13 + $0x2f4] sm:$0xf0] }
 0x113   : > { %2581 = vmatpush.bf16.msra.mxu0 %v5157_v0  ;;  %v5337_v0 = vor.u32 %v6427_v53, %v5334_v55  ;;  %v5465_v1 = vor.u32 %v6459_v56, %v5462_v57  ;;  %v5660_v55 = vld [vmem:[%s7369_s13 + $0x3e8] sm:$0xf]  ;;  %v6510_v56 = vld [vmem:[%s7369_s13 + $0x3f4] sm:$0xf0]  ;;  %v5545_v57 = vor.u32 %v6479_v44, %v5542_v45 }
 0x114   : > { %2594 = vmatpush.bf16.msra.mxu1 %v5285_v4  ;;  %v6423_v4 = vld [vmem:[%s7369_s13 + $0x144] sm:$0xf]  ;;  %v5661_v2 = vor.u32 %v6510_v56, %v5660_v55  ;;  %v6430_v45 = vld [vmem:[%s7369_s13 + $0x174] sm:$0xf0]  ;;  %v5324_v56 = vld [vmem:[%s7369_s13 + $0x148] sm:$0xf] }
 0x115   : > { %2607 = vmatpush.bf16.msra.mxu2 %v5413_v5  ;;  %v6394_v55 = vld [vmem:[%s7369_s13 + $0x54] sm:$0xf0] }
 0x116   : > { %2620 = vmatpush.bf16.msra.mxu3 %v5541_v8  ;;  %2582 = vmatmul.bf16.vlgmr.msra.gmra.mxu0 %v7519_v10  ;;  %v1607_v60 = vpop.f32.mrf.mxu0  ;;  %v5318_v8 = vld [vmem:[%s7369_s13 + $0x150] sm:$0xf0] }
 0x117   : > { %2626 = vmatpush.bf16.msrb.mxu0 %v5273_v12  ;;  %2595 = vmatmul.bf16.vlgmr.msra.gmra.mxu1 %v7521_v11  ;;  %v1620_v63 = vpop.f32.mrf.mxu1  ;;  %v6455_v12 = vld [vmem:[%s7369_s13 + $0x244] sm:$0xf] }
 0x118   : > { %2639 = vmatpush.bf16.msrb.mxu1 %v5401_v13  ;;  %2608 = vmatmul.bf16.vlgmr.msra.gmra.mxu2 %v7506_v61  ;;  %v1621_v5 = vadd.f32 %v1620_v63, %v1607_v60  ;;  %v5446_v13 = vld [vmem:[%s7369_s13 + $0x250] sm:$0xf0]  ;;  %v5260_v63 = vld [vmem:[%s7369_s13 + $0xc8] sm:$0xf] }
 0x119   : > { %2652 = vmatpush.bf16.msrb.mxu2 %v5529_v14  ;;  %2621 = vmatmul.bf16.vlgmr.msra.gmra.mxu3 %v7517_v9  ;;  %v6487_v14 = vld [vmem:[%s7369_s13 + $0x344] sm:$0xf]  ;;  %v5449_v19 = vor.u32 %v6455_v12, %v5446_v13 }
 0x11a   : > { %2665 = vmatpush.bf16.msrb.mxu3 %v5657_v18  ;;  %v5321_v18 = vor.u32 %v6423_v4, %v5318_v8  ;;  %v5577_v23 = vor.u32 %v6487_v14, %v5574_v15  ;;  %v5516_v4 = vld [vmem:[%s7369_s13 + $0x2c8] sm:$0xf]  ;;  %v6406_v15 = vld [vmem:[%s7369_s13 + $0xb4] sm:$0xf0] }
 0x11b   : > { %2627 = vmatpush.bf16.msrb.mxu0 %v5257_v24  ;;  %v1633_v6 = vpop.f32.mrf.mxu2  ;;  %v5302_v24 = vld [vmem:[%s7369_s13 + $0x130] sm:$0xf0]  ;;  %v5244_v14 = vld [vmem:[%s7369_s13 + $0xa8] sm:$0xf] }
 0x11c   : > { %2640 = vmatpush.bf16.msrb.mxu1 %v5385_v25  ;;  %v1634_v16 = vadd.f32 %v1633_v6, %v1621_v5  ;;  %v6451_v25 = vld [vmem:[%s7369_s13 + $0x224] sm:$0xf]  ;;  %v6474_v5 = vld [vmem:[%s7369_s13 + $0x2d4] sm:$0xf0]  ;;  %v5644_v6 = vld [vmem:[%s7369_s13 + $0x3c8] sm:$0xf] }
 0x11d   : > { %2653 = vmatpush.bf16.msrb.mxu2 %v5513_v26  ;;  %v5430_v26 = vld [vmem:[%s7369_s13 + $0x230] sm:$0xf0]  ;;  %v5517_v13 = vor.u32 %v6474_v5, %v5516_v4  ;;  %v5180_v5 = vld [vmem:[%s7369_s13 + $0x28] sm:$0xf] }
 0x11e   : > { %2666 = vmatpush.bf16.msrb.mxu3 %v5641_v30  ;;  %v1646_v27 = vpop.f32.mrf.mxu3  ;;  %v1609_v31 = vpop.f32.mrf.mxu0 }
 0x11f   : > { %2628 = vmatpush.bf16.msrb.mxu0 %v5241_v36  ;;  %v7830_v30 = vadd.f32 %v1646_v27, %v1634_v16  ;;  %v1622_v35 = vpop.f32.mrf.mxu1  ;;  %v5305_v36 = vor.u32 %v6419_v22, %v5302_v24  ;;  %v5372_v16 = vld [vmem:[%s7369_s13 + $0x1a8] sm:$0xf]  ;;  %v6502_v22 = vld [vmem:[%s7369_s13 + $0x3b4] sm:$0xf0] }
 0x120   : > { %2641 = vmatpush.bf16.msrb.mxu1 %v5369_v37  ;;  %v5433_v37 = vor.u32 %v6451_v25, %v5430_v26  ;;  %v5228_v26 = vld [vmem:[%s7369_s13 + $0x88] sm:$0xf]  ;;  %v6402_v27 = vld [vmem:[%s7369_s13 + $0x94] sm:$0xf0] }
 0x121   : > { %2654 = vmatpush.bf16.msrb.mxu2 %v5497_v38  ;;  %v6415_v38 = vld [vmem:[%s7369_s13 + $0x104] sm:$0xf]  ;;  %v6434_v31 = vld [vmem:[%s7369_s13 + $0x194] sm:$0xf0] }
 0x122   : > { %2667 = vmatpush.bf16.msrb.mxu3 %v5625_v42  ;;  %v5561_v42 = vor.u32 %v6483_v28, %v5558_v29  ;;  %v5289_v53 = vor.u32 %v6415_v38, %v5286_v39  ;;  %v5356_v28 = vld [vmem:[%s7369_s13 + $0x188] sm:$0xf]  ;;  %v5629_v29 = vor.u32 %v6502_v22, %v5628_v21  ;;  %v6498_v35 = vld [vmem:[%s7369_s13 + $0x394] sm:$0xf0] }
 0x123   : > { %2629 = vmatpush.bf16.msrb.mxu0 %v5225_v48  ;;  %v1635_v41 = vpop.f32.mrf.mxu2  ;;  %v5404_v48 = vld [vmem:[%s7369_s13 + $0x1e8] sm:$0xf]  ;;  %v5357_v38 = vor.u32 %v6434_v31, %v5356_v28  ;;  %v6450_v28 = vld [vmem:[%s7369_s13 + $0x214] sm:$0xf0] }
 0x124   : > { %2642 = vmatpush.bf16.msrb.mxu1 %v5353_v49  ;;  %v5161_v49 = vor.u32 %v6383_v33, %v5158_v34  ;;  %v6466_v33 = vld [vmem:[%s7369_s13 + $0x294] sm:$0xf0]  ;;  %v5612_v34 = vld [vmem:[%s7369_s13 + $0x388] sm:$0xf] }
 0x125   : > { %2655 = vmatpush.bf16.msrb.mxu2 %v5481_v50  ;;  %v6446_v50 = vld [vmem:[%s7369_s13 + $0x1f4] sm:$0xf0]  ;;  %v5212_v41 = vld [vmem:[%s7369_s13 + $0x68] sm:$0xf]  ;;  %v5613_v44 = vor.u32 %v6498_v35, %v5612_v34  ;;  %v5278_v34 = vld [vmem:[%s7369_s13 + $0xf8] sm:$0xf0] }
 0x126   : > { %2668 = vmatpush.bf16.msrb.mxu3 %v5609_v54  ;;  %v5417_v54 = vor.u32 %v6447_v40, %v5414_v43  ;;  %v1648_v59 = vpop.f32.mrf.mxu3  ;;  %v5405_v60 = vor.u32 %v6446_v50, %v5404_v48  ;;  %v5340_v43 = vld [vmem:[%s7369_s13 + $0x168] sm:$0xf]  ;;  %v6482_v31 = vld [vmem:[%s7369_s13 + $0x314] sm:$0xf0]  ;;  %v6444_v35 = vld [vmem:[%s7369_s13 + $0x1ec] sm:$0xf] }
 0x127   : > { %2630 = vmatpush.bf16.msrb.mxu0 %v5209_v62  ;;  %v5533_v62 = vor.u32 %v6478_v52, %v5532_v51  ;;  %v5596_v48 = vld [vmem:[%s7369_s13 + $0x368] sm:$0xf]  ;;  %v5341_v51 = vor.u32 %v6430_v45, %v5340_v43  ;;  %v5469_v52 = vor.u32 %v6462_v47, %v5468_v46  ;;  %v6426_v59 = vld [vmem:[%s7369_s13 + $0x154] sm:$0xf0]  ;;  %v5662_v45 = vld [vmem:[%s7369_s13 + $0x3f8] sm:$0xf0] }
 0x128   : > { %2643 = vmatpush.bf16.msrb.mxu1 %v5337_v0  ;;  %v6410_v0 = vld [vmem:[%s7369_s13 + $0xd4] sm:$0xf0] }
 0x129   : > { %2656 = vmatpush.bf16.msrb.mxu2 %v5465_v1  ;;  %v5388_v1 = vld [vmem:[%s7369_s13 + $0x1c8] sm:$0xf]  ;;  %v5261_v8 = vor.u32 %v6410_v0, %v5260_v63  ;;  %v6490_v0 = vld [vmem:[%s7369_s13 + $0x354] sm:$0xf0] }
 0x12a   : > { %2669 = vmatpush.bf16.msrb.mxu3 %v5593_v7  ;;  %v6506_v7 = vld [vmem:[%s7369_s13 + $0x3d4] sm:$0xf0]  ;;  %v5389_v12 = vor.u32 %v6442_v3, %v5388_v1  ;;  %v5580_v63 = vld [vmem:[%s7369_s13 + $0x348] sm:$0xf]  ;;  %v5325_v3 = vor.u32 %v6426_v59, %v5324_v56  ;;  %v6472_v56 = vld [vmem:[%s7369_s13 + $0x2cc] sm:$0xf] }
 0x12b   : > { %2631 = vmatpush.bf16.msrb.mxu0 %v5193_v17  ;;  %v5645_v17 = vor.u32 %v6506_v7, %v5644_v6  ;;  %v6390_v6 = vld [vmem:[%s7369_s13 + $0x34] sm:$0xf0]  ;;  %v5308_v7 = vld [vmem:[%s7369_s13 + $0x128] sm:$0xf]  ;;  %v6504_v59 = vld [vmem:[%s7369_s13 + $0x3cc] sm:$0xf] }
 0x12c   : > { %2644 = vmatpush.bf16.msrb.mxu1 %v5321_v18  ;;  %v6438_v18 = vld [vmem:[%s7369_s13 + $0x1b4] sm:$0xf0] }
 0x12d   : > { %2657 = vmatpush.bf16.msrb.mxu2 %v5449_v19  ;;  %v5500_v19 = vld [vmem:[%s7369_s13 + $0x2a8] sm:$0xf]  ;;  %v5373_v24 = vor.u32 %v6438_v18, %v5372_v16  ;;  %v5181_v18 = vor.u32 %v6390_v6, %v5180_v5  ;;  %v5374_v5 = vld [vmem:[%s7369_s13 + $0x1b8] sm:$0xf0]  ;;  %v6468_v6 = vld [vmem:[%s7369_s13 + $0x2ac] sm:$0xf] }
 0x12e   : > { %2670 = vmatpush.bf16.msrb.mxu3 %v5577_v23  ;;  %v5245_v23 = vor.u32 %v6406_v15, %v5244_v14  ;;  %v5501_v25 = vor.u32 %v6470_v20, %v5500_v19  ;;  %v5436_v14 = vld [vmem:[%s7369_s13 + $0x228] sm:$0xf]  ;;  %v6454_v15 = vld [vmem:[%s7369_s13 + $0x234] sm:$0xf0] }
 0x12f   : > { %2632 = vmatpush.bf16.msrb.mxu0 %v5177_v32  ;;  %v5484_v32 = vld [vmem:[%s7369_s13 + $0x288] sm:$0xf]  ;;  %v6386_v20 = vld [vmem:[%s7369_s13 + $0x14] sm:$0xf0]  ;;  %v5437_v22 = vor.u32 %v6454_v15, %v5436_v14 }
 0x130   : > { %2645 = vmatpush.bf16.msrb.mxu1 %v5305_v36  ;;  %v5229_v36 = vor.u32 %v6402_v27, %v5228_v26  ;;  %v5485_v39 = vor.u32 %v6466_v33, %v5484_v32  ;;  %v5564_v16 = vld [vmem:[%s7369_s13 + $0x328] sm:$0xf]  ;;  %v6412_v33 = vld [vmem:[%s7369_s13 + $0xec] sm:$0xf] }
 0x131   : > { %2658 = vmatpush.bf16.msrb.mxu2 %v5433_v37  ;;  %v5164_v19 = vld [vmem:[%s7369_s13 + $0x8] sm:$0xf]  ;;  %v5281_v47 = vor.u32 %v6412_v33, %v5278_v34 }
 0x132   : > { %2671 = vmatpush.bf16.msrb.mxu3 %v5561_v42  ;;  %v6398_v42 = vld [vmem:[%s7369_s13 + $0x74] sm:$0xf0] }
 0x133   : > { %2633 = vmatpush.bf16.msrb.mxu0 %v5161_v49  ;;  %v7876_v37 = vpop.f32.mrf.mxu0  ;;  %v6494_v49 = vld [vmem:[%s7369_s13 + $0x374] sm:$0xf0]  ;;  %v5213_v50 = vor.u32 %v6398_v42, %v5212_v41  ;;  %v5534_v41 = vld [vmem:[%s7369_s13 + $0x2f8] sm:$0xf0] }
 0x134   : > { %2646 = vmatpush.bf16.msrb.mxu1 %v5289_v53  ;;  %v7878_v40 = vpop.f32.mrf.mxu1 }
 0x135   : > { %2659 = vmatpush.bf16.msrb.mxu2 %v5417_v54  ;;  %v5196_v54 = vld [vmem:[%s7369_s13 + $0x48] sm:$0xf] }
 0x136   : > { %2672 = vmatpush.bf16.msrb.mxu3 %v5545_v57  ;;  %2634 = vmatmul.bf16.vlgmr.msrb.gmra.mxu0 %v7519_v10  ;;  %v5597_v57 = vor.u32 %v6494_v49, %v5596_v48  ;;  %v5197_v1 = vor.u32 %v6394_v55, %v5196_v54  ;;  %v5390_v55 = vld [vmem:[%s7369_s13 + $0x1d8] sm:$0xf0] }
 0x137   : > { %2678 = vmatpush.bf16.msra.mxu0 %v5277_v58  ;;  %2647 = vmatmul.bf16.vlgmr.msrb.gmra.mxu1 %v7521_v11 }
 0x138   : > { %2691 = vmatpush.bf16.msra.mxu1 %v5405_v60  ;;  %2660 = vmatmul.bf16.vlgmr.msrb.gmra.mxu2 %v7506_v61  ;;  %v5452_v60 = vld [vmem:[%s7369_s13 + $0x248] sm:$0xf] }
 0x139   : > { %2704 = vmatpush.bf16.msra.mxu2 %v5533_v62  ;;  %2673 = vmatmul.bf16.vlgmr.msrb.gmra.mxu3 %v7517_v9  ;;  %v6458_v62 = vld [vmem:[%s7369_s13 + $0x254] sm:$0xf0] }
 0x13a   : > { %2717 = vmatpush.bf16.msra.mxu3 %v5661_v2  ;;  %v5453_v4 = vor.u32 %v6458_v62, %v5452_v60  ;;  %v5646_v60 = vld [vmem:[%s7369_s13 + $0x3d8] sm:$0xf0] }
 0x13b   : > { %2679 = vmatpush.bf16.msra.mxu0 %v5261_v8  ;;  %v7888_v53 = vpop.f32.mrf.mxu2  ;;  %v1661_v2 = vpop.f32.mrf.mxu0 }
 0x13c   : > { %2692 = vmatpush.bf16.msra.mxu1 %v5389_v12  ;;  %v7893_v58 = vpop.f32.mrf.mxu3  ;;  %v1674_v8 = vpop.f32.mrf.mxu1  ;;  %v5581_v12 = vor.u32 %v6490_v0, %v5580_v63  ;;  %v5246_v2 = vld [vmem:[%s7369_s13 + $0xb8] sm:$0xf0] }
 0x13d   : > { %2705 = vmatpush.bf16.msra.mxu2 %v5517_v13  ;;  %v6422_v13 = vld [vmem:[%s7369_s13 + $0x134] sm:$0xf0]  ;;  %v6500_v8 = vld [vmem:[%s7369_s13 + $0x3ac] sm:$0xf] }
 0x13e   : > { %2718 = vmatpush.bf16.msra.mxu3 %v5645_v17  ;;  %v6486_v17 = vld [vmem:[%s7369_s13 + $0x334] sm:$0xf0]  ;;  %v5309_v21 = vor.u32 %v6422_v13, %v5308_v7  ;;  %v5502_v7 = vld [vmem:[%s7369_s13 + $0x2b8] sm:$0xf0] }
 0x13f   : > { %2680 = vmatpush.bf16.msra.mxu0 %v5245_v23  ;;  %v5292_v23 = vld [vmem:[%s7369_s13 + $0x108] sm:$0xf]  ;;  %v5565_v27 = vor.u32 %v6486_v17, %v5564_v16  ;;  %v5505_v15 = vor.u32 %v6468_v6, %v5502_v7  ;;  %v6400_v16 = vld [vmem:[%s7369_s13 + $0x8c] sm:$0xf]  ;;  %v5230_v17 = vld [vmem:[%s7369_s13 + $0x98] sm:$0xf0] }
 0x140   : > { %2693 = vmatpush.bf16.msra.mxu1 %v5373_v24  ;;  %v6418_v24 = vld [vmem:[%s7369_s13 + $0x114] sm:$0xf0]  ;;  %v5438_v6 = vld [vmem:[%s7369_s13 + $0x238] sm:$0xf0]  ;;  %v6484_v7 = vld [vmem:[%s7369_s13 + $0x32c] sm:$0xf] }
 0x141   : > { %2706 = vmatpush.bf16.msra.mxu2 %v5501_v25  ;;  %v5420_v25 = vld [vmem:[%s7369_s13 + $0x208] sm:$0xf]  ;;  %v5293_v42 = vor.u32 %v6418_v24, %v5292_v23  ;;  %v6496_v23 = vld [vmem:[%s7369_s13 + $0x38c] sm:$0xf]  ;;  %v5614_v24 = vld [vmem:[%s7369_s13 + $0x398] sm:$0xf0] }
 0x142   : > { %2719 = vmatpush.bf16.msra.mxu3 %v5629_v29  ;;  %v5548_v29 = vld [vmem:[%s7369_s13 + $0x308] sm:$0xf]  ;;  %v5421_v43 = vor.u32 %v6450_v28, %v5420_v25  ;;  %v5233_v25 = vor.u32 %v6400_v16, %v5230_v17  ;;  %v5617_v34 = vor.u32 %v6496_v23, %v5614_v24  ;;  %v5166_v16 = vld [vmem:[%s7369_s13 + $0x18] sm:$0xf0]  ;;  %v6416_v17 = vld [vmem:[%s7369_s13 + $0x10c] sm:$0xf] }
 0x143   : > { %2681 = vmatpush.bf16.msra.mxu0 %v5229_v36  ;;  %v1687_v26 = vpop.f32.mrf.mxu2  ;;  %v5165_v36 = vor.u32 %v6386_v20, %v5164_v19  ;;  %v5549_v46 = vor.u32 %v6482_v31, %v5548_v29  ;;  %v5358_v20 = vld [vmem:[%s7369_s13 + $0x198] sm:$0xf0]  ;;  %v6396_v29 = vld [vmem:[%s7369_s13 + $0x6c] sm:$0xf] }
 0x144   : > { %2694 = vmatpush.bf16.msra.mxu1 %v5357_v38  ;;  %v1700_v32 = vpop.f32.mrf.mxu3  ;;  %v5406_v38 = vld [vmem:[%s7369_s13 + $0x1f8] sm:$0xf0]  ;;  %v6480_v24 = vld [vmem:[%s7369_s13 + $0x30c] sm:$0xf] }
 0x145   : > { %2707 = vmatpush.bf16.msra.mxu2 %v5485_v39  ;;  %v6476_v39 = vld [vmem:[%s7369_s13 + $0x2ec] sm:$0xf]  ;;  %v5409_v48 = vor.u32 %v6444_v35, %v5406_v38  ;;  %v5214_v31 = vld [vmem:[%s7369_s13 + $0x78] sm:$0xf0] }
 0x146   : > { %2720 = vmatpush.bf16.msra.mxu3 %v5613_v44  ;;  %v6508_v44 = vld [vmem:[%s7369_s13 + $0x3ec] sm:$0xf]  ;;  %v5537_v49 = vor.u32 %v6476_v39, %v5534_v41  ;;  %v5342_v35 = vld [vmem:[%s7369_s13 + $0x178] sm:$0xf0] }
 0x147   : > { %2682 = vmatpush.bf16.msra.mxu0 %v5213_v50  ;;  %v6408_v50 = vld [vmem:[%s7369_s13 + $0xcc] sm:$0xf]  ;;  %v5665_v54 = vor.u32 %v6508_v44, %v5662_v45  ;;  %v5470_v38 = vld [vmem:[%s7369_s13 + $0x278] sm:$0xf0] }
 0x148   : > { %2695 = vmatpush.bf16.msra.mxu1 %v5341_v51  ;;  %v5262_v51 = vld [vmem:[%s7369_s13 + $0xd8] sm:$0xf0]  ;;  %v6428_v32 = vld [vmem:[%s7369_s13 + $0x16c] sm:$0xf] }
 0x149   : > { %2708 = vmatpush.bf16.msra.mxu2 %v5469_v52  ;;  %v6440_v52 = vld [vmem:[%s7369_s13 + $0x1cc] sm:$0xf]  ;;  %v5265_v62 = vor.u32 %v6408_v50, %v5262_v51  ;;  %v5598_v41 = vld [vmem:[%s7369_s13 + $0x378] sm:$0xf0] }
 0x14a   : > { %2721 = vmatpush.bf16.msra.mxu3 %v5597_v57  ;;  %v5518_v57 = vld [vmem:[%s7369_s13 + $0x2d8] sm:$0xf0]  ;;  %v5393_v63 = vor.u32 %v6440_v52, %v5390_v55  ;;  %v6492_v39 = vld [vmem:[%s7369_s13 + $0x36c] sm:$0xf] }
 0x14b   : > { %2683 = vmatpush.bf16.msra.mxu0 %v5197_v1  ;;  %v5521_v0 = vor.u32 %v6472_v56, %v5518_v57  ;;  %v6404_v1 = vld [vmem:[%s7369_s13 + $0xac] sm:$0xf]  ;;  %v5326_v50 = vld [vmem:[%s7369_s13 + $0x158] sm:$0xf0] }
 0x14c   : > { %2696 = vmatpush.bf16.msra.mxu1 %v5325_v3  ;;  %v6436_v3 = vld [vmem:[%s7369_s13 + $0x1ac] sm:$0xf]  ;;  %v5249_v13 = vor.u32 %v6404_v1, %v5246_v2  ;;  %v5454_v52 = vld [vmem:[%s7369_s13 + $0x258] sm:$0xf0] }
 0x14d   : > { %2709 = vmatpush.bf16.msra.mxu2 %v5453_v4  ;;  %v5649_v4 = vor.u32 %v6504_v59, %v5646_v60  ;;  %v5377_v14 = vor.u32 %v6436_v3, %v5374_v5  ;;  %v6392_v45 = vld [vmem:[%s7369_s13 + $0x4c] sm:$0xf]  ;;  %v5582_v56 = vld [vmem:[%s7369_s13 + $0x358] sm:$0xf0] }
 0x14e   : > { %2722 = vmatpush.bf16.msra.mxu3 %v5581_v12  ;;  %v5630_v12 = vld [vmem:[%s7369_s13 + $0x3b8] sm:$0xf0]  ;;  %v6456_v51 = vld [vmem:[%s7369_s13 + $0x24c] sm:$0xf] }
 0x14f   : > { %2684 = vmatpush.bf16.msra.mxu0 %v5181_v18  ;;  %v6432_v18 = vld [vmem:[%s7369_s13 + $0x18c] sm:$0xf]  ;;  %v5633_v19 = vor.u32 %v6500_v8, %v5630_v12  ;;  %v5566_v8 = vld [vmem:[%s7369_s13 + $0x338] sm:$0xf0] }
 0x150   : > { %2697 = vmatpush.bf16.msra.mxu1 %v5309_v21  ;;  %v6464_v21 = vld [vmem:[%s7369_s13 + $0x28c] sm:$0xf] }
 0x151   : > { %2710 = vmatpush.bf16.msra.mxu2 %v5437_v22  ;;  %v5486_v22 = vld [vmem:[%s7369_s13 + $0x298] sm:$0xf0]  ;;  %v6488_v55 = vld [vmem:[%s7369_s13 + $0x34c] sm:$0xf] }
 0x152   : > { %2723 = vmatpush.bf16.msra.mxu3 %v5565_v27  ;;  %v5361_v27 = vor.u32 %v6432_v18, %v5358_v20  ;;  %v5489_v28 = vor.u32 %v6464_v21, %v5486_v22  ;;  %v6420_v1 = vld [vmem:[%s7369_s13 + $0x12c] sm:$0xf]  ;;  %v5585_v3 = vor.u32 %v6488_v55, %v5582_v56  ;;  %v5294_v20 = vld [vmem:[%s7369_s13 + $0x118] sm:$0xf0] }
 0x153   : > { %2685 = vmatpush.bf16.msra.mxu0 %v5165_v36  ;;  %v7952_v26 = vpop.f32.mrf.mxu0  ;;  %v6460_v36 = vld [vmem:[%s7369_s13 + $0x26c] sm:$0xf]  ;;  %v5422_v22 = vld [vmem:[%s7369_s13 + $0x218] sm:$0xf0] }
 0x154   : > { %2698 = vmatpush.bf16.msra.mxu1 %v5293_v42  ;;  %v7957_v33 = vpop.f32.mrf.mxu1  ;;  %v5217_v42 = vor.u32 %v6396_v29, %v5214_v31  ;;  %v5473_v44 = vor.u32 %v6460_v36, %v5470_v38  ;;  %v6452_v5 = vld [vmem:[%s7369_s13 + $0x22c] sm:$0xf]  ;;  %v1673_v36 = vadd.f32 %v7878_v40, %v7876_v37  ;;  %v8016_v37 = vld [vmem:[%s8661_s14] sm:$0xf] }
 0x155   : > { %2711 = vmatpush.bf16.msra.mxu2 %v5421_v43  ;;  %v5345_v43 = vor.u32 %v6428_v32, %v5342_v35  ;;  %v6448_v21 = vld [vmem:[%s7369_s13 + $0x20c] sm:$0xf]  ;;  %v6526_v32 = vld [vmem:[%s8656_s23 + $0x38] sm:$0xff]  ;;  %v8023_v40 = vld [vmem:[%s788_s27] sm:$0xf]  ;;  %s6655_s27 = sshll.u32 %s7041_s28, 5 }
 0x156   : > { %2724 = vmatpush.bf16.msra.mxu3 %v5549_v46  ;;  %2686 = vmatmul.bf16.vlgmr.msra.gmra.mxu0 %v7519_v10  ;;  %v5198_v46 = vld [vmem:[%s7369_s13 + $0x58] sm:$0xf0]  ;;  %v5425_v29 = vor.u32 %v6448_v21, %v5422_v22  ;;  %v6525_v35 = vld [vmem:[%s8657_s20 + $0x30] sm:$0xff]  ;;  %v2806_v22 = vrot.slane %v8023_v40, 2 }
 0x157   : > { %2730 = vmatpush.bf16.msrb.mxu0 %v5281_v47  ;;  %2699 = vmatmul.bf16.vlgmr.msra.gmra.mxu1 %v7521_v11  ;;  %v6424_v47 = vld [vmem:[%s7369_s13 + $0x14c] sm:$0xf]  ;;  %v5201_v57 = vor.u32 %v6392_v45, %v5198_v46 }
 0x158   : > { %2743 = vmatpush.bf16.msrb.mxu1 %v5409_v48  ;;  %2712 = vmatmul.bf16.vlgmr.msra.gmra.mxu2 %v7506_v61  ;;  %v5329_v60 = vor.u32 %v6424_v47, %v5326_v50  ;;  %v6517_v38 = vld [vmem:[%s8659_s2 + $0x30] sm:$0xff] }
 0x159   : > { %2756 = vmatpush.bf16.msrb.mxu2 %v5537_v49  ;;  %2725 = vmatmul.bf16.vlgmr.msra.gmra.mxu3 %v7517_v9  ;;  %v5601_v49 = vor.u32 %v6492_v39, %v5598_v41  ;;  %v6524_v39 = vld [vmem:[%s8657_s20 + $0x28] sm:$0xff]  ;;  %v2785_v41 = vrot.slane %v8016_v37, 1 }
 0x15a   : > { %2769 = vmatpush.bf16.msrb.mxu3 %v5665_v54 }
 0x15b   : > { %2731 = vmatpush.bf16.msrb.mxu0 %v5265_v62  ;;  %v7967_v48 = vpop.f32.mrf.mxu2  ;;  %v1713_v59 = vpop.f32.mrf.mxu0  ;;  %v5457_v62 = vor.u32 %v6456_v51, %v5454_v52  ;;  %v2789_v46 = vperm.slane %v2785_v41, 0  ;;  %v6522_v51 = vld [vmem:[%s8657_s20 + $0x18] sm:$0xff] }
 0x15c   : > { %2744 = vmatpush.bf16.msrb.mxu1 %v5393_v63  ;;  %v7972_v54 = vpop.f32.mrf.mxu3  ;;  %v6388_v63 = vld [vmem:[%s7369_s13 + $0x2c] sm:$0xf]  ;;  %v1726_v2 = vpop.f32.mrf.mxu1 }
 0x15d   : > { %2757 = vmatpush.bf16.msrb.mxu2 %v5521_v0  ;;  %v5182_v0 = vld [vmem:[%s7369_s13 + $0x38] sm:$0xf0] }
 0x15e   : > { %2770 = vmatpush.bf16.msrb.mxu3 %v5649_v4  ;;  %v5310_v4 = vld [vmem:[%s7369_s13 + $0x138] sm:$0xf0]  ;;  %v5185_v12 = vor.u32 %v6388_v63, %v5182_v0  ;;  %v1725_v63 = vadd.f32 %v7957_v33, %v7952_v26  ;;  %v6521_v0 = vld [vmem:[%s8657_s20 + $0x10] sm:$0xff] }
 0x15f   : > { %2732 = vmatpush.bf16.msrb.mxu0 %v5249_v13  ;;  %v5313_v13 = vor.u32 %v6420_v1, %v5310_v4  ;;  %v2820_v2 = vld [vmem:[%s8664_s7] sm:$0xff] }
 0x160   : > { %2745 = vmatpush.bf16.msrb.mxu1 %v5377_v14  ;;  %v5441_v14 = vor.u32 %v6452_v5, %v5438_v6  ;;  %v6513_v5 = vld [vmem:[%s8659_s2 + $0x10] sm:$0xff] }
 0x161   : > { %2758 = vmatpush.bf16.msrb.mxu2 %v5505_v15  ;;  %v6384_v15 = vld [vmem:[%s7369_s13 + $0xc] sm:$0xf] }
 0x162   : > { %2771 = vmatpush.bf16.msrb.mxu3 %v5633_v19  ;;  %v5569_v19 = vor.u32 %v6484_v7, %v5566_v8  ;;  %v2787_v7 = vrot.slane %v8016_v37, 3 }
 0x163   : > { %2733 = vmatpush.bf16.msrb.mxu0 %v5233_v25  ;;  %v1739_v18 = vpop.f32.mrf.mxu2  ;;  %v5550_v25 = vld [vmem:[%s7369_s13 + $0x318] sm:$0xf0]  ;;  %s4359_s13 = scalar_lea.sflag [#allocation4], %s7353_s1 }
 0x164   : > { %2746 = vmatpush.bf16.msrb.mxu1 %v5361_v27  ;;  %v1752_v23 = vpop.f32.mrf.mxu3  ;;  %v5169_v27 = vor.u32 %v6384_v15, %v5166_v16  ;;  %v5553_v31 = vor.u32 %v6480_v24, %v5550_v25  ;;  %v6512_v18 = vld [vmem:[%s8659_s2 + $0x8] sm:$0xff] }
 0x165   : > { %2759 = vmatpush.bf16.msrb.mxu2 %v5489_v28  ;;  %v5297_v28 = vor.u32 %v6416_v17, %v5294_v20  ;;  %v2807_v17 = vrot.slane %v8023_v40, 3  ;;  %v2791_v23 = vperm.slane %v2787_v7, 0 }
 0x166   : > { %2772 = vmatpush.bf16.msrb.mxu3 %v5617_v34  ;;  %v6518_v34 = vld [vmem:[%s8658_s30 + $0x38] sm:$0xff] }
 0x167   : > { %2734 = vmatpush.bf16.msrb.mxu0 %v5217_v42  ;;  %v2805_v42 = vrot.slane %v8023_v40, 1 }
 0x168   : > { %2747 = vmatpush.bf16.msrb.mxu1 %v5345_v43  ;;  %v6516_v43 = vld [vmem:[%s8659_s2 + $0x28] sm:$0xff] }
 0x169   : > { %2760 = vmatpush.bf16.msrb.mxu2 %v5473_v44  ;;  %v2788_v44 = vperm.slane %v8016_v37, 0  ;;  %v2809_v47 = vperm.slane %v2805_v42, 0 }
 0x16a   : > { %2773 = vmatpush.bf16.msrb.mxu3 %v5601_v49  ;;  %v6515_v49 = vld [vmem:[%s8659_s2 + $0x20] sm:$0xff] }
 0x16b   : > { %2735 = vmatpush.bf16.msrb.mxu0 %v5201_v57  ;;  %v2796_v50 = vadd.f32 %v2788_v44, %v7830_v30 }
 0x16c   : > { %2748 = vmatpush.bf16.msrb.mxu1 %v5329_v60 }
 0x16d   : > { %2761 = vmatpush.bf16.msrb.mxu2 %v5457_v62  ;;  %v2800_v60 = vpack.c.bf16 %v2796_v50, %v2796_v50  ;;  %v8057_v62 = vld [vmem:[%s8663_s6] sm:$0xff] }
 0x16e   : > { %2774 = vmatpush.bf16.msrb.mxu3 %v5585_v3 }
 0x16f   : > { %2736 = vmatpush.bf16.msrb.mxu0 %v5185_v12  ;;  %v1738_v12 = vadd.f32 %v7967_v48, %v1725_v63 }
 0x170   : > { %2749 = vmatpush.bf16.msrb.mxu1 %v5313_v13  ;;  %v2786_v13 = vrot.slane %v8016_v37, 2 }
 0x171   : > { %2762 = vmatpush.bf16.msrb.mxu2 %v5441_v14  ;;  %v6520_v14 = vld [vmem:[%s8657_s20 + $0x8] sm:$0xff]  ;;  %v1751_v25 = vadd.f32 %v7972_v54, %v1738_v12 }
 0x172   : > { %2775 = vmatpush.bf16.msrb.mxu3 %v5569_v19 }
 0x173   : > { %2737 = vmatpush.bf16.msrb.mxu0 %v5169_v27  ;;  %v2790_v27 = vperm.slane %v2786_v13, 0 }
 0x174   : > { %2750 = vmatpush.bf16.msrb.mxu1 %v5297_v28  ;;  %v6519_v28 = vld [vmem:[%s8657_s20] sm:$0xff] }
 0x175   : > { %2763 = vmatpush.bf16.msrb.mxu2 %v5425_v29  ;;  %v2798_v54 = vadd.f32 %v2790_v27, %v1751_v25 }
 0x176   : > { %2776 = vmatpush.bf16.msrb.mxu3 %v5553_v31  ;;  %2738 = vmatmul.bf16.vlgmr.msrb.gmra.mxu0 %v7519_v10 }
 0x177   : > { %2930 = vmatpush.bf16.msra.mxu0 %v6526_v32  ;;  %2751 = vmatmul.bf16.vlgmr.msrb.gmra.mxu1 %v7521_v11  ;;  %v2811_v32 = vperm.slane %v2807_v17, 0  ;;  %v2802_v44 = vpack.c.bf16 %v2798_v54, %v2798_v54 }
 0x178   : > { %3009 = vmatpush.bf16.msra.mxu1 %v6518_v34  ;;  %2764 = vmatmul.bf16.vlgmr.msrb.gmra.mxu2 %v7506_v61  ;;  %v6511_v34 = vld [vmem:[%s8659_s2] sm:$0xff] }
 0x179   : > { %2777 = vmatmul.bf16.vlgmr.msrb.gmra.mxu3 %v7517_v9  ;;  %3035 = vmatpush.bf16.xpose.msra.mxu2 %v7519_v10  ;;  %v1686_v10 = vadd.f32 %v7888_v53, %v1673_v36  ;;  %v1763_v53 = vpop.f32.mrf.mxu0 }
 0x17a   : > { %3048 = vmatpush.bf16.xpose.msra.mxu3 %v7521_v11  ;;  %v6523_v11 = vld [vmem:[%s8657_s20 + $0x20] sm:$0xff] }
 0x17b   : > { %2931 = vmatpush.bf16.msra.mxu0 %v6525_v35  ;;  %v1699_v45 = vadd.f32 %v7893_v58, %v1686_v10  ;;  %v6514_v58 = vld [vmem:[%s8659_s2 + $0x18] sm:$0xff]  ;;  %v1789_v56 = vpop.f32.mrf.mxu2 }
 0x17c   : > { %3010 = vmatpush.bf16.msra.mxu1 %v6517_v38  ;;  %v1802_v57 = vpop.f32.mrf.mxu3  ;;  %v2810_v38 = vperm.slane %v2806_v22, 0 }
 0x17d   : > { %v2797_v52 = vadd.f32 %v2789_v46, %v1699_v45  ;;  %v2817_v55 = vadd.f32 %v2809_v47, %v1699_v45 }
 0x17e   : > { %v2818_v42 = vadd.f32 %v2810_v38, %v1751_v25 }
 0x17f   : > { %2932 = vmatpush.bf16.msra.mxu0 %v6524_v39  ;;  %v2831_v3 = vmul.f32 %v8057_v62, %v2817_v55  ;;  %v2822_v33 = vmul.f32 %v2820_v2, %v2817_v55 }
 0x180   : > { %3011 = vmatpush.bf16.msra.mxu1 %v6516_v43  ;;  %v2832_v45 = vmul.f32 %v8057_v62, %v2818_v42  ;;  %v2823_v46 = vmul.f32 %v2820_v2, %v2818_v42 }
 0x181   : > { %3061 = vmatpush.bf16.xpose.msrb.mxu2 %v7506_v61  ;;  %v1776_v61 = vpop.f32.mrf.mxu1  ;;  %v1765_v1 = vpop.f32.mrf.mxu0  ;;  %v2835_v15 = vpack.c.bf16 %v2831_v3, %v2831_v3  ;;  %v2826_v20 = vpack.c.bf16 %v2822_v33, %v2822_v33 }
 0x182   : > { %3074 = vmatpush.bf16.xpose.msrb.mxu3 %v7517_v9  ;;  %v2808_v9 = vperm.slane %v8023_v40, 0  ;;  %v1777_v4 = vadd.f32 %v1776_v61, %v1763_v53  ;;  %v2836_v50 = vpack.c.bf16 %v2832_v45, %v2832_v45  ;;  %v3080_v45 = vld [vmem:[%s8665_s11] sm:$0x1] }
 0x183   : > { %2933 = vmatpush.bf16.msra.mxu0 %v6523_v11  ;;  %v1791_v19 = vpop.f32.mrf.mxu2  ;;  %v2875_v29 = vunpack.c.l.b16 %v2835_v15  ;;  %v2954_v35 = vunpack.c.l.b16 %v2826_v20  ;;  %vm3081_vm1 = vcmp.eq.f32.partialorder %v3080_v45, 0.0 }
 0x184   : > { %3012 = vmatpush.bf16.msra.mxu1 %v6515_v49  ;;  %v2816_v59 = vadd.f32 %v2808_v9, %v7830_v30  ;;  %v2801_v30 = vpack.c.bf16 %v2797_v52, %v2797_v52  ;;  %v1790_v16 = vadd.f32 %v1789_v56, %v1777_v4  ;;  %v1804_v21 = vpop.f32.mrf.mxu3  ;;  %v2876_v56 = vunpack.c.l.b16 %v2836_v50 }
 0x186   : > { %v2830_v6 = vmul.f32 %v8057_v62, %v2816_v59  ;;  %v2821_v8 = vmul.f32 %v2820_v2, %v2816_v59  ;;  %v1803_v31 = vadd.f32 %v1802_v57, %v1790_v16 }
 0x187   : > { %2934 = vmatpush.bf16.msra.mxu0 %v6522_v51  ;;  %v2827_v51 = vpack.c.bf16 %v2823_v46, %v2823_v46 }
 0x188   : > { %3013 = vmatpush.bf16.msra.mxu1 %v6514_v58  ;;  %3036 = vmatmul.bf16.vlgmr.msra.gmra.mxu2 %v2800_v60  ;;  %v2834_v48 = vpack.c.bf16 %v2830_v6, %v2830_v6  ;;  %v2825_v24 = vpack.c.bf16 %v2821_v8, %v2821_v8  ;;  %v2799_v37 = vadd.f32 %v2791_v23, %v1803_v31 }
 0x189   : > { %v1778_v26 = vpop.f32.mrf.mxu1  ;;  %3049 = vmatmul.bf16.vlgmr.msra.gmra.mxu3 %v2801_v30  ;;  %v2819_v39 = vadd.f32 %v2811_v32, %v1803_v31  ;;  %v2955_v57 = vunpack.c.l.b16 %v2827_v51 }
 0x18a   : > { %v2874_v36 = vunpack.c.l.b16 %v2834_v48  ;;  %v2953_v40 = vunpack.c.l.b16 %v2825_v24  ;;  %v2803_v43 = vpack.c.bf16 %v2799_v37, %v2799_v37 }
 0x18b   : > { %2935 = vmatpush.bf16.msra.mxu0 %v6521_v0  ;;  %v2833_v11 = vmul.f32 %v8057_v62, %v2819_v39  ;;  %v2824_v53 = vmul.f32 %v2820_v2, %v2819_v39 }
 0x18c   : > { %3014 = vmatpush.bf16.msra.mxu1 %v6513_v5  ;;  %v2878_v10 = vpack.c.b16 %v2875_v29, %v2874_v36  ;;  %v2957_v41 = vpack.c.b16 %v2954_v35, %v2953_v40 }
 0x18d   : > { %v2837_v47 = vpack.c.bf16 %v2833_v11, %v2833_v11  ;;  %v2828_v61 = vpack.c.bf16 %v2824_v53, %v2824_v53 }
 0x18f   : > { %2936 = vmatpush.bf16.msra.mxu0 %v6520_v14  ;;  %v2877_v52 = vunpack.c.l.b16 %v2837_v47  ;;  %v2956_v58 = vunpack.c.l.b16 %v2828_v61 }
 0x190   : > { %3015 = vmatpush.bf16.msra.mxu1 %v6512_v18 }
 0x191   : > { %v2879_v60 = vpack.c.b16 %v2877_v52, %v2876_v56  ;;  %v2958_v30 = vpack.c.b16 %v2956_v58, %v2955_v57 }
 0x193   : > { %2937 = vmatpush.bf16.msra.mxu0 %v6519_v28  ;;  %v2583_v49 = vpop.f32.mrf.mxu0 }
 0x194   : > { %3016 = vmatpush.bf16.msra.mxu1 %v6511_v34  ;;  %v2596_v9 = vpop.f32.mrf.mxu1 }
 0x195   : > { %v2597_v55 = vadd.f32 %v2596_v9, %v2583_v49  ;;  %v7057_v49 = vmov 0  }
 0x196   : > { %2938 = vmatmul.bf16.vlgmr.msra.gmra.mxu0 %v2878_v10  ;;  %v3082_v61 = vsel %vm3081_vm1, 1, %v7057_v49 }
 0x197   : > { %3017 = vmatmul.bf16.vlgmr.msra.gmra.mxu1 %v2957_v41  ;;  %v3083_v9 = vperm.slane %v3082_v61, 0 }
 0x198   : > { %3062 = vmatmul.bf16.vlgmr.msrb.gmra.mxu2 %v2802_v44 }
 0x199   : > { %3075 = vmatmul.bf16.vlgmr.msrb.gmra.mxu3 %v2803_v43  ;;  %vm8098_vm2 = vcmp.eq.s32.totalorder %v3083_v9, 1 }
 0x19b   : > { %v2609_v59 = vpop.f32.mrf.mxu2  ;;  %v2585_v63 = vpop.f32.mrf.mxu0 }
 0x19c   : > { %v2610_v0 = vadd.f32 %v2609_v59, %v2597_v55  ;;  %v2622_v1 = vpop.f32.mrf.mxu3  ;;  %v2598_v3 = vpop.f32.mrf.mxu1 }
 0x19e   : > { %v2623_v62 = vadd.f32 %v2622_v1, %v2610_v0 }
 0x1a0   : > { %v3138_v2 = vpack.c.bf16 %v2623_v62, %v2623_v62 }
 0x1a2   : > { %v3147_v4 = vsel %vm3145_vm0, %v3138_v2, 0 }
 0x1a3   : > { %3156 = vmatpush.bf16.msra.mxu2 %v3147_v4  ;;  %v2611_v5 = vpop.f32.mrf.mxu2 }
 0x1a4   : > { %v2624_v26 = vpop.f32.mrf.mxu3 }
 0x1a6   : > { %2943 = vmatmul.bf16.gmra.mxu0 %v2879_v60 }
 0x1a7   : > { %3022 = vmatmul.bf16.gmra.mxu1 %v2958_v30 }
 0x1b3   : > { %v2635_v33 = vpop.f32.mrf.mxu0 }
 0x1b4   : > { %v2648_v6 = vpop.f32.mrf.mxu1 }
 0x1b5   : > { %v2649_v7 = vadd.f32 %v2648_v6, %v2635_v33 }
 0x1bb   : > { %v2661_v8 = vpop.f32.mrf.mxu2  ;;  %v2637_v12 = vpop.f32.mrf.mxu0 }
 0x1bc   : > { %v2662_v13 = vadd.f32 %v2661_v8, %v2649_v7  ;;  %v2674_v14 = vpop.f32.mrf.mxu3  ;;  %v2650_v15 = vpop.f32.mrf.mxu1 }
 0x1be   : > { %v2675_v16 = vadd.f32 %v2674_v14, %v2662_v13 }
 0x1c0   : > { %v3139_v17 = vpack.c.bf16 %v2675_v16, %v2675_v16 }
 0x1c2   : > { %v3166_v18 = vsel %vm3145_vm0, %v3139_v17, 0 }
 0x1c3   : > { %3175 = vmatpush.bf16.msra.mxu3 %v3166_v18  ;;  %v2663_v19 = vpop.f32.mrf.mxu2 }
 0x1c4   : > { %v2676_v20 = vpop.f32.mrf.mxu3 }
 0x1d3   : > { %v2687_v21 = vpop.f32.mrf.mxu0 }
 0x1d4   : > { %v2700_v48 = vpop.f32.mrf.mxu1 }
 0x1d5   : > { %v2701_v22 = vadd.f32 %v2700_v48, %v2687_v21 }
 0x1db   : > { %v2713_v23 = vpop.f32.mrf.mxu2  ;;  %v2689_v28 = vpop.f32.mrf.mxu0 }
 0x1dc   : > { %v2714_v24 = vadd.f32 %v2713_v23, %v2701_v22  ;;  %v2726_v25 = vpop.f32.mrf.mxu3  ;;  %v2702_v29 = vpop.f32.mrf.mxu1 }
 0x1de   : > { %v2727_v27 = vadd.f32 %v2726_v25, %v2714_v24 }
 0x1e0   : > { %v3140_v31 = vpack.c.bf16 %v2727_v27, %v2727_v27 }
 0x1e2   : > { %v3185_v32 = vsel %vm3145_vm0, %v3140_v31, 0 }
 0x1e3   : > { %v2715_v34 = vpop.f32.mrf.mxu2  ;;  %3194 = vmatpush.bf16.msrb.mxu0 %v3185_v32 }
 0x1e4   : > { %v2728_v35 = vpop.f32.mrf.mxu3 }
 0x1f3   : > { %v2739_v36 = vpop.f32.mrf.mxu0 }
 0x1f4   : > { %v2752_v38 = vpop.f32.mrf.mxu1 }
 0x1f5   : > { %v2753_v37 = vadd.f32 %v2752_v38, %v2739_v36 }
 0x1fb   : > { %v2765_v40 = vpop.f32.mrf.mxu2  ;;  %v2741_v10 = vpop.f32.mrf.mxu0 }
 0x1fc   : > { %v2766_v54 = vadd.f32 %v2765_v40, %v2753_v37  ;;  %v2778_v39 = vpop.f32.mrf.mxu3  ;;  %v2754_v41 = vpop.f32.mrf.mxu1 }
 0x1fe   : > { %v2779_v42 = vadd.f32 %v2778_v39, %v2766_v54 }
 0x200   : > { %v3141_v43 = vpack.c.bf16 %v2779_v42, %v2779_v42 }
 0x202   : > { %v3204_v44 = vsel %vm3145_vm0, %v3141_v43, 0 }
 0x203   : > { %v2767_v11 = vpop.f32.mrf.mxu2  ;;  %3213 = vmatpush.bf16.msrb.mxu1 %v3204_v44 }
 0x204   : > { %v2780_v53 = vpop.f32.mrf.mxu3 }
 0x20b   : > { %v3037_v46 = vpop.f32.mrf.mxu2 }
 0x20c   : > { %v3050_v47 = vpop.f32.mrf.mxu3 }
 0x213   : > { %v2939_v50 = vpop.f32.mrf.mxu0  ;;  %v3039_v52 = vpop.f32.mrf.mxu2 }
 0x214   : > { %v3018_v51 = vpop.f32.mrf.mxu1  ;;  %v3052_v58 = vpop.f32.mrf.mxu3 }
 0x215   : > { %v3019_v55 = vadd.f32 %v3018_v51, %v2939_v50 }
 0x217   : > { %v3038_v57 = vadd.f32 %v3037_v46, %v3019_v55 }
 0x219   : > { %v3085_v59 = vsel %vm8098_vm2, -1e+30, %v3038_v57 }
 0x21a   : > { %v3090_v60 = vsel %vm3089_vm3, %v3085_v59, -inf }
 0x21b   : > { %3091 = vmax.xlane.f32.xlu0 %v3090_v60  ;;  %v2941_v63 = vpop.f32.mrf.mxu0  ;;  %v3063_v1 = vpop.f32.mrf.mxu2 }
 0x21c   : > { %v3020_v0 = vpop.f32.mrf.mxu1  ;;  %v3076_v3 = vpop.f32.mrf.mxu3 }
 0x21d   : > { %v3021_v30 = vadd.f32 %v3020_v0, %v2941_v63  ;;  %v6800_v63 = vld [vmem:[%s7415_s24] sm:$0xff] }
 0x21f   : > { %v3051_v62 = vadd.f32 %v3050_v47, %v3021_v30  ;;  %v6801_v30 = vld [vmem:[%s7415_s24 + $0x10] sm:$0xff] }
 0x221   : > { %v3086_v2 = vsel %vm8098_vm2, -1e+30, %v3051_v62 }
 0x222   : > { %v3093_v4 = vsel %vm3089_vm3, %v3086_v2, -inf }
 0x223   : > { %3094 = vmax.xlane.f32.xlu0 %v3093_v4  ;;  %v2944_v5 = vpop.f32.mrf.mxu0  ;;  %v3065_v33 = vpop.f32.mrf.mxu2 }
 0x224   : > { %v3023_v26 = vpop.f32.mrf.mxu1  ;;  %v3078_v7 = vpop.f32.mrf.mxu3 }
 0x225   : > { %v3024_v6 = vadd.f32 %v3023_v26, %v2944_v5  ;;  %v6802_v26 = vld [vmem:[%s7415_s24 + $0x18] sm:$0xff] }
 0x227   : > { %v3064_v8 = vadd.f32 %v3063_v1, %v3024_v6 }
 0x229   : > { %v3087_v12 = vsel %vm8098_vm2, -1e+30, %v3064_v8  ;;  %v7058_v8 = vmov 512.0  }
 0x22a   : > { %v3096_v13 = vsel %vm3089_vm3, %v3087_v12, -inf }
 0x22b   : > { %3097 = vmax.xlane.f32.xlu1 %v3096_v13  ;;  %v2946_v14 = vpop.f32.mrf.mxu0 }
 0x22c   : > { %v3025_v15 = vpop.f32.mrf.mxu1 }
 0x22d   : > { %v3026_v16 = vadd.f32 %v3025_v15, %v2946_v14  ;;  %v5848_v15 = vld [vmem:[%s7371_s16 + $0xe0] sm:$0xf] }
 0x22f   : > { %v3077_v17 = vadd.f32 %v3076_v3, %v3026_v16  ;;  %v6557_v16 = vld [vmem:[%s7371_s16 + $0xec] sm:$0xf0] }
 0x231   : > { %v3088_v18 = vsel %vm8098_vm2, -1e+30, %v3077_v17  ;;  %v5976_v17 = vld [vmem:[%s7371_s16 + $0x1e0] sm:$0xf] }
 0x232   : > { %v3099_v19 = vsel %vm3089_vm3, %v3088_v18, -inf }
 0x233   : > { %3100 = vmax.xlane.f32.xlu1 %v3099_v19  ;;  %v6589_v19 = vld [vmem:[%s7371_s16 + $0x1ec] sm:$0xf0] }
 0x28e   : > { %v3092_v20 = vpop.xlane.xlu0 %3091 }
 0x28f   : > { %v3102_v21 = vsub.f32 %v3085_v59, %v3092_v20  ;;  %v6799_v59 = vld [vmem:[%s7415_s24 + $0x8] sm:$0xff]  ;;  %v6104_v20 = vld [vmem:[%s7371_s16 + $0x2e0] sm:$0xf] }
 0x291   : > { %v3106_v48 = vmul.f32 1.442695, %v3102_v21  ;;  %v6621_v21 = vld [vmem:[%s7371_s16 + $0x2ec] sm:$0xf0] }
 0x293   : > { %6777 = vpow2.f32 %v3106_v48  ;;  %v5977_v48 = vor.u32 %v6589_v19, %v5976_v17  ;;  %v5768_v17 = vld [vmem:[%s7371_s16 + $0x40] sm:$0xf] }
 0x295   : > { %4088 = vmatpush.bf16.msrb.mxu3 %v5977_v48  ;;  %v6569_v48 = vld [vmem:[%s7371_s16 + $0x14c] sm:$0xf0] }
 0x296   : > { %v3095_v22 = vpop.xlane.xlu0 %3094 }
 0x297   : > { %v3103_v23 = vsub.f32 %v3086_v2, %v3095_v22  ;;  %v6105_v22 = vor.u32 %v6621_v21, %v6104_v20  ;;  %v5896_v21 = vld [vmem:[%s7371_s16 + $0x140] sm:$0xf] }
 0x299   : > { %v6778_v24 = vpop.eup %6777  ;;  %v3108_v25 = vmul.f32 1.442695, %v3103_v23  ;;  %v6232_v23 = vld [vmem:[%s7371_s16 + $0x3e0] sm:$0xf]  ;;  %4101 = vmatpush.bf16.msra.mxu0 %v6105_v22 }
 0x29a   : > { %v3114_v27 = vsel %vm3089_vm3, %v6778_v24, 0.0  ;;  %v6024_v22 = vld [vmem:[%s7371_s16 + $0x240] sm:$0xf] }
 0x29b   : > { %6779 = vpow2.f32 %v3108_v25  ;;  %3115 = vadd.xlane.f32.xlu2 %v3114_v27  ;;  %v5832_v25 = vld [vmem:[%s7371_s16 + $0xc0] sm:$0xf] }
 0x29e   : > { %v3098_v28 = vpop.xlane.xlu1 %3097 }
 0x29f   : > { %v3104_v29 = vsub.f32 %v3087_v12, %v3098_v28  ;;  %v6553_v28 = vld [vmem:[%s7371_s16 + $0xcc] sm:$0xf0] }
 0x2a1   : > { %v6780_v31 = vpop.eup %6779  ;;  %v3110_v32 = vmul.f32 1.442695, %v3104_v29  ;;  %v5960_v29 = vld [vmem:[%s7371_s16 + $0x1c0] sm:$0xf] }
 0x2a2   : > { %v3117_v34 = vsel %vm3089_vm3, %v6780_v31, 0.0 }
 0x2a3   : > { %6781 = vpow2.f32 %v3110_v32  ;;  %3118 = vadd.xlane.f32.xlu2 %v3117_v34  ;;  %v5833_v32 = vor.u32 %v6553_v28, %v5832_v25  ;;  %v6633_v25 = vld [vmem:[%s7371_s16 + $0x34c] sm:$0xf0] }
 0x2a6   : > { %v3101_v35 = vpop.xlane.xlu1 %3100 }
 0x2a7   : > { %v3105_v36 = vsub.f32 %v3088_v18, %v3101_v35  ;;  %v5849_v18 = vor.u32 %v6557_v16, %v5848_v15  ;;  %v6088_v35 = vld [vmem:[%s7371_s16 + $0x2c0] sm:$0xf] }
 0x2a9   : > { %v6782_v38 = vpop.eup %6781  ;;  %v3112_v37 = vmul.f32 1.442695, %v3105_v36  ;;  %4075 = vmatpush.bf16.msrb.mxu2 %v5849_v18  ;;  %v6617_v36 = vld [vmem:[%s7371_s16 + $0x2cc] sm:$0xf0] }
 0x2aa   : > { %v3120_v40 = vsel %vm3089_vm3, %v6782_v38, 0.0  ;;  %v6537_v18 = vld [vmem:[%s7371_s16 + $0x4c] sm:$0xf0] }
 0x2ab   : > { %6783 = vpow2.f32 %v3112_v37  ;;  %3121 = vadd.xlane.f32.xlu0 %v3120_v40  ;;  %v6089_v37 = vor.u32 %v6617_v36, %v6088_v35  ;;  %v6649_v40 = vld [vmem:[%s7371_s16 + $0x3cc] sm:$0xf0]  ;;  %v5769_v28 = vor.u32 %v6537_v18, %v5768_v17  ;;  %v5880_v36 = vld [vmem:[%s7371_s16 + $0x120] sm:$0xf] }
 0x2ad   : > { %4076 = vmatpush.bf16.msrb.mxu2 %v5833_v32  ;;  %4102 = vmatpush.bf16.msra.mxu0 %v6089_v37  ;;  %v6533_v32 = vld [vmem:[%s7371_s16 + $0x2c] sm:$0xf0]  ;;  %v6008_v37 = vld [vmem:[%s7371_s16 + $0x220] sm:$0xf] }
 0x2b1   : > { %v6784_v54 = vpop.eup %6783 }
 0x2b2   : > { %v3123_v39 = vsel %vm3089_vm3, %v6784_v54, 0.0 }
 0x2b3   : > { %3124 = vadd.xlane.f32.xlu1 %v3123_v39  ;;  %v6549_v39 = vld [vmem:[%s7371_s16 + $0xac] sm:$0xf0] }
 0x30e   : > { %v3116_v10 = vpop.xlane.xlu2 %3115 }
 0x30f   : > { %6785 = vrcp.f32 %v3116_v10 }
 0x315   : > { %v6786_v41 = vpop.eup %6785 }
 0x316   : > { %v3130_v42 = vmul.f32 %v6786_v41, %v6778_v24  ;;  %v3119_v43 = vpop.xlane.xlu2 %3118  ;;  %v6653_v24 = vld [vmem:[%s7371_s16 + $0x3ec] sm:$0xf0]  ;;  %v5944_v41 = vld [vmem:[%s7371_s16 + $0x1a0] sm:$0xf] }
 0x317   : > { %6787 = vrcp.f32 %v3119_v43  ;;  %v6233_v27 = vor.u32 %v6653_v24, %v6232_v23  ;;  %v6072_v43 = vld [vmem:[%s7371_s16 + $0x2a0] sm:$0xf]  ;;  %v6601_v23 = vld [vmem:[%s7371_s16 + $0x24c] sm:$0xf0] }
 0x318   : > { %v3134_v44 = vpack.c.bf16 %v3130_v42, %v3130_v42  ;;  %v6581_v42 = vld [vmem:[%s7371_s16 + $0x1ac] sm:$0xf0]  ;;  %v6152_v24 = vld [vmem:[%s7371_s16 + $0x340] sm:$0xf] }
 0x319   : > { %4114 = vmatpush.bf16.msra.mxu1 %v6233_v27  ;;  %v6153_v35 = vor.u32 %v6633_v25, %v6152_v24  ;;  %v6647_v24 = vld [vmem:[%s7371_s16 + $0x3c4] sm:$0xf]  ;;  %v6218_v25 = vld [vmem:[%s7371_s16 + $0x3d0] sm:$0xf0] }
 0x31a   : > { %5730 = vmatmul.msk.bf16.vlgmr.msra.gmra.mxu2 %vm3089_vm3, %v3134_v44 }
 0x31d   : > { %v6788_v11 = vpop.eup %6787 }
 0x31e   : > { %v3131_v53 = vmul.f32 %v6788_v11, %v6780_v31  ;;  %v3122_v45 = vpop.xlane.xlu0 %3121  ;;  %v6585_v31 = vld [vmem:[%s7371_s16 + $0x1cc] sm:$0xf0] }
 0x31f   : > { %6789 = vrcp.f32 %v3122_v45  ;;  %v5961_v34 = vor.u32 %v6585_v31, %v5960_v29  ;;  %v6613_v11 = vld [vmem:[%s7371_s16 + $0x2ac] sm:$0xf0]  ;;  %v5897_v29 = vor.u32 %v6569_v48, %v5896_v21  ;;  %v5752_v31 = vld [vmem:[%s7371_s16 + $0x20] sm:$0xf]  ;;  %v5962_v21 = vld [vmem:[%s7371_s16 + $0x1d0] sm:$0xf0] }
 0x320   : > { %v3135_v46 = vpack.c.bf16 %v3131_v53, %v3131_v53  ;;  %v6200_v53 = vld [vmem:[%s7371_s16 + $0x3a0] sm:$0xf]  ;;  %v6645_v45 = vld [vmem:[%s7371_s16 + $0x3ac] sm:$0xf0]  ;;  %v6615_v48 = vld [vmem:[%s7371_s16 + $0x2c4] sm:$0xf] }
 0x321   : > { %4089 = vmatpush.bf16.msrb.mxu3 %v5961_v34  ;;  %v6025_v34 = vor.u32 %v6601_v23, %v6024_v22  ;;  %v6090_v23 = vld [vmem:[%s7371_s16 + $0x2d0] sm:$0xf0] }
 0x322   : > { %5731 = vmatmul.msk.bf16.vlgmr.msra.gmra.mxu3 %vm3089_vm3, %v3135_v46  ;;  %v5945_v46 = vor.u32 %v6581_v42, %v5944_v41  ;;  %v6136_v41 = vld [vmem:[%s7371_s16 + $0x320] sm:$0xf]  ;;  %v6629_v42 = vld [vmem:[%s7371_s16 + $0x32c] sm:$0xf0] }
 0x325   : > { %v6790_v47 = vpop.eup %6789  ;;  %4090 = vmatpush.bf16.msrb.mxu3 %v5945_v46 }
 0x326   : > { %v3132_v49 = vmul.f32 %v6790_v47, %v6782_v38  ;;  %v3125_v61 = vpop.xlane.xlu1 %3124  ;;  %v6216_v38 = vld [vmem:[%s7371_s16 + $0x3c0] sm:$0xf]  ;;  %v6073_v47 = vor.u32 %v6613_v11, %v6072_v43  ;;  %v5753_v43 = vor.u32 %v6533_v32, %v5752_v31  ;;  %v6579_v31 = vld [vmem:[%s7371_s16 + $0x1a4] sm:$0xf] }
 0x327   : > { %6791 = vrcp.f32 %v3125_v61  ;;  %v6217_v10 = vor.u32 %v6649_v40, %v6216_v38  ;;  %v6545_v61 = vld [vmem:[%s7371_s16 + $0x8c] sm:$0xf0] }
 0x328   : > { %v3136_v9 = vpack.c.bf16 %v3132_v49, %v3132_v49  ;;  %6793 = vrcp.f32 %v7058_v8  ;;  %v5800_v49 = vld [vmem:[%s7371_s16 + $0x80] sm:$0xf]  ;;  %4103 = vmatpush.bf16.msra.mxu0 %v6073_v47  ;;  %v6565_v38 = vld [vmem:[%s7371_s16 + $0x12c] sm:$0xf0] }
 0x329   : > { %4115 = vmatpush.bf16.msra.mxu1 %v6217_v10  ;;  %v6168_v8 = vld [vmem:[%s7371_s16 + $0x360] sm:$0xf]  ;;  %v6597_v10 = vld [vmem:[%s7371_s16 + $0x22c] sm:$0xf0] }
 0x32a   : > { %5732 = vmatmul.msk.bf16.vlgmr.msrb.gmra.mxu0 %vm3089_vm3, %v3136_v9  ;;  %v5928_v9 = vld [vmem:[%s7371_s16 + $0x180] sm:$0xf] }
 0x32d   : > { %v6792_v50 = vpop.eup %6791 }
 0x32e   : > { %v3133_v51 = vmul.f32 %v6792_v50, %v6784_v54  ;;  %v8138_v12 = vpop.eup %6793  ;;  %v5816_v54 = vld [vmem:[%s7371_s16 + $0xa0] sm:$0xf] }
 0x32f   : > { %v3229_v13 = vmul.f32 512.0, %v8138_v12  ;;  %v5817_v44 = vor.u32 %v6549_v39, %v5816_v54  ;;  %vm3233_vm4 = vweird.f32 %v8138_v12 }
 0x330   : > { %v3137_v52 = vpack.c.bf16 %v3133_v51, %v3133_v51  ;;  %v6201_v51 = vor.u32 %v6645_v45, %v6200_v53  ;;  %v6137_v53 = vor.u32 %v6629_v42, %v6136_v41  ;;  %v6202_v41 = vld [vmem:[%s7371_s16 + $0x3b0] sm:$0xf0] }
 0x331   : > { %v3230_v14 = vsub.f32 1.0, %v3229_v13  ;;  %4077 = vmatpush.bf16.msrb.mxu2 %v5817_v44  ;;  %v6637_v13 = vld [vmem:[%s7371_s16 + $0x36c] sm:$0xf0] }
 0x332   : > { %5733 = vmatmul.msk.bf16.vlgmr.msrb.gmra.mxu1 %vm3089_vm3, %v3137_v52  ;;  %v6577_v52 = vld [vmem:[%s7371_s16 + $0x18c] sm:$0xf0]  ;;  %v6169_v20 = vor.u32 %v6637_v13, %v6168_v8  ;;  %v6651_v8 = vld [vmem:[%s7371_s16 + $0x3e4] sm:$0xf] }
 0x333   : > { %v3231_v50 = vmul.f32 %v8138_v12, %v3230_v14  ;;  %4116 = vmatpush.bf16.msra.mxu1 %v6201_v51 }
 0x39d   : > { %v3158_v55 = vpop.f32.mrf.mxu2 }
 0x39e   : > { %v8126_v0 = vadd.f32 %v6800_v63, %v3158_v55  ;;  %v6056_v55 = vld [vmem:[%s7371_s16 + $0x280] sm:$0xf]  ;;  %v5929_v63 = vor.u32 %v6577_v52, %v5928_v9  ;;  %v6529_v9 = vld [vmem:[%s7371_s16 + $0xc] sm:$0xf0] }
 0x39f   : > { %v6561_v52 = vld [vmem:[%s7371_s16 + $0x10c] sm:$0xf0] }
 0x3a0   : > { %4091 = vmatpush.bf16.msrb.mxu3 %v5929_v63  ;;  %v6625_v63 = vld [vmem:[%s7371_s16 + $0x30c] sm:$0xf0] }
 0x3a5   : > { %v3160_v58 = vpop.f32.mrf.mxu2  ;;  %v3177_v56 = vpop.f32.mrf.mxu3 }
 0x3a6   : > { %v8123_v60 = vadd.f32 %v6799_v59, %v3177_v56  ;;  %v6609_v58 = vld [vmem:[%s7371_s16 + $0x28c] sm:$0xf0]  ;;  %v6184_v56 = vld [vmem:[%s7371_s16 + $0x380] sm:$0xf]  ;;  %v5801_v59 = vor.u32 %v6545_v61, %v5800_v49 }
 0x3a7   : > { %v3196_v57 = vpop.f32.mrf.mxu0  ;;  %v5736_v61 = vld [vmem:[%s7371_s16] sm:$0xf] }
 0x3a8   : > { %v3223_v1 = vadd.f32 %v8123_v60, %v8126_v0  ;;  %v8131_v3 = vadd.f32 %v6801_v30, %v3196_v57  ;;  %v6641_v57 = vld [vmem:[%s7371_s16 + $0x38c] sm:$0xf0]  ;;  %v5784_v30 = vld [vmem:[%s7371_s16 + $0x60] sm:$0xf]  ;;  %4078 = vmatpush.bf16.msrb.mxu2 %v5801_v59  ;;  %v5737_v51 = vor.u32 %v6529_v9, %v5736_v61  ;;  %v6539_v9 = vld [vmem:[%s7371_s16 + $0x64] sm:$0xf] }
 0x3a9   : > { %v6120_v59 = vld [vmem:[%s7371_s16 + $0x300] sm:$0xf] }
 0x3aa   : > { %v3224_v5 = vadd.f32 %v3223_v1, %v8131_v3  ;;  %v6057_v1 = vor.u32 %v6609_v58, %v6056_v55  ;;  %v5992_v55 = vld [vmem:[%s7371_s16 + $0x200] sm:$0xf]  ;;  %v6593_v58 = vld [vmem:[%s7371_s16 + $0x20c] sm:$0xf0] }
 0x3ac   : > { %4104 = vmatpush.bf16.msra.mxu0 %v6057_v1  ;;  %v6555_v1 = vld [vmem:[%s7371_s16 + $0xe4] sm:$0xf] }
 0x3ad   : > { %v3179_v62 = vpop.f32.mrf.mxu3 }
 0x3ae   : > { %v6541_v62 = vld [vmem:[%s7371_s16 + $0x6c] sm:$0xf0] }
 0x3af   : > { %v3198_v2 = vpop.f32.mrf.mxu0  ;;  %v3215_v4 = vpop.f32.mrf.mxu1  ;;  %v5785_v14 = vor.u32 %v6541_v62, %v5784_v30  ;;  %v6121_v30 = vor.u32 %v6625_v63, %v6120_v59  ;;  %v5850_v62 = vld [vmem:[%s7371_s16 + $0xf0] sm:$0xf0]  ;;  %v6635_v63 = vld [vmem:[%s7371_s16 + $0x364] sm:$0xf] }
 0x3b0   : > { %v8135_v33 = vadd.f32 %v6802_v26, %v3215_v4  ;;  %v5912_v2 = vld [vmem:[%s7371_s16 + $0x160] sm:$0xf]  ;;  %v3232_v4 = vadd.f32 %v8138_v12, %v3231_v50  ;;  %v6573_v26 = vld [vmem:[%s7371_s16 + $0x16c] sm:$0xf0] }
 0x3b1   : > { %v5913_v15 = vor.u32 %v6573_v26, %v5912_v2  ;;  %4079 = vmatpush.bf16.msrb.mxu2 %v5785_v14  ;;  %v5864_v50 = vld [vmem:[%s7371_s16 + $0x100] sm:$0xf]  ;;  %v6587_v2 = vld [vmem:[%s7371_s16 + $0x1e4] sm:$0xf]  ;;  %v6234_v14 = vld [vmem:[%s7371_s16 + $0x3f0] sm:$0xf0] }
 0x3b2   : > { %v3225_v6 = vadd.f32 %v3224_v5, %v8135_v33  ;;  %v6185_v5 = vor.u32 %v6641_v57, %v6184_v56  ;;  %v8187_v19 = vsel %vm3233_vm4, %v8138_v12, %v3232_v4  ;;  %v5865_v56 = vor.u32 %v6561_v52, %v5864_v50  ;;  %v5978_v4 = vld [vmem:[%s7371_s16 + $0x1f0] sm:$0xf0] }
 0x3b3   : > { %4092 = vmatpush.bf16.msrb.mxu3 %v5913_v15  ;;  %v5993_v57 = vor.u32 %v6593_v58, %v5992_v55  ;;  %v5981_v26 = vor.u32 %v6587_v2, %v5978_v4  ;;  %v6551_v15 = vld [vmem:[%s7371_s16 + $0xc4] sm:$0xf]  ;;  %v6237_v17 = vor.u32 %v6651_v8, %v6234_v14  ;;  %v5786_v50 = vld [vmem:[%s7371_s16 + $0x70] sm:$0xf0] }
 0x3b4   : > { %3226 = vadd.xlane.f32.xlu2 %v3225_v6  ;;  %v6040_v6 = vld [vmem:[%s7371_s16 + $0x260] sm:$0xf]  ;;  %4117 = vmatpush.bf16.msra.mxu1 %v6185_v5  ;;  %v5853_v5 = vor.u32 %v6555_v1, %v5850_v62  ;;  %v5789_v52 = vor.u32 %v6539_v9, %v5786_v50  ;;  %v5914_v55 = vld [vmem:[%s7371_s16 + $0x170] sm:$0xf0]  ;;  %v6603_v58 = vld [vmem:[%s7371_s16 + $0x264] sm:$0xf] }
 0x3b5   : > { %4080 = vmatpush.bf16.msrb.mxu2 %v5769_v28  ;;  %v6221_v28 = vor.u32 %v6647_v24, %v6218_v25  ;;  %v6170_v1 = vld [vmem:[%s7371_s16 + $0x370] sm:$0xf0]  ;;  %v6535_v62 = vld [vmem:[%s7371_s16 + $0x44] sm:$0xf] }
 0x3b6   : > { %v5770_v2 = vld [vmem:[%s7371_s16 + $0x50] sm:$0xf0]  ;;  %v6567_v4 = vld [vmem:[%s7371_s16 + $0x144] sm:$0xf] }
 0x3b7   : > { %v3217_v7 = vpop.f32.mrf.mxu1  ;;  %4093 = vmatpush.bf16.msrb.mxu3 %v5897_v29  ;;  %v5818_v29 = vld [vmem:[%s7371_s16 + $0xb0] sm:$0xf0]  ;;  %v6631_v14 = vld [vmem:[%s7371_s16 + $0x344] sm:$0xf] }
 0x3b8   : > { %v6605_v7 = vld [vmem:[%s7371_s16 + $0x26c] sm:$0xf0]  ;;  %4118 = vmatpush.bf16.msra.mxu1 %v6169_v20  ;;  %v6583_v20 = vld [vmem:[%s7371_s16 + $0x1c4] sm:$0xf] }
 0x3b9   : > { %v6041_v16 = vor.u32 %v6605_v7, %v6040_v6  ;;  %4081 = vmatpush.bf16.msrb.mxu2 %v5753_v43  ;;  %v6619_v6 = vld [vmem:[%s7371_s16 + $0x2e4] sm:$0xf]  ;;  %v6106_v7 = vld [vmem:[%s7371_s16 + $0x2f0] sm:$0xf0]  ;;  %v5965_v22 = vor.u32 %v6583_v20, %v5962_v21 }
 0x3ba   : > { %v6109_v13 = vor.u32 %v6619_v6, %v6106_v7  ;;  %v6543_v43 = vld [vmem:[%s7371_s16 + $0x84] sm:$0xf]  ;;  %v6026_v7 = vld [vmem:[%s7371_s16 + $0x250] sm:$0xf0] }
 0x3bb   : > { %4105 = vmatpush.bf16.msra.mxu0 %v6041_v16  ;;  %v5834_v16 = vld [vmem:[%s7371_s16 + $0xd0] sm:$0xf0]  ;;  %v6599_v6 = vld [vmem:[%s7371_s16 + $0x244] sm:$0xf] }
 0x3bc   : > { %4119 = vmatpush.bf16.msra.mxu1 %v6153_v35  ;;  %v5837_v18 = vor.u32 %v6551_v15, %v5834_v16  ;;  %v6611_v35 = vld [vmem:[%s7371_s16 + $0x2a4] sm:$0xf]  ;;  %v6154_v15 = vld [vmem:[%s7371_s16 + $0x350] sm:$0xf0] }
 0x3bd   : > { %4082 = vmatpush.bf16.msrb.mxu2 %v5737_v51  ;;  %v6571_v51 = vld [vmem:[%s7371_s16 + $0x164] sm:$0xf]  ;;  %v6157_v16 = vor.u32 %v6631_v14, %v6154_v15  ;;  %v6622_v15 = vld [vmem:[%s7371_s16 + $0x2f4] sm:$0xf0] }
 0x3be   : > { %v6563_v20 = vld [vmem:[%s7371_s16 + $0x124] sm:$0xf] }
 0x3bf   : > { %4106 = vmatpush.bf16.msra.mxu0 %v6025_v34  ;;  %v5946_v34 = vld [vmem:[%s7371_s16 + $0x1b0] sm:$0xf0] }
 0x3c0   : > { %4120 = vmatpush.bf16.msra.mxu1 %v6137_v53  ;;  %v6607_v53 = vld [vmem:[%s7371_s16 + $0x284] sm:$0xf] }
 0x3c1   : > { %4127 = vmatpush.bf16.msra.mxu2 %v5853_v5  ;;  %v5773_v5 = vor.u32 %v6535_v62, %v5770_v2  ;;  %v5856_v2 = vld [vmem:[%s7371_s16 + $0xe8] sm:$0xf] }
 0x3c4   : > { %4121 = vmatpush.bf16.msra.mxu1 %v6121_v30  ;;  %v6173_v30 = vor.u32 %v6635_v63, %v6170_v1 }
 0x3c5   : > { %4128 = vmatpush.bf16.msra.mxu2 %v5837_v18  ;;  %v5754_v18 = vld [vmem:[%s7371_s16 + $0x30] sm:$0xf0] }
 0x3c8   : > { %4166 = vmatpush.bf16.msrb.mxu1 %v6237_v17  ;;  %v6531_v17 = vld [vmem:[%s7371_s16 + $0x24] sm:$0xf] }
 0x3c9   : > { %v5757_v21 = vor.u32 %v6531_v17, %v5754_v18  ;;  %v6654_v17 = vld [vmem:[%s7371_s16 + $0x3f4] sm:$0xf0] }
 0x3cc   : > { %4167 = vmatpush.bf16.msrb.mxu1 %v6221_v28  ;;  %v6138_v28 = vld [vmem:[%s7371_s16 + $0x330] sm:$0xf0] }
 0x427   : > { %v3227_v27 = vpop.xlane.xlu2 %3226 }
 0x428   : > { %v3235_v12 = vmul.f32 %v8187_v19, %v3227_v27  ;;  %v6093_v27 = vor.u32 %v6615_v48, %v6090_v23  ;;  %v5882_v48 = vld [vmem:[%s7371_s16 + $0x130] sm:$0xf0] }
 0x429   : > { %v6010_v23 = vld [vmem:[%s7371_s16 + $0x230] sm:$0xf0]  ;;  %v5885_v24 = vor.u32 %v6563_v20, %v5882_v48 }
 0x42a   : > { %v8202_v40 = vsub.f32 %v8126_v0, %v3235_v12  ;;  %v8205_v54 = vsub.f32 %v8123_v60, %v3235_v12  ;;  %v8208_v39 = vsub.f32 %v8131_v3, %v3235_v12  ;;  %v8214_v44 = vsub.f32 %v8135_v33, %v3235_v12  ;;  %v6547_v12 = vld [vmem:[%s7371_s16 + $0xa4] sm:$0xf] }
 0x42b   : > { %v5881_v60 = vor.u32 %v6565_v38, %v5880_v36  ;;  %v6009_v3 = vor.u32 %v6597_v10, %v6008_v37  ;;  %v5821_v32 = vor.u32 %v6547_v12, %v5818_v29  ;;  %v6074_v36 = vld [vmem:[%s7371_s16 + $0x2b0] sm:$0xf0]  ;;  %v5949_v38 = vor.u32 %v6579_v31, %v5946_v34  ;;  %v6643_v10 = vld [vmem:[%s7371_s16 + $0x3a4] sm:$0xf] }
 0x42c   : > { %v3240_v11 = vmul.f32 %v8202_v40, %v8202_v40  ;;  %v3241_v0 = vmul.f32 %v8205_v54, %v8205_v54  ;;  %v3242_v33 = vmul.f32 %v8208_v39, %v8208_v39  ;;  %v3243_v46 = vmul.f32 %v8214_v44, %v8214_v44  ;;  %v6527_v12 = vld [vmem:[%s7371_s16 + $0x4] sm:$0xf]  ;;  %v5738_v31 = vld [vmem:[%s7371_s16 + $0x10] sm:$0xf0] }
 0x42d   : > { %4094 = vmatpush.bf16.msrb.mxu3 %v5881_v60  ;;  %4107 = vmatpush.bf16.msra.mxu0 %v6009_v3  ;;  %v6077_v37 = vor.u32 %v6611_v35, %v6074_v36  ;;  %v6205_v42 = vor.u32 %v6643_v10, %v6202_v41  ;;  %v5930_v3 = vld [vmem:[%s7371_s16 + $0x190] sm:$0xf0]  ;;  %v6591_v35 = vld [vmem:[%s7371_s16 + $0x204] sm:$0xf] }
 0x42e   : > { %v3244_v45 = vadd.f32 %v3241_v0, %v3240_v11  ;;  %v5802_v11 = vld [vmem:[%s7371_s16 + $0x90] sm:$0xf0]  ;;  %v6575_v0 = vld [vmem:[%s7371_s16 + $0x184] sm:$0xf]  ;;  %4129 = vmatpush.bf16.msra.mxu2 %v5821_v32 }
 0x42f   : > { %v5805_v60 = vor.u32 %v6543_v43, %v5802_v11  ;;  %4168 = vmatpush.bf16.msrb.mxu1 %v6205_v42  ;;  %v6559_v32 = vld [vmem:[%s7371_s16 + $0x104] sm:$0xf]  ;;  %v5866_v34 = vld [vmem:[%s7371_s16 + $0x110] sm:$0xf0] }
 0x430   : > { %v3245_v47 = vadd.f32 %v3244_v45, %v3242_v33  ;;  %v6058_v33 = vld [vmem:[%s7371_s16 + $0x290] sm:$0xf0]  ;;  %v5933_v45 = vor.u32 %v6575_v0, %v5930_v3  ;;  %v5869_v10 = vor.u32 %v6559_v32, %v5866_v34  ;;  %v6618_v32 = vld [vmem:[%s7371_s16 + $0x2d4] sm:$0xf0]  ;;  %v6224_v34 = vld [vmem:[%s7371_s16 + $0x3c8] sm:$0xf] }
 0x431   : > { %4095 = vmatpush.bf16.msrb.mxu3 %v5865_v56  ;;  %4108 = vmatpush.bf16.msra.mxu0 %v5993_v57  ;;  %v6042_v56 = vld [vmem:[%s7371_s16 + $0x270] sm:$0xf0]  ;;  %v5917_v57 = vor.u32 %v6571_v51, %v5914_v55 }
 0x432   : > { %v3246_v49 = vadd.f32 %v3245_v47, %v3243_v46  ;;  %v6061_v46 = vor.u32 %v6607_v53, %v6058_v33  ;;  %v6639_v47 = vld [vmem:[%s7371_s16 + $0x384] sm:$0xf]  ;;  %4130 = vmatpush.bf16.msra.mxu2 %v5805_v60  ;;  %v6045_v59 = vor.u32 %v6603_v58, %v6042_v56  ;;  %v5994_v36 = vld [vmem:[%s7371_s16 + $0x210] sm:$0xf0] }
 0x433   : > { %v6122_v41 = vld [vmem:[%s7371_s16 + $0x310] sm:$0xf0]  ;;  %v5997_v42 = vor.u32 %v6591_v35, %v5994_v36  ;;  %v6650_v35 = vld [vmem:[%s7371_s16 + $0x3d4] sm:$0xf0] }
 0x434   : > { %3247 = vadd.xlane.f32.xlu0 %v3246_v49  ;;  %v6186_v49 = vld [vmem:[%s7371_s16 + $0x390] sm:$0xf0] }
 0x435   : > { %4140 = vmatpush.bf16.msra.mxu3 %v5981_v26  ;;  %4153 = vmatpush.bf16.msrb.mxu0 %v6109_v13  ;;  %v6189_v61 = vor.u32 %v6639_v47, %v6186_v49  ;;  %v5898_v26 = vld [vmem:[%s7371_s16 + $0x150] sm:$0xf0]  ;;  %v6029_v13 = vor.u32 %v6599_v6, %v6026_v7  ;;  %v3279_v49 = vld [vmem:[%s796_s10] sm:$0xf]  ;;  %v6558_v7 = vld [vmem:[%s7371_s16 + $0xf4] sm:$0xf0] }
 0x436   : > { %4131 = vmatpush.bf16.msra.mxu2 %v5789_v52  ;;  %v5901_v8 = vor.u32 %v6567_v4, %v5898_v26  ;;  %v3281_v50 = vperm.slane %v3279_v49, 0  ;;  %v3282_v56 = vperm.slane %v3279_v49, 1  ;;  %v5857_v18 = vor.u32 %v6558_v7, %v5856_v2  ;;  %v6574_v2 = vld [vmem:[%s7371_s16 + $0x174] sm:$0xf0] }
 0x437   : > { %4169 = vmatpush.bf16.msrb.mxu1 %v6189_v61 }
 0x439   : > { %4141 = vmatpush.bf16.msra.mxu3 %v5965_v22  ;;  %4154 = vmatpush.bf16.msrb.mxu0 %v6093_v27  ;;  %v6595_v22 = vld [vmem:[%s7371_s16 + $0x224] sm:$0xf] }
 0x43a   : > { %4132 = vmatpush.bf16.msra.mxu2 %v5773_v5  ;;  %v6013_v25 = vor.u32 %v6595_v22, %v6010_v23  ;;  %v6627_v27 = vld [vmem:[%s7371_s16 + $0x324] sm:$0xf] }
 0x43b   : > { %4170 = vmatpush.bf16.msrb.mxu1 %v6173_v30  ;;  %v6141_v29 = vor.u32 %v6627_v27, %v6138_v28 }
 0x43d   : > { %4142 = vmatpush.bf16.msra.mxu3 %v5949_v38  ;;  %4155 = vmatpush.bf16.msrb.mxu0 %v6077_v37  ;;  %v6623_v38 = vld [vmem:[%s7371_s16 + $0x304] sm:$0xf]  ;;  %v5741_v37 = vor.u32 %v6527_v12, %v5738_v31  ;;  %v5968_v12 = vld [vmem:[%s7371_s16 + $0x1c8] sm:$0xf] }
 0x43e   : > { %4133 = vmatpush.bf16.msra.mxu2 %v5757_v21  ;;  %v6125_v43 = vor.u32 %v6623_v38, %v6122_v41  ;;  %v6096_v31 = vld [vmem:[%s7371_s16 + $0x2c8] sm:$0xf] }
 0x43f   : > { %4171 = vmatpush.bf16.msrb.mxu1 %v6157_v16  ;;  %v6240_v16 = vld [vmem:[%s7371_s16 + $0x3e8] sm:$0xf]  ;;  %v6097_v41 = vor.u32 %v6618_v32, %v6096_v31  ;;  %v6534_v31 = vld [vmem:[%s7371_s16 + $0x34] sm:$0xf0] }
 0x440   : > { %v6241_v28 = vor.u32 %v6654_v17, %v6240_v16  ;;  %v5904_v17 = vld [vmem:[%s7371_s16 + $0x148] sm:$0xf] }
 0x441   : > { %4143 = vmatpush.bf16.msra.mxu3 %v5933_v45  ;;  %4156 = vmatpush.bf16.msrb.mxu0 %v6061_v46  ;;  %v3265_v46 = vld [vmem:[%s792_s3] sm:$0xf] }
 0x442   : > { %4134 = vmatpush.bf16.msra.mxu2 %v5741_v37  ;;  %v3267_v9 = vperm.slane %v3265_v46, 0  ;;  %v3268_v51 = vperm.slane %v3265_v46, 1  ;;  %v3269_v52 = vperm.slane %v3265_v46, 2  ;;  %v3270_v55 = vperm.slane %v3265_v46, 3  ;;  %v5824_v37 = vld [vmem:[%s7371_s16 + $0xa8] sm:$0xf] }
 0x443   : > { %4172 = vmatpush.bf16.msrb.mxu1 %v6141_v29  ;;  %v6586_v29 = vld [vmem:[%s7371_s16 + $0x1d4] sm:$0xf0]  ;;  %v5808_v46 = vld [vmem:[%s7371_s16 + $0x88] sm:$0xf] }
 0x444   : > { %v5969_v38 = vor.u32 %v6586_v29, %v5968_v12  ;;  %v5760_v29 = vld [vmem:[%s7371_s16 + $0x28] sm:$0xf] }
 0x445   : > { %4144 = vmatpush.bf16.msra.mxu3 %v5917_v57  ;;  %4157 = vmatpush.bf16.msrb.mxu0 %v6045_v59  ;;  %v3283_v57 = vperm.slane %v3279_v49, 2  ;;  %v3284_v59 = vperm.slane %v3279_v49, 3 }
 0x447   : > { %4173 = vmatpush.bf16.msrb.mxu1 %v6125_v43  ;;  %v5952_v43 = vld [vmem:[%s7371_s16 + $0x1a8] sm:$0xf] }
 0x449   : > { %4145 = vmatpush.bf16.msra.mxu3 %v5901_v8  ;;  %4158 = vmatpush.bf16.msrb.mxu0 %v6029_v13  ;;  %v5984_v8 = vld [vmem:[%s7371_s16 + $0x1e8] sm:$0xf]  ;;  %v6590_v13 = vld [vmem:[%s7371_s16 + $0x1f4] sm:$0xf0] }
 0x44a   : > { %v5985_v20 = vor.u32 %v6590_v13, %v5984_v8  ;;  %v5776_v13 = vld [vmem:[%s7371_s16 + $0x48] sm:$0xf] }
 0x44d   : > { %4146 = vmatpush.bf16.msra.mxu3 %v5885_v24  ;;  %4159 = vmatpush.bf16.msrb.mxu0 %v6013_v25  ;;  %v5840_v24 = vld [vmem:[%s7371_s16 + $0xc8] sm:$0xf]  ;;  %v6554_v25 = vld [vmem:[%s7371_s16 + $0xd4] sm:$0xf0] }
 0x44e   : > { %v5841_v36 = vor.u32 %v6554_v25, %v5840_v24  ;;  %v6602_v24 = vld [vmem:[%s7371_s16 + $0x254] sm:$0xf0]  ;;  %v6160_v25 = vld [vmem:[%s7371_s16 + $0x348] sm:$0xf] }
 0x451   : > { %4147 = vmatpush.bf16.msra.mxu3 %v5869_v10  ;;  %4160 = vmatpush.bf16.msrb.mxu0 %v5997_v42  ;;  %v6550_v10 = vld [vmem:[%s7371_s16 + $0xb4] sm:$0xf0]  ;;  %v6225_v42 = vor.u32 %v6650_v35, %v6224_v34  ;;  %v5888_v35 = vld [vmem:[%s7371_s16 + $0x128] sm:$0xf] }
 0x4a7   : > { %v3248_v11 = vpop.xlane.xlu0 %3247 }
 0x4a8   : > { %v3249_v0 = vmul.f32 %v3248_v11, %v8187_v19  ;;  %v6582_v11 = vld [vmem:[%s7371_s16 + $0x1b4] sm:$0xf0] }
 0x4aa   : > { %v3250_v60 = vadd.f32 1e-05, %v3249_v0  ;;  %v6080_v0 = vld [vmem:[%s7371_s16 + $0x2a8] sm:$0xf] }
 0x4ac   : > { %6795 = vrsqrt.f32 %v3250_v60  ;;  %vm3257_vm6 = vweird.f32 %v3250_v60 }
 0x4b2   : > { %v6796_v3 = vpop.eup %6795 }
 0x4b3   : > { %v3252_v53 = vmul.f32 %v6796_v3, %v3250_v60  ;;  %vm3258_vm5 = vweird.f32 %v6796_v3  ;;  %v6614_v60 = vld [vmem:[%s7371_s16 + $0x2b4] sm:$0xf0] }
 0x4b4   : > { %vm3259_vm7 = vmor %vm3257_vm6, %vm3258_vm5  ;;  %v6081_v49 = vor.u32 %v6614_v60, %v6080_v0  ;;  %v6530_v0 = vld [vmem:[%s7371_s16 + $0x14] sm:$0xf0]  ;;  %v5872_v60 = vld [vmem:[%s7371_s16 + $0x108] sm:$0xf] }
 0x4b5   : > { %v3253_v33 = vmul.f32 %v6796_v3, %v3252_v53  ;;  %v6646_v53 = vld [vmem:[%s7371_s16 + $0x3b4] sm:$0xf0] }
 0x4b7   : > { %v3254_v45 = vmul.f32 0.5, %v3253_v33  ;;  %v5825_v33 = vor.u32 %v6550_v10, %v5824_v37  ;;  %v6598_v37 = vld [vmem:[%s7371_s16 + $0x234] sm:$0xf0]  ;;  %v6144_v10 = vld [vmem:[%s7371_s16 + $0x328] sm:$0xf] }
 0x4b9   : > { %v3255_v47 = vsub.f32 1.5, %v3254_v45  ;;  %v5953_v45 = vor.u32 %v6582_v11, %v5952_v43  ;;  %v5761_v43 = vor.u32 %v6534_v31, %v5760_v29  ;;  %v6082_v29 = vld [vmem:[%s7371_s16 + $0x2b8] sm:$0xf0]  ;;  %v6644_v31 = vld [vmem:[%s7371_s16 + $0x3ac] sm:$0xf] }
 0x4bb   : > { %v3256_v61 = vmul.f32 %v6796_v3, %v3255_v47  ;;  %v6546_v47 = vld [vmem:[%s7371_s16 + $0x94] sm:$0xf0] }
 0x4bd   : > { %v3260_v58 = vsel %vm3259_vm7, %v6796_v3, %v3256_v61  ;;  %v6208_v3 = vld [vmem:[%s7371_s16 + $0x3a8] sm:$0xf] }
 0x4be   : > { %v3261_v63 = vmul.f32 %v3260_v58, %v8202_v40  ;;  %v3262_v1 = vmul.f32 %v3260_v58, %v8205_v54  ;;  %v3263_v30 = vmul.f32 %v3260_v58, %v8208_v39  ;;  %v3264_v62 = vmul.f32 %v3260_v58, %v8214_v44  ;;  %v6112_v40 = vld [vmem:[%s7371_s16 + $0x2e8] sm:$0xf]  ;;  %v6642_v58 = vld [vmem:[%s7371_s16 + $0x394] sm:$0xf0] }
 0x4bf   : > { %v6113_v27 = vor.u32 %v6622_v15, %v6112_v40  ;;  %v6209_v61 = vor.u32 %v6646_v53, %v6208_v3  ;;  %v6538_v40 = vld [vmem:[%s7371_s16 + $0x54] sm:$0xf0] }
 0x4c0   : > { %v3275_v4 = vmul.f32 %v3267_v9, %v3261_v63  ;;  %v3276_v5 = vmul.f32 %v3268_v51, %v3262_v1  ;;  %v3277_v26 = vmul.f32 %v3269_v52, %v3263_v30  ;;  %v3278_v6 = vmul.f32 %v3270_v55, %v3264_v62  ;;  %v5936_v9 = vld [vmem:[%s7371_s16 + $0x188] sm:$0xf]  ;;  %v6610_v52 = vld [vmem:[%s7371_s16 + $0x294] sm:$0xf0] }
 0x4c1   : > { %v6064_v51 = vld [vmem:[%s7371_s16 + $0x288] sm:$0xf]  ;;  %v6542_v63 = vld [vmem:[%s7371_s16 + $0x74] sm:$0xf0] }
 0x4c2   : > { %v8316_v14 = vadd.f32 %v3281_v50, %v3275_v4  ;;  %v8318_v54 = vadd.f32 %v3282_v56, %v3276_v5  ;;  %v8320_v39 = vadd.f32 %v3283_v57, %v3277_v26  ;;  %v8322_v44 = vadd.f32 %v3284_v59, %v3278_v6  ;;  %v6578_v50 = vld [vmem:[%s7371_s16 + $0x194] sm:$0xf0]  ;;  %v6192_v55 = vld [vmem:[%s7371_s16 + $0x388] sm:$0xf] }
 0x4c3   : > { %v5809_v56 = vor.u32 %v6546_v47, %v5808_v46  ;;  %v5937_v57 = vor.u32 %v6578_v50, %v5936_v9  ;;  %v5792_v59 = vld [vmem:[%s7371_s16 + $0x68] sm:$0xf]  ;;  %v6065_v1 = vor.u32 %v6610_v52, %v6064_v51  ;;  %v6193_v30 = vor.u32 %v6642_v58, %v6192_v55  ;;  %v6606_v5 = vld [vmem:[%s7371_s16 + $0x274] sm:$0xf0]  ;;  %v5858_v9 = vld [vmem:[%s7371_s16 + $0xf8] sm:$0xf0] }
 0x4c4   : > { %v8329_v21 = vpack.c.bf16 %v8316_v14, %v8316_v14  ;;  %v8333_v48 = vpack.c.bf16 %v8318_v54, %v8318_v54  ;;  %v8337_v22 = vpack.c.bf16 %v8320_v39, %v8320_v39  ;;  %v8341_v23 = vpack.c.bf16 %v8322_v44, %v8322_v44  ;;  %v5920_v62 = vld [vmem:[%s7371_s16 + $0x168] sm:$0xf]  ;;  %v6638_v6 = vld [vmem:[%s7371_s16 + $0x374] sm:$0xf0]  ;;  %v6588_v50 = vld [vmem:[%s7371_s16 + $0x1ec] sm:$0xf] }
 0x4c5   : > { %v6048_v4 = vld [vmem:[%s7371_s16 + $0x268] sm:$0xf]  ;;  %v5793_v7 = vor.u32 %v6542_v63, %v5792_v59  ;;  %v5921_v8 = vor.u32 %v6574_v2, %v5920_v62  ;;  %v6562_v3 = vld [vmem:[%s7371_s16 + $0x114] sm:$0xf0]  ;;  %v5986_v51 = vld [vmem:[%s7371_s16 + $0x1f8] sm:$0xf0] }
 0x4c6   : > { %4083 = vmatmul.bf16.vlgmr.msrb.gmra.mxu2 %v8329_v21  ;;  %4096 = vmatmul.bf16.vlgmr.msrb.gmra.mxu3 %v8333_v48  ;;  %v6176_v26 = vld [vmem:[%s7371_s16 + $0x368] sm:$0xf]  ;;  %v6049_v15 = vor.u32 %v6606_v5, %v6048_v4  ;;  %v6594_v46 = vld [vmem:[%s7371_s16 + $0x214] sm:$0xf0]  ;;  %v6620_v52 = vld [vmem:[%s7371_s16 + $0x2ec] sm:$0xf]  ;;  %v5873_v58 = vor.u32 %v6562_v3, %v5872_v60  ;;  %v5989_v62 = vor.u32 %v6588_v50, %v5986_v51 }
 0x4c7   : > { %4109 = vmatmul.bf16.vlgmr.msra.gmra.mxu0 %v8337_v22  ;;  %4122 = vmatmul.bf16.vlgmr.msra.gmra.mxu1 %v8341_v23  ;;  %v6177_v16 = vor.u32 %v6638_v6, %v6176_v26  ;;  %v6128_v47 = vld [vmem:[%s7371_s16 + $0x308] sm:$0xf]  ;;  %v6242_v59 = vld [vmem:[%s7371_s16 + $0x3f8] sm:$0xf0]  ;;  %v6552_v2 = vld [vmem:[%s7371_s16 + $0xcc] sm:$0xf] }
 0x4c8   : > { %4179 = vmatpush.bf16.msrb.mxu2 %v5857_v18  ;;  %4192 = vmatpush.bf16.msrb.mxu3 %v5985_v20  ;;  %v6570_v18 = vld [vmem:[%s7371_s16 + $0x154] sm:$0xf0]  ;;  %v6032_v20 = vld [vmem:[%s7371_s16 + $0x248] sm:$0xf]  ;;  %v5842_v4 = vld [vmem:[%s7371_s16 + $0xd8] sm:$0xf0] }
 0x4c9   : > { %4205 = vmatpush.bf16.msra.mxu0 %v6113_v27  ;;  %4218 = vmatpush.bf16.msra.mxu1 %v6241_v28  ;;  %v6634_v27 = vld [vmem:[%s7371_s16 + $0x354] sm:$0xf0]  ;;  %v5777_v28 = vor.u32 %v6538_v40, %v5776_v13  ;;  %v5905_v12 = vor.u32 %v6570_v18, %v5904_v17  ;;  %v6033_v32 = vor.u32 %v6602_v24, %v6032_v20  ;;  %v6584_v6 = vld [vmem:[%s7371_s16 + $0x1cc] sm:$0xf]  ;;  %v6098_v13 = vld [vmem:[%s7371_s16 + $0x2d8] sm:$0xf0] }
 0x4ca   : > { %v6161_v34 = vor.u32 %v6634_v27, %v6160_v25  ;;  %v6648_v40 = vld [vmem:[%s7371_s16 + $0x3cc] sm:$0xf]  ;;  %v5826_v20 = vld [vmem:[%s7371_s16 + $0xb8] sm:$0xf0] }
 0x4cb   : > { %v6548_v18 = vld [vmem:[%s7371_s16 + $0xac] sm:$0xf]  ;;  %v6194_v60 = vld [vmem:[%s7371_s16 + $0x398] sm:$0xf0] }
 0x4cc   : > { %4180 = vmatpush.bf16.msrb.mxu2 %v5841_v36  ;;  %4193 = vmatpush.bf16.msrb.mxu3 %v5969_v38  ;;  %v6566_v36 = vld [vmem:[%s7371_s16 + $0x134] sm:$0xf0]  ;;  %v6016_v38 = vld [vmem:[%s7371_s16 + $0x228] sm:$0xf]  ;;  %v6580_v27 = vld [vmem:[%s7371_s16 + $0x1ac] sm:$0xf] }
 0x4cd   : > { %4206 = vmatpush.bf16.msra.mxu0 %v6097_v41  ;;  %4219 = vmatpush.bf16.msra.mxu1 %v6225_v42  ;;  %v6630_v41 = vld [vmem:[%s7371_s16 + $0x334] sm:$0xf0]  ;;  %v5744_v42 = vld [vmem:[%s7371_s16 + $0x8] sm:$0xf]  ;;  %v5889_v11 = vor.u32 %v6566_v36, %v5888_v35  ;;  %v6017_v53 = vor.u32 %v6598_v37, %v6016_v38  ;;  %v6544_v36 = vld [vmem:[%s7371_s16 + $0x8c] sm:$0xf] }
 0x4ce   : > { %v5745_v55 = vor.u32 %v6530_v0, %v5744_v42  ;;  %v5810_v38 = vld [vmem:[%s7371_s16 + $0x98] sm:$0xf0]  ;;  %v6640_v0 = vld [vmem:[%s7371_s16 + $0x38c] sm:$0xf] }
 0x4cf   : > { %v5938_v42 = vld [vmem:[%s7371_s16 + $0x198] sm:$0xf0]  ;;  %v5813_v3 = vor.u32 %v6544_v36, %v5810_v38  ;;  %v6636_v51 = vld [vmem:[%s7371_s16 + $0x36c] sm:$0xf] }
 0x4d0   : > { %4181 = vmatpush.bf16.msrb.mxu2 %v5825_v33  ;;  %4194 = vmatpush.bf16.msrb.mxu3 %v5953_v45  ;;  %v6145_v33 = vor.u32 %v6630_v41, %v6144_v10  ;;  %v6000_v45 = vld [vmem:[%s7371_s16 + $0x208] sm:$0xf]  ;;  %v6576_v41 = vld [vmem:[%s7371_s16 + $0x18c] sm:$0xf]  ;;  %v6050_v50 = vld [vmem:[%s7371_s16 + $0x278] sm:$0xf0] }
 0x4d1   : > { %4207 = vmatpush.bf16.msra.mxu0 %v6081_v49  ;;  %4220 = vmatpush.bf16.msra.mxu1 %v6209_v61  ;;  %v6626_v49 = vld [vmem:[%s7371_s16 + $0x314] sm:$0xf0]  ;;  %v6556_v61 = vld [vmem:[%s7371_s16 + $0xec] sm:$0xf]  ;;  %v6001_v63 = vor.u32 %v6594_v46, %v6000_v45  ;;  %v5794_v45 = vld [vmem:[%s7371_s16 + $0x78] sm:$0xf0] }
 0x4d2   : > { %v6002_v36 = vld [vmem:[%s7371_s16 + $0x218] sm:$0xf0]  ;;  %v6624_v38 = vld [vmem:[%s7371_s16 + $0x30c] sm:$0xf] }
 0x4d4   : > { %4182 = vmatpush.bf16.msrb.mxu2 %v5809_v56  ;;  %4195 = vmatpush.bf16.msrb.mxu3 %v5937_v57  ;;  %v6114_v56 = vld [vmem:[%s7371_s16 + $0x2f8] sm:$0xf0]  ;;  %v6652_v57 = vld [vmem:[%s7371_s16 + $0x3ec] sm:$0xf] }
 0x4d5   : > { %4208 = vmatpush.bf16.msra.mxu0 %v6065_v1  ;;  %4221 = vmatpush.bf16.msra.mxu1 %v6193_v30  ;;  %v6129_v1 = vor.u32 %v6626_v49, %v6128_v47  ;;  %v5861_v30 = vor.u32 %v6556_v61, %v5858_v9  ;;  %v6117_v5 = vor.u32 %v6620_v52, %v6114_v56  ;;  %v6572_v49 = vld [vmem:[%s7371_s16 + $0x16c] sm:$0xf]  ;;  %v5922_v61 = vld [vmem:[%s7371_s16 + $0x178] sm:$0xf0] }
 0x4d6   : > { %4135 = vmatmul.bf16.vlgmr.msra.gmra.mxu2 %v8329_v21  ;;  %4148 = vmatmul.bf16.vlgmr.msra.gmra.mxu3 %v8333_v48  ;;  %v6245_v26 = vor.u32 %v6652_v57, %v6242_v59  ;;  %v6197_v47 = vor.u32 %v6640_v0, %v6194_v60  ;;  %v6604_v9 = vld [vmem:[%s7371_s16 + $0x26c] sm:$0xf]  ;;  %v6178_v52 = vld [vmem:[%s7371_s16 + $0x378] sm:$0xf0] }
 0x4d7   : > { %4161 = vmatmul.bf16.vlgmr.msrb.gmra.mxu0 %v8337_v22  ;;  %4174 = vmatmul.bf16.vlgmr.msrb.gmra.mxu1 %v8341_v23  ;;  %v6536_v56 = vld [vmem:[%s7371_s16 + $0x4c] sm:$0xf]  ;;  %v5778_v57 = vld [vmem:[%s7371_s16 + $0x58] sm:$0xf0]  ;;  %v6053_v59 = vor.u32 %v6604_v9, %v6050_v50 }
 0x4d8   : > { %4183 = vmatpush.bf16.msrb.mxu2 %v5793_v7  ;;  %4196 = vmatpush.bf16.msrb.mxu3 %v5921_v8  ;;  %v5970_v7 = vld [vmem:[%s7371_s16 + $0x1d8] sm:$0xf0]  ;;  %v6616_v8 = vld [vmem:[%s7371_s16 + $0x2cc] sm:$0xf] }
 0x4d9   : > { %4209 = vmatpush.bf16.msra.mxu0 %v6049_v15  ;;  %4222 = vmatpush.bf16.msra.mxu1 %v6177_v16  ;;  %v6226_v15 = vld [vmem:[%s7371_s16 + $0x3d8] sm:$0xf0]  ;;  %v5845_v16 = vor.u32 %v6552_v2, %v5842_v4  ;;  %v5973_v17 = vor.u32 %v6584_v6, %v5970_v7  ;;  %v6101_v24 = vor.u32 %v6616_v8, %v6098_v13  ;;  %v6632_v4 = vld [vmem:[%s7371_s16 + $0x34c] sm:$0xf] }
 0x4da   : > { %v6229_v25 = vor.u32 %v6648_v40, %v6226_v15  ;;  %v6034_v2 = vld [vmem:[%s7371_s16 + $0x258] sm:$0xf0]  ;;  %v6532_v7 = vld [vmem:[%s7371_s16 + $0x2c] sm:$0xf] }
 0x4db   : > { %v5762_v8 = vld [vmem:[%s7371_s16 + $0x38] sm:$0xf0]  ;;  %v6564_v15 = vld [vmem:[%s7371_s16 + $0x12c] sm:$0xf] }
 0x4dc   : > { %4184 = vmatpush.bf16.msrb.mxu2 %v5777_v28  ;;  %4197 = vmatpush.bf16.msrb.mxu3 %v5905_v12  ;;  %v5954_v28 = vld [vmem:[%s7371_s16 + $0x1b8] sm:$0xf0]  ;;  %v6612_v12 = vld [vmem:[%s7371_s16 + $0x2ac] sm:$0xf] }
 0x4dd   : > { %4210 = vmatpush.bf16.msra.mxu0 %v6033_v32  ;;  %4223 = vmatpush.bf16.msra.mxu1 %v6161_v34  ;;  %v6210_v32 = vld [vmem:[%s7371_s16 + $0x3b8] sm:$0xf0]  ;;  %v5829_v34 = vor.u32 %v6548_v18, %v5826_v20  ;;  %v5957_v35 = vor.u32 %v6580_v27, %v5954_v28  ;;  %v6085_v37 = vor.u32 %v6612_v12, %v6082_v29  ;;  %v6628_v20 = vld [vmem:[%s7371_s16 + $0x32c] sm:$0xf] }
 0x4de   : > { %v6213_v10 = vor.u32 %v6644_v31, %v6210_v32  ;;  %v6018_v18 = vld [vmem:[%s7371_s16 + $0x238] sm:$0xf0]  ;;  %v6528_v28 = vld [vmem:[%s7371_s16 + $0xc] sm:$0xf] }
 0x4df   : > { %v5746_v12 = vld [vmem:[%s7371_s16 + $0x18] sm:$0xf0]  ;;  %v6560_v32 = vld [vmem:[%s7371_s16 + $0x10c] sm:$0xf] }
 0x4e0   : > { %4185 = vmatpush.bf16.msrb.mxu2 %v5761_v43  ;;  %4198 = vmatpush.bf16.msrb.mxu3 %v5889_v11  ;;  %v6608_v43 = vld [vmem:[%s7371_s16 + $0x28c] sm:$0xf]  ;;  %v6066_v11 = vld [vmem:[%s7371_s16 + $0x298] sm:$0xf0] }
 0x4e1   : > { %4211 = vmatpush.bf16.msra.mxu0 %v6017_v53  ;;  %4224 = vmatpush.bf16.msra.mxu1 %v6145_v33  ;;  %v5941_v53 = vor.u32 %v6576_v41, %v5938_v42  ;;  %v6540_v33 = vld [vmem:[%s7371_s16 + $0x6c] sm:$0xf]  ;;  %v6069_v46 = vor.u32 %v6608_v43, %v6066_v11  ;;  %v3425_v11 = vld [vmem:[%s800_s25] sm:$0xf] }
 0x4e4   : > { %4186 = vmatpush.bf16.msrb.mxu2 %v5745_v55  ;;  %4199 = vmatpush.bf16.msrb.mxu3 %v5873_v58  ;;  %v5797_v55 = vor.u32 %v6540_v33, %v5794_v45  ;;  %v5925_v58 = vor.u32 %v6572_v49, %v5922_v61 }
 0x4e5   : > { %4212 = vmatpush.bf16.msra.mxu0 %v6001_v63  ;;  %4225 = vmatpush.bf16.msra.mxu1 %v6129_v1  ;;  %v6181_v63 = vor.u32 %v6636_v51, %v6178_v52  ;;  %v6568_v1 = vld [vmem:[%s7371_s16 + $0x14c] sm:$0xf] }
 0x4e7   : > { %4187 = vmatmul.bf16.vlgmr.msrb.gmra.mxu2 %v8329_v21  ;;  %4200 = vmatmul.bf16.vlgmr.msrb.gmra.mxu3 %v8333_v48 }
 0x4e8   : > { %4231 = vmatpush.bf16.msra.mxu2 %v5861_v30  ;;  %4244 = vmatpush.bf16.msra.mxu3 %v5989_v62  ;;  %v5906_v30 = vld [vmem:[%s7371_s16 + $0x158] sm:$0xf0]  ;;  %v6600_v62 = vld [vmem:[%s7371_s16 + $0x24c] sm:$0xf] }
 0x4e9   : > { %4257 = vmatpush.bf16.msrb.mxu0 %v6117_v5  ;;  %4270 = vmatpush.bf16.msrb.mxu1 %v6245_v26  ;;  %v6162_v5 = vld [vmem:[%s7371_s16 + $0x358] sm:$0xf0]  ;;  %v5781_v26 = vor.u32 %v6536_v56, %v5778_v57  ;;  %v5909_v6 = vor.u32 %v6568_v1, %v5906_v30  ;;  %v6037_v13 = vor.u32 %v6600_v62, %v6034_v2 }
 0x4ea   : > { %4213 = vmatmul.bf16.vlgmr.msra.gmra.mxu0 %v8337_v22  ;;  %4226 = vmatmul.bf16.vlgmr.msra.gmra.mxu1 %v8341_v23  ;;  %v6165_v40 = vor.u32 %v6632_v4, %v6162_v5  ;;  %v3428_v5 = vperm.slane %v3425_v11, 1 }
 0x4ec   : > { %4232 = vmatpush.bf16.msra.mxu2 %v5845_v16  ;;  %4245 = vmatpush.bf16.msra.mxu3 %v5973_v17  ;;  %v5890_v16 = vld [vmem:[%s7371_s16 + $0x138] sm:$0xf0]  ;;  %v6596_v17 = vld [vmem:[%s7371_s16 + $0x22c] sm:$0xf] }
 0x4ed   : > { %4258 = vmatpush.bf16.msrb.mxu0 %v6101_v24  ;;  %4271 = vmatpush.bf16.msrb.mxu1 %v6229_v25  ;;  %v6146_v24 = vld [vmem:[%s7371_s16 + $0x338] sm:$0xf0]  ;;  %v5765_v25 = vor.u32 %v6532_v7, %v5762_v8  ;;  %v5893_v27 = vor.u32 %v6564_v15, %v5890_v16  ;;  %v6021_v29 = vor.u32 %v6596_v17, %v6018_v18 }
 0x4ee   : > { %v6149_v31 = vor.u32 %v6628_v20, %v6146_v24  ;;  %v3430_v20 = vperm.slane %v3425_v11, 3 }
 0x4f0   : > { %4233 = vmatpush.bf16.msra.mxu2 %v5829_v34  ;;  %4246 = vmatpush.bf16.msra.mxu3 %v5957_v35  ;;  %v5874_v34 = vld [vmem:[%s7371_s16 + $0x118] sm:$0xf0]  ;;  %v6592_v35 = vld [vmem:[%s7371_s16 + $0x20c] sm:$0xf] }
 0x4f1   : > { %4259 = vmatpush.bf16.msrb.mxu0 %v6085_v37  ;;  %4272 = vmatpush.bf16.msrb.mxu1 %v6213_v10  ;;  %v6130_v37 = vld [vmem:[%s7371_s16 + $0x318] sm:$0xf0]  ;;  %v5749_v10 = vor.u32 %v6528_v28, %v5746_v12  ;;  %v5877_v41 = vor.u32 %v6560_v32, %v5874_v34  ;;  %v6005_v42 = vor.u32 %v6592_v35, %v6002_v36 }
 0x4f2   : > { %v6133_v43 = vor.u32 %v6624_v38, %v6130_v37 }
 0x4f4   : > { %4234 = vmatpush.bf16.msra.mxu2 %v5813_v3  ;;  %4247 = vmatpush.bf16.msra.mxu3 %v5941_v53  ;;  %v3427_v3 = vperm.slane %v3425_v11, 0 }
 0x4f5   : > { %4260 = vmatpush.bf16.msrb.mxu0 %v6069_v46  ;;  %4273 = vmatpush.bf16.msrb.mxu1 %v6197_v47 }
 0x4f8   : > { %4235 = vmatpush.bf16.msra.mxu2 %v5797_v55  ;;  %4248 = vmatpush.bf16.msra.mxu3 %v5925_v58 }
 0x4f9   : > { %4261 = vmatpush.bf16.msrb.mxu0 %v6053_v59  ;;  %4274 = vmatpush.bf16.msrb.mxu1 %v6181_v63 }
 0x4fc   : > { %4236 = vmatpush.bf16.msra.mxu2 %v5781_v26  ;;  %4249 = vmatpush.bf16.msra.mxu3 %v5909_v6  ;;  %v3429_v26 = vperm.slane %v3425_v11, 2 }
 0x4fd   : > { %4262 = vmatpush.bf16.msrb.mxu0 %v6037_v13  ;;  %4275 = vmatpush.bf16.msrb.mxu1 %v6165_v40 }
 0x500   : > { %4237 = vmatpush.bf16.msra.mxu2 %v5765_v25  ;;  %4250 = vmatpush.bf16.msra.mxu3 %v5893_v27 }
 0x501   : > { %4263 = vmatpush.bf16.msrb.mxu0 %v6021_v29  ;;  %4276 = vmatpush.bf16.msrb.mxu1 %v6149_v31 }
 0x504   : > { %4238 = vmatpush.bf16.msra.mxu2 %v5749_v10  ;;  %4251 = vmatpush.bf16.msra.mxu3 %v5877_v41 }
 0x505   : > { %4264 = vmatpush.bf16.msrb.mxu0 %v6005_v42  ;;  %4277 = vmatpush.bf16.msrb.mxu1 %v6133_v43 }
 0x507   : > { %4239 = vmatmul.bf16.vlgmr.msra.gmra.mxu2 %v8329_v21  ;;  %4252 = vmatmul.bf16.vlgmr.msra.gmra.mxu3 %v8333_v48 }
 0x508   : > { %4265 = vmatmul.bf16.vlgmr.msrb.gmra.mxu0 %v8337_v22  ;;  %4278 = vmatmul.bf16.vlgmr.msrb.gmra.mxu1 %v8341_v23 }
 0x544   : > { %v4110_v0 = vpop.f32.mrf.mxu0  ;;  %v4123_v60 = vpop.f32.mrf.mxu1 }
 0x549   : > { %v4084_v53 = vpop.f32.mrf.mxu2  ;;  %v4097_v33 = vpop.f32.mrf.mxu3 }
 0x54a   : > { %v4085_v45 = vadd.f32 %v4084_v53, %v3427_v3 }
 0x54c   : > { %v4098_v46 = vadd.f32 %v4097_v33, %v4085_v45  ;;  %v4112_v47 = vpop.f32.mrf.mxu0  ;;  %v4125_v21 = vpop.f32.mrf.mxu1 }
 0x54e   : > { %v4111_v49 = vadd.f32 %v4110_v0, %v4098_v46 }
 0x550   : > { %v4124_v48 = vadd.f32 %v4123_v60, %v4111_v49 }
 0x551   : > { %v4086_v61 = vpop.f32.mrf.mxu2  ;;  %v4099_v22 = vpop.f32.mrf.mxu3 }
 0x552   : > { %v4283_v29 = vmax.f32 %v4124_v48, 0.0 }
 0x554   : > { %v4162_v9 = vpop.f32.mrf.mxu0  ;;  %v4175_v23 = vpop.f32.mrf.mxu1  ;;  %v4287_v37 = vadd.f32 %v4283_v29, %v8316_v14 }
 0x559   : > { %v4136_v50 = vpop.f32.mrf.mxu2  ;;  %v4149_v51 = vpop.f32.mrf.mxu3 }
 0x55a   : > { %v4137_v6 = vadd.f32 %v4136_v50, %v3428_v5 }
 0x55c   : > { %v4164_v52 = vpop.f32.mrf.mxu0  ;;  %v4177_v55 = vpop.f32.mrf.mxu1  ;;  %v4150_v8 = vadd.f32 %v4149_v51, %v4137_v6 }
 0x55e   : > { %v4163_v40 = vadd.f32 %v4162_v9, %v4150_v8 }
 0x560   : > { %v4176_v18 = vadd.f32 %v4175_v23, %v4163_v40 }
 0x561   : > { %v4138_v58 = vpop.f32.mrf.mxu2  ;;  %v4151_v56 = vpop.f32.mrf.mxu3 }
 0x562   : > { %v4284_v28 = vmax.f32 %v4176_v18, 0.0  ;;  %v4326_v56 = vld [vmem:[%s804_s26] sm:$0xf] }
 0x564   : > { %v4288_v36 = vadd.f32 %v4284_v28, %v8318_v54 }
 0x566   : > { %v4291_v0 = vadd.f32 %v4288_v36, %v4287_v37 }
 0x567   : > { %v4214_v57 = vpop.f32.mrf.mxu0  ;;  %v4227_v59 = vpop.f32.mrf.mxu1 }
 0x56a   : > { %v4188_v63 = vpop.f32.mrf.mxu2  ;;  %v4201_v1 = vpop.f32.mrf.mxu3 }
 0x56b   : > { %v4189_v7 = vadd.f32 %v4188_v63, %v3429_v26  ;;  %v4328_v63 = vperm.slane %v4326_v56, 0 }
 0x56d   : > { %v4202_v13 = vadd.f32 %v4201_v1, %v4189_v7  ;;  %v4329_v1 = vperm.slane %v4326_v56, 1 }
 0x56f   : > { %v4216_v30 = vpop.f32.mrf.mxu0  ;;  %v4229_v62 = vpop.f32.mrf.mxu1  ;;  %v4215_v15 = vadd.f32 %v4214_v57, %v4202_v13 }
 0x570   : > { %v4330_v30 = vperm.slane %v4326_v56, 2  ;;  %v4331_v62 = vperm.slane %v4326_v56, 3 }
 0x571   : > { %v4228_v24 = vadd.f32 %v4227_v59, %v4215_v15  ;;  %v4340_v59 = vld [vmem:[%s808_s15] sm:$0xf]  ;;  %s8673_s15 = sld [smem:[#allocation46_spill]] }
 0x572   : > { %v4190_v2 = vpop.f32.mrf.mxu2  ;;  %v4203_v4 = vpop.f32.mrf.mxu3  ;;  %v4343_v5 = vperm.slane %v4340_v59, 1  ;;  %v4344_v26 = vperm.slane %v4340_v59, 2  ;;  %v4345_v40 = vperm.slane %v4340_v59, 3 }
 0x573   : > { %v4285_v31 = vmax.f32 %v4228_v24, 0.0  ;;  %v4342_v4 = vperm.slane %v4340_v59, 0 }
 0x575   : > { %v4289_v41 = vadd.f32 %v4285_v31, %v8320_v39 }
 0x577   : > { %v4292_v3 = vadd.f32 %v4291_v0, %v4289_v41  ;;  %s4370_s0 = scalar_lea.hbm %s8673_s15, %s6655_s27  ;;  %s6943_s9 = scalar_lea.hbm %s8673_s15, 64 }
 0x578   : > { %s4374_s30 = sshll.u32 %s4370_s0, 4  ;;  %s4375_s30 = int_to_ptr.hbm [resolvable:$true] %s4374_s30 }
 0x579   : > { %s6937_s5 = sshra.s32 %s4375_s30, 4  ;;  %s6938_s5 = int_to_ptr.hbm [resolvable:$true] %s6937_s5 }
 0x57a   : > { %s6939_s4 = scalar_lea.hbm %s6938_s5, 32  ;;  %p6944_p5 = scmp.lt.s32.totalorder %s6938_s5, %s8673_s15 }
 0x57b   : > { %p6940_p2 = scmp.ne.s32.totalorder %s6938_s5, %s6939_s4  ;;  %p6945_p0 = scmp.lt.s32.totalorder %s6943_s9, %s6939_s4 }
 0x57d   : > { %p6941_p3 = pnand %p6940_p2, %p7304_p12  ;;  %p6946_p7 = por %p6945_p0, %p6944_p5 }
 0x57f   : > { %p6942_p1 = pneg %p6941_p3 }
 0x581   : > { %p6947_p8 = pnand %p6946_p7, %p6942_p1 }
 0x585   : > { %v4266_v16 = vpop.f32.mrf.mxu0  ;;  %v4279_v17 = vpop.f32.mrf.mxu1 }
 0x58a   : > { %v4240_v25 = vpop.f32.mrf.mxu2  ;;  %v4253_v27 = vpop.f32.mrf.mxu3 }
 0x58b   : > { %v4241_v12 = vadd.f32 %v4240_v25, %v3430_v20 }
 0x58d   : > { %v4254_v32 = vadd.f32 %v4253_v27, %v4241_v12  ;;  %v4268_v34 = vpop.f32.mrf.mxu0  ;;  %v4281_v35 = vpop.f32.mrf.mxu1 }
 0x58f   : > { %v4267_v38 = vadd.f32 %v4266_v16, %v4254_v32 }
 0x591   : > { %v4280_v10 = vadd.f32 %v4279_v17, %v4267_v38 }
 0x592   : > { %v4242_v42 = vpop.f32.mrf.mxu2  ;;  %v4255_v43 = vpop.f32.mrf.mxu3 }
 0x593   : > { %v4286_v11 = vmax.f32 %v4280_v10, 0.0 }
 0x595   : > { %v4290_v60 = vadd.f32 %v4286_v11, %v8322_v44 }
 0x597   : > { %v4293_v53 = vadd.f32 %v4292_v3, %v4290_v60 }
 0x599   : > { %4294 = vadd.xlane.f32.xlu1 %v4293_v53 }
 0x60c   : > { %v4295_v33 = vpop.xlane.xlu1 %4294 }
 0x60d   : > { %v4296_v45 = vmul.f32 %v4295_v33, %v8187_v19 }
 0x60f   : > { %v4297_v46 = vsub.f32 %v4287_v37, %v4296_v45  ;;  %v4298_v54 = vsub.f32 %v4288_v36, %v4296_v45  ;;  %v4299_v47 = vsub.f32 %v4289_v41, %v4296_v45  ;;  %v4300_v21 = vsub.f32 %v4290_v60, %v4296_v45 }
 0x611   : > { %v4301_v14 = vmul.f32 %v4297_v46, %v4297_v46  ;;  %v4302_v49 = vmul.f32 %v4298_v54, %v4298_v54  ;;  %v4303_v39 = vmul.f32 %v4299_v47, %v4299_v47  ;;  %v4304_v61 = vmul.f32 %v4300_v21, %v4300_v21 }
 0x613   : > { %v4305_v48 = vadd.f32 %v4302_v49, %v4301_v14 }
 0x615   : > { %v4306_v22 = vadd.f32 %v4305_v48, %v4303_v39 }
 0x617   : > { %v4307_v9 = vadd.f32 %v4306_v22, %v4304_v61 }
 0x619   : > { %4308 = vadd.xlane.f32.xlu2 %v4307_v9 }
 0x68c   : > { %v4309_v44 = vpop.xlane.xlu2 %4308 }
 0x68d   : > { %v4310_v23 = vmul.f32 %v4309_v44, %v8187_v19 }
 0x68f   : > { %v4311_v50 = vadd.f32 1e-05, %v4310_v23 }
 0x691   : > { %6797 = vrsqrt.f32 %v4311_v50  ;;  %vm4318_vm9 = vweird.f32 %v4311_v50 }
 0x697   : > { %v6798_v51 = vpop.eup %6797 }
 0x698   : > { %v4313_v52 = vmul.f32 %v6798_v51, %v4311_v50  ;;  %vm4319_vm8 = vweird.f32 %v6798_v51 }
 0x699   : > { %vm4320_vm10 = vmor %vm4318_vm9, %vm4319_vm8 }
 0x69a   : > { %v4314_v55 = vmul.f32 %v6798_v51, %v4313_v52 }
 0x69c   : > { %v4315_v58 = vmul.f32 0.5, %v4314_v55 }
 0x69e   : > { %v4316_v57 = vsub.f32 1.5, %v4315_v58 }
 0x6a0   : > { %v4317_v19 = vmul.f32 %v6798_v51, %v4316_v57 }
 0x6a2   : > { %v4321_v2 = vsel %vm4320_vm10, %v6798_v51, %v4317_v19 }
 0x6a3   : > { %v4322_v6 = vmul.f32 %v4321_v2, %v4297_v46  ;;  %v4323_v7 = vmul.f32 %v4321_v2, %v4298_v54  ;;  %v4324_v8 = vmul.f32 %v4321_v2, %v4299_v47  ;;  %v4325_v13 = vmul.f32 %v4321_v2, %v4300_v21 }
 0x6a5   : > { %v4336_v15 = vmul.f32 %v4328_v63, %v4322_v6  ;;  %v4337_v16 = vmul.f32 %v4329_v1, %v4323_v7  ;;  %v4338_v17 = vmul.f32 %v4330_v30, %v4324_v8  ;;  %v4339_v18 = vmul.f32 %v4331_v62, %v4325_v13 }
 0x6a7   : > { %v4350_v20 = vadd.f32 %v4342_v4, %v4336_v15  ;;  %v4351_v24 = vadd.f32 %v4343_v5, %v4337_v16  ;;  %v4352_v25 = vadd.f32 %v4344_v26, %v4338_v17  ;;  %v4353_v27 = vadd.f32 %v4345_v40, %v4339_v18 }
 0x6a9   : > { %4354 = vst [vmem:[%s7415_s24] sm:$0xff] %v4350_v20 }
 0x6aa   : > { %4355 = vst [vmem:[%s7415_s24 + $0x8] sm:$0xff] %v4351_v24 }
 0x6ab   : > { %4356 = vst [vmem:[%s7415_s24 + $0x10] sm:$0xff] %v4352_v25 }
 0x6ac   : > { %4357 = vst [vmem:[%s7415_s24 + $0x18] sm:$0xff] %v4353_v27 }
 0x6ad   : > { %6950 = shalt.err (!%p6947_p8)
}
 0x6ae   : > { %6664 = dma.vmem_to_hbm [thread:$0]  (%p7304_p12), %s4373_s21, 512, %s4375_s30, %s4359_s13  }
 0x6af PF: > { %s8675_s1 = sld [smem:[#allocation23_spill]] }
 0x6b0   : > { %s8676_s24 = sld [smem:[#allocation17_spill]] }
 0x6b5   : > { %p6684_p10 = scmp.ge.s32.totalorder %s8675_s1, 2 }
 0x6b6   : > { %s4386_s19 = sand.u32 1, %s8676_s24  }
 0x6b7   : > { %p6680_p13 = pnand %p6684_p10, %p7315_p4  ;;  %s4387_s10 = scalar_lea.sflag [#allocation4], %s4386_s19 }
 0x6b9   : > { %p6681_p6 = pneg %p6680_p13 }
 0x6bb   : > { %7008 = dma.done.wait (%p6681_p6), %s4387_s10, 512  }
 0x6bc   : > { %7010 = vsyncadd (%p6681_p6), %s4387_s10, 4294966784  ;;  %s38_s0 = sadd.s32 1, %s8675_s1   ;;  %s8678_s21 = sld [smem:[#allocation15_spill]] }
 0x6bd   : > { %p35_p9 = scmp.ge.s32.totalorder %s38_s0, 6   ;;  %s8679_s22 = sld [smem:[#allocation16_spill]] }
 0x6be   : > { %s8680_s23 = sld [smem:[#allocation25_spill]] }
 0x6bf   : > { %s8681_s24 = sld [smem:[#allocation18_spill]] }
 0x6c0   : > { %s8682_s25 = sld [smem:[#allocation19_spill]] }
 0x6c1   : > { %s8683_s26 = sld [smem:[#allocation28_spill]]  ;;  %37 = sbr.rel (!%p35_p9) target bundleno = 31 (0x1f), region = 194 }
 0x6c2   : > { %s8684_s27 = sld [smem:[#allocation21_spill]] }
 0x6c3   : > { %s8685_s28 = sld [smem:[#allocation22_spill]] }
 0x6c4   : > { %s8686_s29 = sld [smem:[#allocation24_spill]] }
 0x6c5   : > { %s8687_s30 = sld [smem:[#allocation26_spill]] }
 0x6c6   :  { %4393 = vsyncpa [#allocation3], 1 }
 0x6c7   :  { %4395 = vsyncpa [#allocation3 + $0x1], 1 }
 0x6c8   :  { %4396 = vsyncpa [#allocation6], 1 }
 0x6c9   :  { %4398 = vsyncpa [#allocation6 + $0x1], 1 }
 0x6ca   :  { %4399 = vsyncpa [#allocation9], 1 }
 0x6cb   :  { %4401 = vsyncpa [#allocation9 + $0x1], 1 }
 0x6cc   :  { %4402 = vsyncpa [#allocation4], 1 }
 0x6cd   :  { %4404 = vsyncpa [#allocation4 + $0x1], 1 }

</bundles_post_ra>
